<compile_context>
chip_gen: v7x
topology: tpu7x:2x2x1
jax: 0.10.0
libtpu: 0.0.40
codegen_flags: <defaults>
</compile_context>

<pallas_src>
import functools

import jax
import jax.numpy as jnp
from jax import lax
from jax.experimental import pallas as pl
from jax.experimental.pallas import tpu as pltpu


# ---------------------------------------------------------------------------
# Kernel factory
# ---------------------------------------------------------------------------
def _make_block_ir_kernel(H, W, Cin, Cm, stride, dim_match):
    Ho = H // stride
    PADL = 8                    # zero-pad columns on each side (keeps all stores 8-aligned)
    PW = W + 2 * PADL           # padded scratch width

    def conv3x3(pad_ref, w_ref, cin, n_rows, row_stride):
        """3x3 conv as 9 shifted-window matmuls; accumulates (n_rows*W, Cout) in f32.

        pad_ref holds the input with data at rows [1:H+1], cols [PADL:PADL+W] and zero
        borders.  Output rows are taken every `row_stride` rows (n_rows of them); the
        width is kept dense (the wrapper subsamples columns when stride > 1).
        """
        cout = w_ref.shape[-1]
        acc = jnp.zeros((n_rows * W, cout), jnp.float32)
        for dy in range(3):
            for dx in range(3):
                win = pad_ref[dy:dy + row_stride * n_rows,
                              PADL - 1 + dx:PADL - 1 + dx + W, :]     # (rs*n, W, cin) f32
                if row_stride > 1:
                    win = win.reshape(n_rows, row_stride, W, cin)[:, 0]
                win = win.reshape(n_rows * W, cin).astype(jnp.bfloat16)
                acc = acc + jnp.dot(win, w_ref[dy, dx],               # bf16 x bf16 -> f32
                                    preferred_element_type=jnp.float32)
        return acc

    def kernel(x_ref, w1_ref, w2_ref, wd_ref,
               s1_ref, b1_ref, s2_ref, b2_ref, s3_ref, b3_ref,
               sd_ref, bd_ref, alpha_ref,
               out_ref, pad1_ref, pad2_ref):
        # ---- zero only the halo borders (interior is fully overwritten every step) ----
        for p_ref, c in ((pad1_ref, Cin), (pad2_ref, Cm)):
            p_ref[0:1, :, :] = jnp.zeros((1, PW, c), jnp.float32)
            p_ref[H + 1:H + 2, :, :] = jnp.zeros((1, PW, c), jnp.float32)
            p_ref[1:H + 1, 0:PADL, :] = jnp.zeros((H, PADL, c), jnp.float32)
            p_ref[1:H + 1, PADL + W:PW, :] = jnp.zeros((H, PADL, c), jnp.float32)

        x = x_ref[0]                                        # (H, W, Cin) bf16

        # ---- bn1 (folded affine, f32) -> padded scratch ----
        h = x.astype(jnp.float32) * s1_ref[...] + b1_ref[...]
        pad1_ref[1:H + 1, PADL:PADL + W, :] = h

        # ---- conv1: 3x3, stride 1 ----
        a = conv3x3(pad1_ref, w1_ref, Cin, H, 1)            # (H*W, Cm) f32

        # ---- bn2 + PReLU (per-channel alpha) ----
        a = a * s2_ref[...] + b2_ref[...]
        a = jnp.where(a > 0, a, alpha_ref[...] * a)
        pad2_ref[1:H + 1, PADL:PADL + W, :] = a.reshape(H, W, Cm)

        # ---- conv2: 3x3, only the Ho surviving rows; width kept dense ----
        y = conv3x3(pad2_ref, w2_ref, Cm, Ho, stride)       # (Ho*W, Cm) f32
        y = y * s3_ref[...] + b3_ref[...]                   # bn3

        # ---- residual path ----
        if dim_match:
            res = x.astype(jnp.float32).reshape(H * W, Cin)  # identity (stride==1, Cin==Cm)
        else:
            xr = x
            if stride > 1:
                xr = xr.reshape(Ho, stride, W, Cin)[:, 0]    # rows at `stride`
            r = jnp.dot(xr.reshape(Ho * W, Cin), wd_ref[...],
                        preferred_element_type=jnp.float32)  # 1x1 conv (width dense)
            res = r * sd_ref[...] + bd_ref[...]              # downsample BatchNorm

        # ---- add + lane-dense store: (Cm, Ho*W), minor dim = Ho*W ----
        out_ref[0] = jnp.swapaxes(y + res, 0, 1).astype(out_ref.dtype)

    return kernel


# ---------------------------------------------------------------------------
# Wrapper (glue): BN folding, bf16 casts, pallas_call, NHWC restore
# ---------------------------------------------------------------------------
def block_ir_forward(x, params, *, stride, dim_match):
    """BlockIR forward. x: (B, H, W, Cin) float32 NHWC -> (B, H//stride, W//stride, planes)."""
    B, H, W, Cin = x.shape
    Cm = params["w1"].shape[-1]
    assert H % stride == 0 and W % stride == 0
    assert W % 8 == 0, "kernel assumes W is a multiple of 8"
    if dim_match:
        assert stride == 1 and Cin == Cm, "dim_match requires identity-compatible shapes"
    Ho = H // stride
    PADL = 8

    bf16 = jnp.bfloat16
    row2d = lambda v: v.reshape(1, -1).astype(jnp.float32)
    args = (
        x.astype(bf16),                                   # activations in bf16 (f32 accum)
        params["w1"].astype(bf16),                        # (3, 3, Cin, Cm) HWIO
        params["w2"].astype(bf16),                        # (3, 3, Cm, Cm)  HWIO
        params["wd"].astype(bf16),                        # (Cin, Cm) 1x1 downsample
        row2d(params["s1"]), row2d(params["b1"]),
        row2d(params["s2"]), row2d(params["b2"]),
        row2d(params["s3"]), row2d(params["b3"]),
        row2d(params["sd"]), row2d(params["bd"]),
        row2d(params["alpha"]),
    )

    def full_spec(a):
        n = a.ndim
        return pl.BlockSpec(a.shape, lambda b, n=n: (0,) * n)

    in_specs = [pl.BlockSpec((1, H, W, Cin), lambda b: (b, 0, 0, 0))]
    in_specs += [full_spec(a) for a in args[1:]]

    kernel = _make_block_ir_kernel(H, W, Cin, Cm, stride, dim_match)

    out = pl.pallas_call(
        kernel,
        out_shape=jax.ShapeDtypeStruct((B, Cm, Ho * W), jnp.float32),
        grid=(B,),
        in_specs=in_specs,
        out_specs=pl.BlockSpec((1, Cm, Ho * W), lambda b: (b, 0, 0)),
        scratch_shapes=[pltpu.VMEM((H + 2, W + 2 * PADL, Cin), jnp.float32),
                        pltpu.VMEM((H + 2, W + 2 * PADL, Cm), jnp.float32)],
        compiler_params=pltpu.CompilerParams(dimension_semantics=("parallel",)),
    )(*args)

    # channel-major slab -> NHWC, then subsample the (width-dense) columns.
    out = out.reshape(B, Cm, Ho, W).transpose(0, 2, 3, 1)     # (B, Ho, W, Cm)
    return out[:, :, ::stride, :]                             # (B, Ho, Wo, Cm)


# ---------------------------------------------------------------------------
# Deterministic synthetic parameters + pure-JAX reference (same quantization points)
# ---------------------------------------------------------------------------
def init_params(key, inplanes, planes):
    eps = 1e-5
    keys = jax.random.split(key, 8)

    def bn(k, c):
        kg, kb, km, kv = jax.random.split(k, 4)
        gamma = 1.0 + 0.1 * jax.random.normal(kg, (c,), jnp.float32)
        beta = 0.1 * jax.random.normal(kb, (c,), jnp.float32)
        mean = 0.1 * jax.random.normal(km, (c,), jnp.float32)
        var = jax.random.uniform(kv, (c,), jnp.float32, minval=0.5, maxval=1.5)
        scale = gamma / jnp.sqrt(var + eps)
        bias = beta - mean * scale
        return scale, bias

    p = {}
    p["w1"] = 0.2 * jax.random.normal(keys[0], (3, 3, inplanes, planes), jnp.float32)
    p["w2"] = 0.2 * jax.random.normal(keys[1], (3, 3, planes, planes), jnp.float32)
    p["wd"] = 0.2 * jax.random.normal(keys[2], (inplanes, planes), jnp.float32)
    p["s1"], p["b1"] = bn(keys[3], inplanes)
    p["s2"], p["b2"] = bn(keys[4], planes)
    p["s3"], p["b3"] = bn(keys[5], planes)
    p["sd"], p["bd"] = bn(keys[6], planes)
    p["alpha"] = 0.25 + 0.05 * jax.random.normal(keys[7], (planes,), jnp.float32)
    return p


def reference_forward(x, p, stride, dim_match):
    """Pure-JAX reference with the same bf16-operand / f32-accumulate quantization points."""
    bf16 = jnp.bfloat16
    conv = functools.partial(lax.conv_general_dilated,
                             dimension_numbers=("NHWC", "HWIO", "NHWC"),
                             preferred_element_type=jnp.float32)
    xq = x.astype(bf16).astype(jnp.float32)
    h = xq * p["s1"] + p["b1"]
    h = conv(h.astype(bf16), p["w1"].astype(bf16), (1, 1), ((1, 1), (1, 1)))
    h = h * p["s2"] + p["b2"]
    h = jnp.where(h > 0, h, p["alpha"] * h)
    h = conv(h.astype(bf16), p["w2"].astype(bf16), (stride, stride), ((1, 1), (1, 1)))
    h = h * p["s3"] + p["b3"]
    if dim_match:
        res = xq
    else:
        wd4 = p["wd"].reshape(1, 1, *p["wd"].shape).astype(bf16)
        res = conv(xq.astype(bf16), wd4, (stride, stride), ((0, 0), (0, 0)))
        res = res * p["sd"] + p["bd"]
    return h + res


if __name__ == "__main__":
    B, H, W = 2, 16, 16
    inplanes, planes, stride, dim_match = 4, 8, 2, False

    key = jax.random.PRNGKey(0)
    kx, kp = jax.random.split(key)
    x = jax.random.normal(kx, (B, H, W, inplanes), jnp.float32)   # NHWC input
    params = init_params(kp, inplanes, planes)

    out = block_ir_forward(x, params, stride=stride, dim_match=dim_match)
    out = jax.block_until_ready(out)

    ref = reference_forward(x, params, stride, dim_match)
    assert out.shape == (B, H // stride, W // stride, planes), out.shape
    max_err = float(jnp.max(jnp.abs(out - ref)))
    if not bool(jnp.allclose(out, ref, atol=5e-3, rtol=5e-3)):
        raise AssertionError(f"Pallas output mismatch vs reference (max abs err = {max_err})")
    print("KERNEL_OK")
</pallas_src>

<mosaic_0001>
module attributes {stable_mosaic.version = 11 : i64} {
  func.func @kernel(%arg0: i32, %arg1: memref<1x16x16x4xbf16, #tpu.memory_space<vmem>>, %arg2: memref<3x3x4x8xbf16, #tpu.memory_space<vmem>>, %arg3: memref<3x3x8x8xbf16, #tpu.memory_space<vmem>>, %arg4: memref<4x8xbf16, #tpu.memory_space<vmem>>, %arg5: memref<1x4xf32, #tpu.memory_space<vmem>>, %arg6: memref<1x4xf32, #tpu.memory_space<vmem>>, %arg7: memref<1x8xf32, #tpu.memory_space<vmem>>, %arg8: memref<1x8xf32, #tpu.memory_space<vmem>>, %arg9: memref<1x8xf32, #tpu.memory_space<vmem>>, %arg10: memref<1x8xf32, #tpu.memory_space<vmem>>, %arg11: memref<1x8xf32, #tpu.memory_space<vmem>>, %arg12: memref<1x8xf32, #tpu.memory_space<vmem>>, %arg13: memref<1x8xf32, #tpu.memory_space<vmem>>, %arg14: memref<1x8x128xf32, #tpu.memory_space<vmem>>, %arg15: memref<18x32x4xf32, #tpu.memory_space<vmem>>, %arg16: memref<18x32x8xf32, #tpu.memory_space<vmem>>) attributes {dimension_semantics = [#tpu.dimension_semantics<parallel>], iteration_bounds = array<i64: 2>, scalar_prefetch = 0 : i64, scratch_operands = 2 : i64, tpu.core_type = #tpu.core_type<tc>, window_params = [{transform_indices = @transform_0, window_bounds = array<i64: 1, 16, 16, 4>}, {pipeline_mode = #tpu.pipeline_mode<synchronous>, transform_indices = @transform_1, window_bounds = array<i64: 3, 3, 4, 8>}, {pipeline_mode = #tpu.pipeline_mode<synchronous>, transform_indices = @transform_2, window_bounds = array<i64: 3, 3, 8, 8>}, {pipeline_mode = #tpu.pipeline_mode<synchronous>, transform_indices = @transform_3, window_bounds = array<i64: 4, 8>}, {pipeline_mode = #tpu.pipeline_mode<synchronous>, transform_indices = @transform_4, window_bounds = array<i64: 1, 4>}, {pipeline_mode = #tpu.pipeline_mode<synchronous>, transform_indices = @transform_5, window_bounds = array<i64: 1, 4>}, {pipeline_mode = #tpu.pipeline_mode<synchronous>, transform_indices = @transform_6, window_bounds = array<i64: 1, 8>}, {pipeline_mode = #tpu.pipeline_mode<synchronous>, transform_indices = @transform_7, window_bounds = array<i64: 1, 8>}, {pipeline_mode = #tpu.pipeline_mode<synchronous>, transform_indices = @transform_8, window_bounds = array<i64: 1, 8>}, {pipeline_mode = #tpu.pipeline_mode<synchronous>, transform_indices = @transform_9, window_bounds = array<i64: 1, 8>}, {pipeline_mode = #tpu.pipeline_mode<synchronous>, transform_indices = @transform_10, window_bounds = array<i64: 1, 8>}, {pipeline_mode = #tpu.pipeline_mode<synchronous>, transform_indices = @transform_11, window_bounds = array<i64: 1, 8>}, {pipeline_mode = #tpu.pipeline_mode<synchronous>, transform_indices = @transform_12, window_bounds = array<i64: 1, 8>}, {transform_indices = @transform_13, window_bounds = array<i64: 1, 8, 128>}]} {
    %cst = arith.constant 0.000000e+00 : f32
    %0 = vector.broadcast %cst : f32 to vector<1x32x4xf32>
    %c0 = arith.constant 0 : index
    %c0_0 = arith.constant 0 : index
    %c0_1 = arith.constant 0 : index
    %1 = vector.load %arg15[%c0, %c0_0, %c0_1] : memref<18x32x4xf32, #tpu.memory_space<vmem>>, vector<1x32x4xf32>
    tpu.vector_store %arg15[%c0, %c0_0, %c0_1], %0 {strides = array<i32>} : memref<18x32x4xf32, #tpu.memory_space<vmem>>, vector<1x32x4xf32>,
    %cst_2 = arith.constant 0.000000e+00 : f32
    %2 = vector.broadcast %cst_2 : f32 to vector<1x32x4xf32>
    %c17 = arith.constant 17 : index
    %c0_3 = arith.constant 0 : index
    %c0_4 = arith.constant 0 : index
    %3 = vector.load %arg15[%c17, %c0_3, %c0_4] : memref<18x32x4xf32, #tpu.memory_space<vmem>>, vector<1x32x4xf32>
    tpu.vector_store %arg15[%c17, %c0_3, %c0_4], %2 {strides = array<i32>} : memref<18x32x4xf32, #tpu.memory_space<vmem>>, vector<1x32x4xf32>,
    %cst_5 = arith.constant 0.000000e+00 : f32
    %4 = vector.broadcast %cst_5 : f32 to vector<16x8x4xf32>
    %c1 = arith.constant 1 : index
    %c0_6 = arith.constant 0 : index
    %c0_7 = arith.constant 0 : index
    %5 = vector.load %arg15[%c1, %c0_6, %c0_7] : memref<18x32x4xf32, #tpu.memory_space<vmem>>, vector<16x8x4xf32>
    tpu.vector_store %arg15[%c1, %c0_6, %c0_7], %4 {strides = array<i32>} : memref<18x32x4xf32, #tpu.memory_space<vmem>>, vector<16x8x4xf32>,
    %cst_8 = arith.constant 0.000000e+00 : f32
    %6 = vector.broadcast %cst_8 : f32 to vector<16x8x4xf32>
    %c1_9 = arith.constant 1 : index
    %c24 = arith.constant 24 : index
    %c0_10 = arith.constant 0 : index
    %7 = vector.load %arg15[%c1_9, %c24, %c0_10] : memref<18x32x4xf32, #tpu.memory_space<vmem>>, vector<16x8x4xf32>
    tpu.vector_store %arg15[%c1_9, %c24, %c0_10], %6 {strides = array<i32>} : memref<18x32x4xf32, #tpu.memory_space<vmem>>, vector<16x8x4xf32>,
    %cst_11 = arith.constant 0.000000e+00 : f32
    %8 = vector.broadcast %cst_11 : f32 to vector<1x32x8xf32>
    %c0_12 = arith.constant 0 : index
    %c0_13 = arith.constant 0 : index
    %c0_14 = arith.constant 0 : index
    %9 = vector.load %arg16[%c0_12, %c0_13, %c0_14] : memref<18x32x8xf32, #tpu.memory_space<vmem>>, vector<1x32x8xf32>
    tpu.vector_store %arg16[%c0_12, %c0_13, %c0_14], %8 {strides = array<i32>} : memref<18x32x8xf32, #tpu.memory_space<vmem>>, vector<1x32x8xf32>,
    %cst_15 = arith.constant 0.000000e+00 : f32
    %10 = vector.broadcast %cst_15 : f32 to vector<1x32x8xf32>
    %c17_16 = arith.constant 17 : index
    %c0_17 = arith.constant 0 : index
    %c0_18 = arith.constant 0 : index
    %11 = vector.load %arg16[%c17_16, %c0_17, %c0_18] : memref<18x32x8xf32, #tpu.memory_space<vmem>>, vector<1x32x8xf32>
    tpu.vector_store %arg16[%c17_16, %c0_17, %c0_18], %10 {strides = array<i32>} : memref<18x32x8xf32, #tpu.memory_space<vmem>>, vector<1x32x8xf32>,
    %cst_19 = arith.constant 0.000000e+00 : f32
    %12 = vector.broadcast %cst_19 : f32 to vector<16x8x8xf32>
    %c1_20 = arith.constant 1 : index
    %c0_21 = arith.constant 0 : index
    %c0_22 = arith.constant 0 : index
    %13 = vector.load %arg16[%c1_20, %c0_21, %c0_22] : memref<18x32x8xf32, #tpu.memory_space<vmem>>, vector<16x8x8xf32>
    tpu.vector_store %arg16[%c1_20, %c0_21, %c0_22], %12 {strides = array<i32>} : memref<18x32x8xf32, #tpu.memory_space<vmem>>, vector<16x8x8xf32>,
    %cst_23 = arith.constant 0.000000e+00 : f32
    %14 = vector.broadcast %cst_23 : f32 to vector<16x8x8xf32>
    %c1_24 = arith.constant 1 : index
    %c24_25 = arith.constant 24 : index
    %c0_26 = arith.constant 0 : index
    %15 = vector.load %arg16[%c1_24, %c24_25, %c0_26] : memref<18x32x8xf32, #tpu.memory_space<vmem>>, vector<16x8x8xf32>
    tpu.vector_store %arg16[%c1_24, %c24_25, %c0_26], %14 {strides = array<i32>} : memref<18x32x8xf32, #tpu.memory_space<vmem>>, vector<16x8x8xf32>,
    %c0_27 = arith.constant 0 : index
    %c0_28 = arith.constant 0 : index
    %c0_29 = arith.constant 0 : index
    %c0_30 = arith.constant 0 : index
    %16 = vector.load %arg1[%c0_27, %c0_28, %c0_29, %c0_30] : memref<1x16x16x4xbf16, #tpu.memory_space<vmem>>, vector<1x16x16x4xbf16>
    %17 = vector.shape_cast %16 : vector<1x16x16x4xbf16> to vector<16x16x4xbf16>
    %18 = arith.extf %17 : vector<16x16x4xbf16> to vector<16x16x4xf32>
    %c0_31 = arith.constant 0 : index
    %c0_32 = arith.constant 0 : index
    %19 = vector.load %arg5[%c0_31, %c0_32] : memref<1x4xf32, #tpu.memory_space<vmem>>, vector<1x4xf32>
    %20 = vector.shape_cast %19 : vector<1x4xf32> to vector<1x1x4xf32>
    %21 = vector.broadcast %20 : vector<1x1x4xf32> to vector<16x16x4xf32>
    %22 = arith.mulf %18, %21 : vector<16x16x4xf32>
    %c0_33 = arith.constant 0 : index
    %c0_34 = arith.constant 0 : index
    %23 = vector.load %arg6[%c0_33, %c0_34] : memref<1x4xf32, #tpu.memory_space<vmem>>, vector<1x4xf32>
    %24 = vector.shape_cast %23 : vector<1x4xf32> to vector<1x1x4xf32>
    %25 = vector.broadcast %24 : vector<1x1x4xf32> to vector<16x16x4xf32>
    %26 = arith.addf %22, %25 : vector<16x16x4xf32>
    %c1_35 = arith.constant 1 : index
    %c8 = arith.constant 8 : index
    %c0_36 = arith.constant 0 : index
    %27 = vector.load %arg15[%c1_35, %c8, %c0_36] : memref<18x32x4xf32, #tpu.memory_space<vmem>>, vector<16x16x4xf32>
    tpu.vector_store %arg15[%c1_35, %c8, %c0_36], %26 {strides = array<i32>} : memref<18x32x4xf32, #tpu.memory_space<vmem>>, vector<16x16x4xf32>,
    %cst_37 = arith.constant 0.000000e+00 : f32
    %28 = vector.broadcast %cst_37 : f32 to vector<256x8xf32>
    %c0_38 = arith.constant 0 : index
    %c7 = arith.constant 7 : index
    %c0_39 = arith.constant 0 : index
    %29 = vector.load %arg15[%c0_38, %c7, %c0_39] : memref<18x32x4xf32, #tpu.memory_space<vmem>>, vector<16x16x4xf32>
    %30 = vector.shape_cast %29 : vector<16x16x4xf32> to vector<256x4xf32>
    %31 = arith.truncf %30 : vector<256x4xf32> to vector<256x4xbf16>
    %c0_40 = arith.constant 0 : index
    %c0_41 = arith.constant 0 : index
    %c0_42 = arith.constant 0 : index
    %c0_43 = arith.constant 0 : index
    %32 = vector.load %arg2[%c0_40, %c0_41, %c0_42, %c0_43] : memref<3x3x4x8xbf16, #tpu.memory_space<vmem>>, vector<1x1x4x8xbf16>
    %33 = vector.shape_cast %32 : vector<1x1x4x8xbf16> to vector<4x8xbf16>
    %cst_44 = arith.constant dense<0.000000e+00> : vector<256x8xf32>
    %34 = tpu.matmul %31, %33, %cst_44 {dimension_numbers = #tpu.dot_dimension_numbers<[1], [0], [0], [1], [0, 0, 1, 1], [], []>} : vector<256x4xbf16>, vector<4x8xbf16>, vector<256x8xf32> -> vector<256x8xf32>
    %35 = arith.addf %28, %34 : vector<256x8xf32>
    %c0_45 = arith.constant 0 : index
    %c8_46 = arith.constant 8 : index
    %c0_47 = arith.constant 0 : index
    %36 = vector.load %arg15[%c0_45, %c8_46, %c0_47] : memref<18x32x4xf32, #tpu.memory_space<vmem>>, vector<16x16x4xf32>
    %37 = vector.shape_cast %36 : vector<16x16x4xf32> to vector<256x4xf32>
    %38 = arith.truncf %37 : vector<256x4xf32> to vector<256x4xbf16>
    %c0_48 = arith.constant 0 : index
    %c1_49 = arith.constant 1 : index
    %c0_50 = arith.constant 0 : index
    %c0_51 = arith.constant 0 : index
    %39 = vector.load %arg2[%c0_48, %c1_49, %c0_50, %c0_51] : memref<3x3x4x8xbf16, #tpu.memory_space<vmem>>, vector<1x1x4x8xbf16>
    %40 = vector.shape_cast %39 : vector<1x1x4x8xbf16> to vector<4x8xbf16>
    %cst_52 = arith.constant dense<0.000000e+00> : vector<256x8xf32>
    %41 = tpu.matmul %38, %40, %cst_52 {dimension_numbers = #tpu.dot_dimension_numbers<[1], [0], [0], [1], [0, 0, 1, 1], [], []>} : vector<256x4xbf16>, vector<4x8xbf16>, vector<256x8xf32> -> vector<256x8xf32>
    %42 = arith.addf %35, %41 : vector<256x8xf32>
    %c0_53 = arith.constant 0 : index
    %c9 = arith.constant 9 : index
    %c0_54 = arith.constant 0 : index
    %43 = vector.load %arg15[%c0_53, %c9, %c0_54] : memref<18x32x4xf32, #tpu.memory_space<vmem>>, vector<16x16x4xf32>
    %44 = vector.shape_cast %43 : vector<16x16x4xf32> to vector<256x4xf32>
    %45 = arith.truncf %44 : vector<256x4xf32> to vector<256x4xbf16>
    %c0_55 = arith.constant 0 : index
    %c2 = arith.constant 2 : index
    %c0_56 = arith.constant 0 : index
    %c0_57 = arith.constant 0 : index
    %46 = vector.load %arg2[%c0_55, %c2, %c0_56, %c0_57] : memref<3x3x4x8xbf16, #tpu.memory_space<vmem>>, vector<1x1x4x8xbf16>
    %47 = vector.shape_cast %46 : vector<1x1x4x8xbf16> to vector<4x8xbf16>
    %cst_58 = arith.constant dense<0.000000e+00> : vector<256x8xf32>
    %48 = tpu.matmul %45, %47, %cst_58 {dimension_numbers = #tpu.dot_dimension_numbers<[1], [0], [0], [1], [0, 0, 1, 1], [], []>} : vector<256x4xbf16>, vector<4x8xbf16>, vector<256x8xf32> -> vector<256x8xf32>
    %49 = arith.addf %42, %48 : vector<256x8xf32>
    %c1_59 = arith.constant 1 : index
    %c7_60 = arith.constant 7 : index
    %c0_61 = arith.constant 0 : index
    %50 = vector.load %arg15[%c1_59, %c7_60, %c0_61] : memref<18x32x4xf32, #tpu.memory_space<vmem>>, vector<16x16x4xf32>
    %51 = vector.shape_cast %50 : vector<16x16x4xf32> to vector<256x4xf32>
    %52 = arith.truncf %51 : vector<256x4xf32> to vector<256x4xbf16>
    %c1_62 = arith.constant 1 : index
    %c0_63 = arith.constant 0 : index
    %c0_64 = arith.constant 0 : index
    %c0_65 = arith.constant 0 : index
    %53 = vector.load %arg2[%c1_62, %c0_63, %c0_64, %c0_65] : memref<3x3x4x8xbf16, #tpu.memory_space<vmem>>, vector<1x1x4x8xbf16>
    %54 = vector.shape_cast %53 : vector<1x1x4x8xbf16> to vector<4x8xbf16>
    %cst_66 = arith.constant dense<0.000000e+00> : vector<256x8xf32>
    %55 = tpu.matmul %52, %54, %cst_66 {dimension_numbers = #tpu.dot_dimension_numbers<[1], [0], [0], [1], [0, 0, 1, 1], [], []>} : vector<256x4xbf16>, vector<4x8xbf16>, vector<256x8xf32> -> vector<256x8xf32>
    %56 = arith.addf %49, %55 : vector<256x8xf32>
    %c1_67 = arith.constant 1 : index
    %c8_68 = arith.constant 8 : index
    %c0_69 = arith.constant 0 : index
    %57 = vector.load %arg15[%c1_67, %c8_68, %c0_69] : memref<18x32x4xf32, #tpu.memory_space<vmem>>, vector<16x16x4xf32>
    %58 = vector.shape_cast %57 : vector<16x16x4xf32> to vector<256x4xf32>
    %59 = arith.truncf %58 : vector<256x4xf32> to vector<256x4xbf16>
    %c1_70 = arith.constant 1 : index
    %c1_71 = arith.constant 1 : index
    %c0_72 = arith.constant 0 : index
    %c0_73 = arith.constant 0 : index
    %60 = vector.load %arg2[%c1_70, %c1_71, %c0_72, %c0_73] : memref<3x3x4x8xbf16, #tpu.memory_space<vmem>>, vector<1x1x4x8xbf16>
    %61 = vector.shape_cast %60 : vector<1x1x4x8xbf16> to vector<4x8xbf16>
    %cst_74 = arith.constant dense<0.000000e+00> : vector<256x8xf32>
    %62 = tpu.matmul %59, %61, %cst_74 {dimension_numbers = #tpu.dot_dimension_numbers<[1], [0], [0], [1], [0, 0, 1, 1], [], []>} : vector<256x4xbf16>, vector<4x8xbf16>, vector<256x8xf32> -> vector<256x8xf32>
    %63 = arith.addf %56, %62 : vector<256x8xf32>
    %c1_75 = arith.constant 1 : index
    %c9_76 = arith.constant 9 : index
    %c0_77 = arith.constant 0 : index
    %64 = vector.load %arg15[%c1_75, %c9_76, %c0_77] : memref<18x32x4xf32, #tpu.memory_space<vmem>>, vector<16x16x4xf32>
    %65 = vector.shape_cast %64 : vector<16x16x4xf32> to vector<256x4xf32>
    %66 = arith.truncf %65 : vector<256x4xf32> to vector<256x4xbf16>
    %c1_78 = arith.constant 1 : index
    %c2_79 = arith.constant 2 : index
    %c0_80 = arith.constant 0 : index
    %c0_81 = arith.constant 0 : index
    %67 = vector.load %arg2[%c1_78, %c2_79, %c0_80, %c0_81] : memref<3x3x4x8xbf16, #tpu.memory_space<vmem>>, vector<1x1x4x8xbf16>
    %68 = vector.shape_cast %67 : vector<1x1x4x8xbf16> to vector<4x8xbf16>
    %cst_82 = arith.constant dense<0.000000e+00> : vector<256x8xf32>
    %69 = tpu.matmul %66, %68, %cst_82 {dimension_numbers = #tpu.dot_dimension_numbers<[1], [0], [0], [1], [0, 0, 1, 1], [], []>} : vector<256x4xbf16>, vector<4x8xbf16>, vector<256x8xf32> -> vector<256x8xf32>
    %70 = arith.addf %63, %69 : vector<256x8xf32>
    %c2_83 = arith.constant 2 : index
    %c7_84 = arith.constant 7 : index
    %c0_85 = arith.constant 0 : index
    %71 = vector.load %arg15[%c2_83, %c7_84, %c0_85] : memref<18x32x4xf32, #tpu.memory_space<vmem>>, vector<16x16x4xf32>
    %72 = vector.shape_cast %71 : vector<16x16x4xf32> to vector<256x4xf32>
    %73 = arith.truncf %72 : vector<256x4xf32> to vector<256x4xbf16>
    %c2_86 = arith.constant 2 : index
    %c0_87 = arith.constant 0 : index
    %c0_88 = arith.constant 0 : index
    %c0_89 = arith.constant 0 : index
    %74 = vector.load %arg2[%c2_86, %c0_87, %c0_88, %c0_89] : memref<3x3x4x8xbf16, #tpu.memory_space<vmem>>, vector<1x1x4x8xbf16>
    %75 = vector.shape_cast %74 : vector<1x1x4x8xbf16> to vector<4x8xbf16>
    %cst_90 = arith.constant dense<0.000000e+00> : vector<256x8xf32>
    %76 = tpu.matmul %73, %75, %cst_90 {dimension_numbers = #tpu.dot_dimension_numbers<[1], [0], [0], [1], [0, 0, 1, 1], [], []>} : vector<256x4xbf16>, vector<4x8xbf16>, vector<256x8xf32> -> vector<256x8xf32>
    %77 = arith.addf %70, %76 : vector<256x8xf32>
    %c2_91 = arith.constant 2 : index
    %c8_92 = arith.constant 8 : index
    %c0_93 = arith.constant 0 : index
    %78 = vector.load %arg15[%c2_91, %c8_92, %c0_93] : memref<18x32x4xf32, #tpu.memory_space<vmem>>, vector<16x16x4xf32>
    %79 = vector.shape_cast %78 : vector<16x16x4xf32> to vector<256x4xf32>
    %80 = arith.truncf %79 : vector<256x4xf32> to vector<256x4xbf16>
    %c2_94 = arith.constant 2 : index
    %c1_95 = arith.constant 1 : index
    %c0_96 = arith.constant 0 : index
    %c0_97 = arith.constant 0 : index
    %81 = vector.load %arg2[%c2_94, %c1_95, %c0_96, %c0_97] : memref<3x3x4x8xbf16, #tpu.memory_space<vmem>>, vector<1x1x4x8xbf16>
    %82 = vector.shape_cast %81 : vector<1x1x4x8xbf16> to vector<4x8xbf16>
    %cst_98 = arith.constant dense<0.000000e+00> : vector<256x8xf32>
    %83 = tpu.matmul %80, %82, %cst_98 {dimension_numbers = #tpu.dot_dimension_numbers<[1], [0], [0], [1], [0, 0, 1, 1], [], []>} : vector<256x4xbf16>, vector<4x8xbf16>, vector<256x8xf32> -> vector<256x8xf32>
    %84 = arith.addf %77, %83 : vector<256x8xf32>
    %c2_99 = arith.constant 2 : index
    %c9_100 = arith.constant 9 : index
    %c0_101 = arith.constant 0 : index
    %85 = vector.load %arg15[%c2_99, %c9_100, %c0_101] : memref<18x32x4xf32, #tpu.memory_space<vmem>>, vector<16x16x4xf32>
    %86 = vector.shape_cast %85 : vector<16x16x4xf32> to vector<256x4xf32>
    %87 = arith.truncf %86 : vector<256x4xf32> to vector<256x4xbf16>
    %c2_102 = arith.constant 2 : index
    %c2_103 = arith.constant 2 : index
    %c0_104 = arith.constant 0 : index
    %c0_105 = arith.constant 0 : index
    %88 = vector.load %arg2[%c2_102, %c2_103, %c0_104, %c0_105] : memref<3x3x4x8xbf16, #tpu.memory_space<vmem>>, vector<1x1x4x8xbf16>
    %89 = vector.shape_cast %88 : vector<1x1x4x8xbf16> to vector<4x8xbf16>
    %cst_106 = arith.constant dense<0.000000e+00> : vector<256x8xf32>
    %90 = tpu.matmul %87, %89, %cst_106 {dimension_numbers = #tpu.dot_dimension_numbers<[1], [0], [0], [1], [0, 0, 1, 1], [], []>} : vector<256x4xbf16>, vector<4x8xbf16>, vector<256x8xf32> -> vector<256x8xf32>
    %91 = arith.addf %84, %90 : vector<256x8xf32>
    %c0_107 = arith.constant 0 : index
    %c0_108 = arith.constant 0 : index
    %92 = vector.load %arg7[%c0_107, %c0_108] : memref<1x8xf32, #tpu.memory_space<vmem>>, vector<1x8xf32>
    %93 = vector.broadcast %92 : vector<1x8xf32> to vector<256x8xf32>
    %94 = arith.mulf %91, %93 : vector<256x8xf32>
    %c0_109 = arith.constant 0 : index
    %c0_110 = arith.constant 0 : index
    %95 = vector.load %arg8[%c0_109, %c0_110] : memref<1x8xf32, #tpu.memory_space<vmem>>, vector<1x8xf32>
    %96 = vector.broadcast %95 : vector<1x8xf32> to vector<256x8xf32>
    %97 = arith.addf %94, %96 : vector<256x8xf32>
    %cst_111 = arith.constant 0.000000e+00 : f32
    %98 = vector.broadcast %cst_111 : f32 to vector<256x8xf32>
    %99 = arith.cmpf ogt, %97, %98 : vector<256x8xf32>
    %c0_112 = arith.constant 0 : index
    %c0_113 = arith.constant 0 : index
    %100 = vector.load %arg13[%c0_112, %c0_113] : memref<1x8xf32, #tpu.memory_space<vmem>>, vector<1x8xf32>
    %101 = vector.broadcast %100 : vector<1x8xf32> to vector<256x8xf32>
    %102 = arith.mulf %101, %97 : vector<256x8xf32>
    %103 = arith.select %99, %97, %102 : vector<256x8xi1>, vector<256x8xf32>
    %104 = vector.shape_cast %103 : vector<256x8xf32> to vector<16x16x8xf32>
    %c1_114 = arith.constant 1 : index
    %c8_115 = arith.constant 8 : index
    %c0_116 = arith.constant 0 : index
    %105 = vector.load %arg16[%c1_114, %c8_115, %c0_116] : memref<18x32x8xf32, #tpu.memory_space<vmem>>, vector<16x16x8xf32>
    tpu.vector_store %arg16[%c1_114, %c8_115, %c0_116], %104 {strides = array<i32>} : memref<18x32x8xf32, #tpu.memory_space<vmem>>, vector<16x16x8xf32>,
    %cst_117 = arith.constant 0.000000e+00 : f32
    %106 = vector.broadcast %cst_117 : f32 to vector<128x8xf32>
    %c0_118 = arith.constant 0 : index
    %c7_119 = arith.constant 7 : index
    %c0_120 = arith.constant 0 : index
    %107 = vector.load %arg16[%c0_118, %c7_119, %c0_120] : memref<18x32x8xf32, #tpu.memory_space<vmem>>, vector<16x16x8xf32>
    %108 = vector.shape_cast %107 : vector<16x16x8xf32> to vector<8x2x16x8xf32>
    %109 = vector.extract_strided_slice %108 {offsets = [0, 0, 0, 0], sizes = [8, 1, 16, 8], strides = [1, 1, 1, 1]} : vector<8x2x16x8xf32> to vector<8x1x16x8xf32>
    %110 = vector.shape_cast %109 : vector<8x1x16x8xf32> to vector<8x16x8xf32>
    %111 = vector.shape_cast %110 : vector<8x16x8xf32> to vector<128x8xf32>
    %112 = arith.truncf %111 : vector<128x8xf32> to vector<128x8xbf16>
    %c0_121 = arith.constant 0 : index
    %c0_122 = arith.constant 0 : index
    %c0_123 = arith.constant 0 : index
    %c0_124 = arith.constant 0 : index
    %113 = vector.load %arg3[%c0_121, %c0_122, %c0_123, %c0_124] : memref<3x3x8x8xbf16, #tpu.memory_space<vmem>>, vector<1x1x8x8xbf16>
    %114 = vector.shape_cast %113 : vector<1x1x8x8xbf16> to vector<8x8xbf16>
    %cst_125 = arith.constant dense<0.000000e+00> : vector<128x8xf32>
    %115 = tpu.matmul %112, %114, %cst_125 {dimension_numbers = #tpu.dot_dimension_numbers<[1], [0], [0], [1], [0, 0, 1, 1], [], []>} : vector<128x8xbf16>, vector<8x8xbf16>, vector<128x8xf32> -> vector<128x8xf32>
    %116 = arith.addf %106, %115 : vector<128x8xf32>
    %c0_126 = arith.constant 0 : index
    %c8_127 = arith.constant 8 : index
    %c0_128 = arith.constant 0 : index
    %117 = vector.load %arg16[%c0_126, %c8_127, %c0_128] : memref<18x32x8xf32, #tpu.memory_space<vmem>>, vector<16x16x8xf32>
    %118 = vector.shape_cast %117 : vector<16x16x8xf32> to vector<8x2x16x8xf32>
    %119 = vector.extract_strided_slice %118 {offsets = [0, 0, 0, 0], sizes = [8, 1, 16, 8], strides = [1, 1, 1, 1]} : vector<8x2x16x8xf32> to vector<8x1x16x8xf32>
    %120 = vector.shape_cast %119 : vector<8x1x16x8xf32> to vector<8x16x8xf32>
    %121 = vector.shape_cast %120 : vector<8x16x8xf32> to vector<128x8xf32>
    %122 = arith.truncf %121 : vector<128x8xf32> to vector<128x8xbf16>
    %c0_129 = arith.constant 0 : index
    %c1_130 = arith.constant 1 : index
    %c0_131 = arith.constant 0 : index
    %c0_132 = arith.constant 0 : index
    %123 = vector.load %arg3[%c0_129, %c1_130, %c0_131, %c0_132] : memref<3x3x8x8xbf16, #tpu.memory_space<vmem>>, vector<1x1x8x8xbf16>
    %124 = vector.shape_cast %123 : vector<1x1x8x8xbf16> to vector<8x8xbf16>
    %cst_133 = arith.constant dense<0.000000e+00> : vector<128x8xf32>
    %125 = tpu.matmul %122, %124, %cst_133 {dimension_numbers = #tpu.dot_dimension_numbers<[1], [0], [0], [1], [0, 0, 1, 1], [], []>} : vector<128x8xbf16>, vector<8x8xbf16>, vector<128x8xf32> -> vector<128x8xf32>
    %126 = arith.addf %116, %125 : vector<128x8xf32>
    %c0_134 = arith.constant 0 : index
    %c9_135 = arith.constant 9 : index
    %c0_136 = arith.constant 0 : index
    %127 = vector.load %arg16[%c0_134, %c9_135, %c0_136] : memref<18x32x8xf32, #tpu.memory_space<vmem>>, vector<16x16x8xf32>
    %128 = vector.shape_cast %127 : vector<16x16x8xf32> to vector<8x2x16x8xf32>
    %129 = vector.extract_strided_slice %128 {offsets = [0, 0, 0, 0], sizes = [8, 1, 16, 8], strides = [1, 1, 1, 1]} : vector<8x2x16x8xf32> to vector<8x1x16x8xf32>
    %130 = vector.shape_cast %129 : vector<8x1x16x8xf32> to vector<8x16x8xf32>
    %131 = vector.shape_cast %130 : vector<8x16x8xf32> to vector<128x8xf32>
    %132 = arith.truncf %131 : vector<128x8xf32> to vector<128x8xbf16>
    %c0_137 = arith.constant 0 : index
    %c2_138 = arith.constant 2 : index
    %c0_139 = arith.constant 0 : index
    %c0_140 = arith.constant 0 : index
    %133 = vector.load %arg3[%c0_137, %c2_138, %c0_139, %c0_140] : memref<3x3x8x8xbf16, #tpu.memory_space<vmem>>, vector<1x1x8x8xbf16>
    %134 = vector.shape_cast %133 : vector<1x1x8x8xbf16> to vector<8x8xbf16>
    %cst_141 = arith.constant dense<0.000000e+00> : vector<128x8xf32>
    %135 = tpu.matmul %132, %134, %cst_141 {dimension_numbers = #tpu.dot_dimension_numbers<[1], [0], [0], [1], [0, 0, 1, 1], [], []>} : vector<128x8xbf16>, vector<8x8xbf16>, vector<128x8xf32> -> vector<128x8xf32>
    %136 = arith.addf %126, %135 : vector<128x8xf32>
    %c1_142 = arith.constant 1 : index
    %c7_143 = arith.constant 7 : index
    %c0_144 = arith.constant 0 : index
    %137 = vector.load %arg16[%c1_142, %c7_143, %c0_144] : memref<18x32x8xf32, #tpu.memory_space<vmem>>, vector<16x16x8xf32>
    %138 = vector.shape_cast %137 : vector<16x16x8xf32> to vector<8x2x16x8xf32>
    %139 = vector.extract_strided_slice %138 {offsets = [0, 0, 0, 0], sizes = [8, 1, 16, 8], strides = [1, 1, 1, 1]} : vector<8x2x16x8xf32> to vector<8x1x16x8xf32>
    %140 = vector.shape_cast %139 : vector<8x1x16x8xf32> to vector<8x16x8xf32>
    %141 = vector.shape_cast %140 : vector<8x16x8xf32> to vector<128x8xf32>
    %142 = arith.truncf %141 : vector<128x8xf32> to vector<128x8xbf16>
    %c1_145 = arith.constant 1 : index
    %c0_146 = arith.constant 0 : index
    %c0_147 = arith.constant 0 : index
    %c0_148 = arith.constant 0 : index
    %143 = vector.load %arg3[%c1_145, %c0_146, %c0_147, %c0_148] : memref<3x3x8x8xbf16, #tpu.memory_space<vmem>>, vector<1x1x8x8xbf16>
    %144 = vector.shape_cast %143 : vector<1x1x8x8xbf16> to vector<8x8xbf16>
    %cst_149 = arith.constant dense<0.000000e+00> : vector<128x8xf32>
    %145 = tpu.matmul %142, %144, %cst_149 {dimension_numbers = #tpu.dot_dimension_numbers<[1], [0], [0], [1], [0, 0, 1, 1], [], []>} : vector<128x8xbf16>, vector<8x8xbf16>, vector<128x8xf32> -> vector<128x8xf32>
    %146 = arith.addf %136, %145 : vector<128x8xf32>
    %c1_150 = arith.constant 1 : index
    %c8_151 = arith.constant 8 : index
    %c0_152 = arith.constant 0 : index
    %147 = vector.load %arg16[%c1_150, %c8_151, %c0_152] : memref<18x32x8xf32, #tpu.memory_space<vmem>>, vector<16x16x8xf32>
    %148 = vector.shape_cast %147 : vector<16x16x8xf32> to vector<8x2x16x8xf32>
    %149 = vector.extract_strided_slice %148 {offsets = [0, 0, 0, 0], sizes = [8, 1, 16, 8], strides = [1, 1, 1, 1]} : vector<8x2x16x8xf32> to vector<8x1x16x8xf32>
    %150 = vector.shape_cast %149 : vector<8x1x16x8xf32> to vector<8x16x8xf32>
    %151 = vector.shape_cast %150 : vector<8x16x8xf32> to vector<128x8xf32>
    %152 = arith.truncf %151 : vector<128x8xf32> to vector<128x8xbf16>
    %c1_153 = arith.constant 1 : index
    %c1_154 = arith.constant 1 : index
    %c0_155 = arith.constant 0 : index
    %c0_156 = arith.constant 0 : index
    %153 = vector.load %arg3[%c1_153, %c1_154, %c0_155, %c0_156] : memref<3x3x8x8xbf16, #tpu.memory_space<vmem>>, vector<1x1x8x8xbf16>
    %154 = vector.shape_cast %153 : vector<1x1x8x8xbf16> to vector<8x8xbf16>
    %cst_157 = arith.constant dense<0.000000e+00> : vector<128x8xf32>
    %155 = tpu.matmul %152, %154, %cst_157 {dimension_numbers = #tpu.dot_dimension_numbers<[1], [0], [0], [1], [0, 0, 1, 1], [], []>} : vector<128x8xbf16>, vector<8x8xbf16>, vector<128x8xf32> -> vector<128x8xf32>
    %156 = arith.addf %146, %155 : vector<128x8xf32>
    %c1_158 = arith.constant 1 : index
    %c9_159 = arith.constant 9 : index
    %c0_160 = arith.constant 0 : index
    %157 = vector.load %arg16[%c1_158, %c9_159, %c0_160] : memref<18x32x8xf32, #tpu.memory_space<vmem>>, vector<16x16x8xf32>
    %158 = vector.shape_cast %157 : vector<16x16x8xf32> to vector<8x2x16x8xf32>
    %159 = vector.extract_strided_slice %158 {offsets = [0, 0, 0, 0], sizes = [8, 1, 16, 8], strides = [1, 1, 1, 1]} : vector<8x2x16x8xf32> to vector<8x1x16x8xf32>
    %160 = vector.shape_cast %159 : vector<8x1x16x8xf32> to vector<8x16x8xf32>
    %161 = vector.shape_cast %160 : vector<8x16x8xf32> to vector<128x8xf32>
    %162 = arith.truncf %161 : vector<128x8xf32> to vector<128x8xbf16>
    %c1_161 = arith.constant 1 : index
    %c2_162 = arith.constant 2 : index
    %c0_163 = arith.constant 0 : index
    %c0_164 = arith.constant 0 : index
    %163 = vector.load %arg3[%c1_161, %c2_162, %c0_163, %c0_164] : memref<3x3x8x8xbf16, #tpu.memory_space<vmem>>, vector<1x1x8x8xbf16>
    %164 = vector.shape_cast %163 : vector<1x1x8x8xbf16> to vector<8x8xbf16>
    %cst_165 = arith.constant dense<0.000000e+00> : vector<128x8xf32>
    %165 = tpu.matmul %162, %164, %cst_165 {dimension_numbers = #tpu.dot_dimension_numbers<[1], [0], [0], [1], [0, 0, 1, 1], [], []>} : vector<128x8xbf16>, vector<8x8xbf16>, vector<128x8xf32> -> vector<128x8xf32>
    %166 = arith.addf %156, %165 : vector<128x8xf32>
    %c2_166 = arith.constant 2 : index
    %c7_167 = arith.constant 7 : index
    %c0_168 = arith.constant 0 : index
    %167 = vector.load %arg16[%c2_166, %c7_167, %c0_168] : memref<18x32x8xf32, #tpu.memory_space<vmem>>, vector<16x16x8xf32>
    %168 = vector.shape_cast %167 : vector<16x16x8xf32> to vector<8x2x16x8xf32>
    %169 = vector.extract_strided_slice %168 {offsets = [0, 0, 0, 0], sizes = [8, 1, 16, 8], strides = [1, 1, 1, 1]} : vector<8x2x16x8xf32> to vector<8x1x16x8xf32>
    %170 = vector.shape_cast %169 : vector<8x1x16x8xf32> to vector<8x16x8xf32>
    %171 = vector.shape_cast %170 : vector<8x16x8xf32> to vector<128x8xf32>
    %172 = arith.truncf %171 : vector<128x8xf32> to vector<128x8xbf16>
    %c2_169 = arith.constant 2 : index
    %c0_170 = arith.constant 0 : index
    %c0_171 = arith.constant 0 : index
    %c0_172 = arith.constant 0 : index
    %173 = vector.load %arg3[%c2_169, %c0_170, %c0_171, %c0_172] : memref<3x3x8x8xbf16, #tpu.memory_space<vmem>>, vector<1x1x8x8xbf16>
    %174 = vector.shape_cast %173 : vector<1x1x8x8xbf16> to vector<8x8xbf16>
    %cst_173 = arith.constant dense<0.000000e+00> : vector<128x8xf32>
    %175 = tpu.matmul %172, %174, %cst_173 {dimension_numbers = #tpu.dot_dimension_numbers<[1], [0], [0], [1], [0, 0, 1, 1], [], []>} : vector<128x8xbf16>, vector<8x8xbf16>, vector<128x8xf32> -> vector<128x8xf32>
    %176 = arith.addf %166, %175 : vector<128x8xf32>
    %c2_174 = arith.constant 2 : index
    %c8_175 = arith.constant 8 : index
    %c0_176 = arith.constant 0 : index
    %177 = vector.load %arg16[%c2_174, %c8_175, %c0_176] : memref<18x32x8xf32, #tpu.memory_space<vmem>>, vector<16x16x8xf32>
    %178 = vector.shape_cast %177 : vector<16x16x8xf32> to vector<8x2x16x8xf32>
    %179 = vector.extract_strided_slice %178 {offsets = [0, 0, 0, 0], sizes = [8, 1, 16, 8], strides = [1, 1, 1, 1]} : vector<8x2x16x8xf32> to vector<8x1x16x8xf32>
    %180 = vector.shape_cast %179 : vector<8x1x16x8xf32> to vector<8x16x8xf32>
    %181 = vector.shape_cast %180 : vector<8x16x8xf32> to vector<128x8xf32>
    %182 = arith.truncf %181 : vector<128x8xf32> to vector<128x8xbf16>
    %c2_177 = arith.constant 2 : index
    %c1_178 = arith.constant 1 : index
    %c0_179 = arith.constant 0 : index
    %c0_180 = arith.constant 0 : index
    %183 = vector.load %arg3[%c2_177, %c1_178, %c0_179, %c0_180] : memref<3x3x8x8xbf16, #tpu.memory_space<vmem>>, vector<1x1x8x8xbf16>
    %184 = vector.shape_cast %183 : vector<1x1x8x8xbf16> to vector<8x8xbf16>
    %cst_181 = arith.constant dense<0.000000e+00> : vector<128x8xf32>
    %185 = tpu.matmul %182, %184, %cst_181 {dimension_numbers = #tpu.dot_dimension_numbers<[1], [0], [0], [1], [0, 0, 1, 1], [], []>} : vector<128x8xbf16>, vector<8x8xbf16>, vector<128x8xf32> -> vector<128x8xf32>
    %186 = arith.addf %176, %185 : vector<128x8xf32>
    %c2_182 = arith.constant 2 : index
    %c9_183 = arith.constant 9 : index
    %c0_184 = arith.constant 0 : index
    %187 = vector.load %arg16[%c2_182, %c9_183, %c0_184] : memref<18x32x8xf32, #tpu.memory_space<vmem>>, vector<16x16x8xf32>
    %188 = vector.shape_cast %187 : vector<16x16x8xf32> to vector<8x2x16x8xf32>
    %189 = vector.extract_strided_slice %188 {offsets = [0, 0, 0, 0], sizes = [8, 1, 16, 8], strides = [1, 1, 1, 1]} : vector<8x2x16x8xf32> to vector<8x1x16x8xf32>
    %190 = vector.shape_cast %189 : vector<8x1x16x8xf32> to vector<8x16x8xf32>
    %191 = vector.shape_cast %190 : vector<8x16x8xf32> to vector<128x8xf32>
    %192 = arith.truncf %191 : vector<128x8xf32> to vector<128x8xbf16>
    %c2_185 = arith.constant 2 : index
    %c2_186 = arith.constant 2 : index
    %c0_187 = arith.constant 0 : index
    %c0_188 = arith.constant 0 : index
    %193 = vector.load %arg3[%c2_185, %c2_186, %c0_187, %c0_188] : memref<3x3x8x8xbf16, #tpu.memory_space<vmem>>, vector<1x1x8x8xbf16>
    %194 = vector.shape_cast %193 : vector<1x1x8x8xbf16> to vector<8x8xbf16>
    %cst_189 = arith.constant dense<0.000000e+00> : vector<128x8xf32>
    %195 = tpu.matmul %192, %194, %cst_189 {dimension_numbers = #tpu.dot_dimension_numbers<[1], [0], [0], [1], [0, 0, 1, 1], [], []>} : vector<128x8xbf16>, vector<8x8xbf16>, vector<128x8xf32> -> vector<128x8xf32>
    %196 = arith.addf %186, %195 : vector<128x8xf32>
    %c0_190 = arith.constant 0 : index
    %c0_191 = arith.constant 0 : index
    %197 = vector.load %arg9[%c0_190, %c0_191] : memref<1x8xf32, #tpu.memory_space<vmem>>, vector<1x8xf32>
    %198 = vector.broadcast %197 : vector<1x8xf32> to vector<128x8xf32>
    %199 = arith.mulf %196, %198 : vector<128x8xf32>
    %c0_192 = arith.constant 0 : index
    %c0_193 = arith.constant 0 : index
    %200 = vector.load %arg10[%c0_192, %c0_193] : memref<1x8xf32, #tpu.memory_space<vmem>>, vector<1x8xf32>
    %201 = vector.broadcast %200 : vector<1x8xf32> to vector<128x8xf32>
    %202 = arith.addf %199, %201 : vector<128x8xf32>
    %203 = vector.shape_cast %17 : vector<16x16x4xbf16> to vector<8x2x16x4xbf16>
    %204 = vector.extract_strided_slice %203 {offsets = [0, 0, 0, 0], sizes = [8, 1, 16, 4], strides = [1, 1, 1, 1]} : vector<8x2x16x4xbf16> to vector<8x1x16x4xbf16>
    %205 = vector.shape_cast %204 : vector<8x1x16x4xbf16> to vector<8x16x4xbf16>
    %206 = vector.shape_cast %205 : vector<8x16x4xbf16> to vector<128x4xbf16>
    %c0_194 = arith.constant 0 : index
    %c0_195 = arith.constant 0 : index
    %207 = vector.load %arg4[%c0_194, %c0_195] : memref<4x8xbf16, #tpu.memory_space<vmem>>, vector<4x8xbf16>
    %cst_196 = arith.constant dense<0.000000e+00> : vector<128x8xf32>
    %208 = tpu.matmul %206, %207, %cst_196 {dimension_numbers = #tpu.dot_dimension_numbers<[1], [0], [0], [1], [0, 0, 1, 1], [], []>} : vector<128x4xbf16>, vector<4x8xbf16>, vector<128x8xf32> -> vector<128x8xf32>
    %c0_197 = arith.constant 0 : index
    %c0_198 = arith.constant 0 : index
    %209 = vector.load %arg11[%c0_197, %c0_198] : memref<1x8xf32, #tpu.memory_space<vmem>>, vector<1x8xf32>
    %210 = vector.broadcast %209 : vector<1x8xf32> to vector<128x8xf32>
    %211 = arith.mulf %208, %210 : vector<128x8xf32>
    %c0_199 = arith.constant 0 : index
    %c0_200 = arith.constant 0 : index
    %212 = vector.load %arg12[%c0_199, %c0_200] : memref<1x8xf32, #tpu.memory_space<vmem>>, vector<1x8xf32>
    %213 = vector.broadcast %212 : vector<1x8xf32> to vector<128x8xf32>
    %214 = arith.addf %211, %213 : vector<128x8xf32>
    %215 = arith.addf %202, %214 : vector<128x8xf32>
    %216 = tpu.transpose %215, [1, 0] : vector<128x8xf32> -> vector<8x128xf32>
    %c0_201 = arith.constant 0 : index
    %c0_202 = arith.constant 0 : index
    %c0_203 = arith.constant 0 : index
    %217 = vector.load %arg14[%c0_201, %c0_202, %c0_203] : memref<1x8x128xf32, #tpu.memory_space<vmem>>, vector<1x8x128xf32>
    %218 = vector.shape_cast %217 : vector<1x8x128xf32> to vector<8x128xf32>
    %219 = vector.shape_cast %216 : vector<8x128xf32> to vector<1x8x128xf32>
    tpu.vector_store %arg14[%c0_201, %c0_202, %c0_203], %219 {strides = array<i32>} : memref<1x8x128xf32, #tpu.memory_space<vmem>>, vector<1x8x128xf32>,
    return
  }
  func.func @transform_0(%arg0: i32) -> (i32, i32, i32, i32) {
    %c0_i32 = arith.constant 0 : i32
    %c0_i32_0 = arith.constant 0 : i32
    %c0_i32_1 = arith.constant 0 : i32
    %c0_i32_2 = arith.constant 0 : i32
    return %arg0, %c0_i32, %c0_i32_0, %c0_i32_1 : i32, i32, i32, i32
  }
  func.func @transform_1(%arg0: i32) -> (i32, i32, i32, i32) {
    %c0_i32 = arith.constant 0 : i32
    %c0_i32_0 = arith.constant 0 : i32
    %c0_i32_1 = arith.constant 0 : i32
    %c0_i32_2 = arith.constant 0 : i32
    %c0_i32_3 = arith.constant 0 : i32
    return %c0_i32, %c0_i32_0, %c0_i32_1, %c0_i32_2 : i32, i32, i32, i32
  }
  func.func @transform_2(%arg0: i32) -> (i32, i32, i32, i32) {
    %c0_i32 = arith.constant 0 : i32
    %c0_i32_0 = arith.constant 0 : i32
    %c0_i32_1 = arith.constant 0 : i32
    %c0_i32_2 = arith.constant 0 : i32
    %c0_i32_3 = arith.constant 0 : i32
    return %c0_i32, %c0_i32_0, %c0_i32_1, %c0_i32_2 : i32, i32, i32, i32
  }
  func.func @transform_3(%arg0: i32) -> (i32, i32) {
    %c0_i32 = arith.constant 0 : i32
    %c0_i32_0 = arith.constant 0 : i32
    %c0_i32_1 = arith.constant 0 : i32
    return %c0_i32, %c0_i32_0 : i32, i32
  }
  func.func @transform_4(%arg0: i32) -> (i32, i32) {
    %c0_i32 = arith.constant 0 : i32
    %c0_i32_0 = arith.constant 0 : i32
    %c0_i32_1 = arith.constant 0 : i32
    return %c0_i32, %c0_i32_0 : i32, i32
  }
  func.func @transform_5(%arg0: i32) -> (i32, i32) {
    %c0_i32 = arith.constant 0 : i32
    %c0_i32_0 = arith.constant 0 : i32
    %c0_i32_1 = arith.constant 0 : i32
    return %c0_i32, %c0_i32_0 : i32, i32
  }
  func.func @transform_6(%arg0: i32) -> (i32, i32) {
    %c0_i32 = arith.constant 0 : i32
    %c0_i32_0 = arith.constant 0 : i32
    %c0_i32_1 = arith.constant 0 : i32
    return %c0_i32, %c0_i32_0 : i32, i32
  }
  func.func @transform_7(%arg0: i32) -> (i32, i32) {
    %c0_i32 = arith.constant 0 : i32
    %c0_i32_0 = arith.constant 0 : i32
    %c0_i32_1 = arith.constant 0 : i32
    return %c0_i32, %c0_i32_0 : i32, i32
  }
  func.func @transform_8(%arg0: i32) -> (i32, i32) {
    %c0_i32 = arith.constant 0 : i32
    %c0_i32_0 = arith.constant 0 : i32
    %c0_i32_1 = arith.constant 0 : i32
    return %c0_i32, %c0_i32_0 : i32, i32
  }
  func.func @transform_9(%arg0: i32) -> (i32, i32) {
    %c0_i32 = arith.constant 0 : i32
    %c0_i32_0 = arith.constant 0 : i32
    %c0_i32_1 = arith.constant 0 : i32
    return %c0_i32, %c0_i32_0 : i32, i32
  }
  func.func @transform_10(%arg0: i32) -> (i32, i32) {
    %c0_i32 = arith.constant 0 : i32
    %c0_i32_0 = arith.constant 0 : i32
    %c0_i32_1 = arith.constant 0 : i32
    return %c0_i32, %c0_i32_0 : i32, i32
  }
  func.func @transform_11(%arg0: i32) -> (i32, i32) {
    %c0_i32 = arith.constant 0 : i32
    %c0_i32_0 = arith.constant 0 : i32
    %c0_i32_1 = arith.constant 0 : i32
    return %c0_i32, %c0_i32_0 : i32, i32
  }
  func.func @transform_12(%arg0: i32) -> (i32, i32) {
    %c0_i32 = arith.constant 0 : i32
    %c0_i32_0 = arith.constant 0 : i32
    %c0_i32_1 = arith.constant 0 : i32
    return %c0_i32, %c0_i32_0 : i32, i32
  }
  func.func @transform_13(%arg0: i32) -> (i32, i32, i32) {
    %c0_i32 = arith.constant 0 : i32
    %c0_i32_0 = arith.constant 0 : i32
    %c0_i32_1 = arith.constant 0 : i32
    return %arg0, %c0_i32, %c0_i32_0 : i32, i32, i32
  }
}

</mosaic_0001>

<bundles_post_ra>
// kernel: tpu_custom_call.1
= control target key start
LH: loop header
LB: loop body
LE: loop exit
PB: predicated region body
PF: predicated region fallthrough
CT: control target
= control target key end

     0   :  { %s8340_s0 = inlined_call_operand.vmem [shape: bf16[2,16,16,4], index: 0, kind: input, shape index: {}]   ;;  %s8341_s1 = inlined_call_operand.vmem [shape: bf16[3,3,4,8], index: 1, kind: input, shape index: {}]   ;;  %s8342_s2 = inlined_call_operand.vmem [shape: bf16[3,3,8,8], index: 2, kind: input, shape index: {}]   ;;  %s8343_s3 = inlined_call_operand.vmem [shape: bf16[4,8], index: 3, kind: input, shape index: {}]   ;;  %s8344_s4 = inlined_call_operand.vmem [shape: f32[1,4], index: 4, kind: input, shape index: {}]   ;;  %s8345_s5 = inlined_call_operand.vmem [shape: f32[1,4], index: 5, kind: input, shape index: {}]   ;;  %s8346_s6 = inlined_call_operand.vmem [shape: f32[1,8], index: 6, kind: input, shape index: {}]   ;;  %s8347_s7 = inlined_call_operand.vmem [shape: f32[1,8], index: 7, kind: input, shape index: {}]   ;;  %s8348_s8 = inlined_call_operand.vmem [shape: f32[1,8], index: 8, kind: input, shape index: {}]   ;;  %s8349_s9 = inlined_call_operand.vmem [shape: f32[1,8], index: 9, kind: input, shape index: {}]   ;;  %s8350_s10 = inlined_call_operand.vmem [shape: f32[1,8], index: 10, kind: input, shape index: {}]   ;;  %s8351_s11 = inlined_call_operand.vmem [shape: f32[1,8], index: 11, kind: input, shape index: {}]   ;;  %s8352_s12 = inlined_call_operand.vmem [shape: f32[1,8], index: 12, kind: input, shape index: {}]   ;;  %s8353_s13 = inlined_call_operand.hbm [shape: f32[2,8,128], index: 13, kind: output, shape index: {}]  }
   0x1   :  { %8354 = sst [smem:[#allocation8_spill]] %s8340_s0 }
   0x2   :  { %8355 = sst [smem:[#allocation9_spill]] %s8341_s1 }
   0x3   :  { %18 = vsyncpa [#allocation5], 0 }
   0x4   :  { %20 = vsyncpa [#allocation5 + $0x1], 0  ;;  %s6971_s25 = smov 0   ;;  %s6973_s26 = smov 0  }
   0x5   :  { %s6975_s27 = smov 0   ;;  %s6977_s28 = smov 0  }
   0x6 LB: > { %s6992_s29 = sadd.s32 4294967295, %s6897_s28   ;;  %s5338_s30 = sadd.s32 4294967294, %s6897_s28   ;;  %s6897_s28 = sphi %s6977_s28, %s8365_s28   ;;  %s6893_s27 = sphi %s6975_s27, %s8364_s27   ;;  %s6889_s26 = sphi %s6973_s26, %s8363_s26   ;;  %s6885_s25 = sphi %s6971_s25, %s8362_s25  }
   0x7   : > { %s6996_s14 = sadd.s32 1, %s6897_s28   ;;  %s311_s15 = sadd.s32 1, %s6893_s27 }
   0x8   : > { %s308_s16 = ssub.s32 %s6897_s28, %s6996_s14  ;;  %p321_p0 = scmp.ne.s32.totalorder %s6893_s27, %s6889_s26 }
   0x9   : > { %p309_p1 = scmp.eq.s32.totalorder %s308_s16, 0  ;;  %p322_p2 = scmp.eq.s32.totalorder %s6992_s29, 1 }
   0xa   : > { %p327_p3 = scmp.ne.s32.totalorder %s6889_s26, %s6885_s25  ;;  %p328_p4 = scmp.eq.s32.totalorder %s5338_s30, 1 }
   0xb   : > { %s7007_s17 = scalar_select %p309_p1, %s6893_s27, %s311_s15  }
   0xc   : > { %p7009_p5 = por %p322_p2, %p321_p0  ;;  %p7013_p6 = por %p328_p4, %p327_p3 }
   0xd   : > { %8356 = sst [smem:[#allocation7_spill]] %s7007_s17  ;;  %p5341_p7 = scmp.ge.s32.totalorder %s6897_s28, 1 }
   0xe   : > { %p390_p8 = scmp.lt.s32.totalorder %s6897_s28, 3 }
  0x10   : > { %p391_p9 = pnand %p5341_p7, %p390_p8 }
  0x11   : > { %vm847_vm0 = vcmask (!%p391_p9), 1041408   ;;  %s8359_s1 = sld [smem:[#allocation9_spill]] (!%p391_p9)  ;;  %vm440_vm1 = vcmask (!%p391_p9), 31744   ;;  %p434_p10 = scmp.lt.s32.totalorder (!%p391_p9), %s6992_s29, 1  ;;  %v6899_v2 = vmov (!%p391_p9), 0.0   ;;  %vm3571_vm2 = vcmask (!%p391_p9), 1043456  }
  0x12   : > { %394 = sbr.rel (%p391_p9) target bundleno = 1339 (0x53b), region = 72  ;;  %442 = vst.msk [vmem:[#allocation2 + $0x8] sm:$0xff] (!%p391_p9), %vm440_vm1, %v6899_v2  ;;  %443 = vst.msk [vmem:[#allocation2 + $0x10] sm:$0xff] (!%p391_p9), %vm440_vm1, %v6899_v2  ;;  %s8360_s0 = sld [smem:[#allocation8_spill]] (!%p391_p9)  ;;  %v7120_v4 = vld [vmem:[%s8344_s4] ss:$0 sm:$0xff] (!%p391_p9) }
  0x13   : > { %444 = vst.msk [vmem:[#allocation2 + $0x18] sm:$0xff] (!%p391_p9), %vm440_vm1, %v6899_v2  ;;  %441 = vst.msk [vmem:[#allocation2] sm:$0xff] (!%p391_p9), %vm440_vm1, %v6899_v2  ;;  %v7132_v16 = vld [vmem:[%s8345_s5] ss:$0 sm:$0xff] (!%p391_p9)  ;;  %vm483_vm3 = vcmask (!%p391_p9), 64512   ;;  %s431_s22 = sand.u32 (!%p391_p9), 1, %s6889_s26  }
  0x14   : > { %446 = vst.msk [vmem:[#allocation2 + $0x220] sm:$0xff] (!%p391_p9), %vm440_vm1, %v6899_v2  ;;  %447 = vst.msk [vmem:[#allocation2 + $0x228] sm:$0xff] (!%p391_p9), %vm440_vm1, %v6899_v2  ;;  %s5266_s17 = scalar_lea.sflag (!%p391_p9), [#allocation5], %s431_s22 }
  0x15   : > { %448 = vst.msk [vmem:[#allocation2 + $0x230] sm:$0xff] (!%p391_p9), %vm440_vm1, %v6899_v2  ;;  %449 = vst.msk [vmem:[#allocation2 + $0x238] sm:$0xff] (!%p391_p9), %vm440_vm1, %v6899_v2 }
  0x16   : > { %451 = vst.msk [vmem:[#allocation2 + $0x20] sm:$0xff] (!%p391_p9), %vm440_vm1, %v6899_v2  ;;  %452 = vst.msk [vmem:[#allocation2 + $0x40] sm:$0xff] (!%p391_p9), %vm440_vm1, %v6899_v2 }
  0x17   : > { %v5380_v0 = vld [vmem:[%s8359_s1 + $0x4] sm:$0x3] (!%p391_p9)  ;;  %453 = vst.msk [vmem:[#allocation2 + $0x60] sm:$0xff] (!%p391_p9), %vm440_vm1, %v6899_v2  ;;  %454 = vst.msk [vmem:[#allocation2 + $0x80] sm:$0xff] (!%p391_p9), %vm440_vm1, %v6899_v2  ;;  %v5397_v3 = vld [vmem:[%s8359_s1 + $0x6] sm:$0x3] (!%p391_p9) }
  0x18   : > { %6762 = vmatprep.subr.msk.bf16.mxu0 (!%p391_p9), %vm847_vm0, %v5380_v0  ;;  %v1323_v1 = vsel (!%p391_p9), %vm847_vm0, %v5380_v0, 0  ;;  %455 = vst.msk [vmem:[#allocation2 + $0xa0] sm:$0xff] (!%p391_p9), %vm440_vm1, %v6899_v2  ;;  %456 = vst.msk [vmem:[#allocation2 + $0xc0] sm:$0xff] (!%p391_p9), %vm440_vm1, %v6899_v2  ;;  %v7124_v6 = vsel (!%p391_p9), %vm847_vm0, %v5397_v3, 0 }
  0x19   : > { %457 = vst.msk [vmem:[#allocation2 + $0xe0] sm:$0xff] %vm440_vm1, %v6899_v2  ;;  %458 = vst.msk [vmem:[#allocation2 + $0x100] sm:$0xff] %vm440_vm1, %v6899_v2  ;;  %5959 = vmatpush3.bf16.msra.mxu0 %v1323_v1  ;;  %s435_s24 = scalar_select %p434_p10, %s6992_s29, 1  ;;  %v1224_v14 = vld [vmem:[#allocation2 + $0x9] sm:$0xff] }
  0x1a   : > { %459 = vst.msk [vmem:[#allocation2 + $0x120] sm:$0xff] %vm440_vm1, %v6899_v2  ;;  %460 = vst.msk [vmem:[#allocation2 + $0x140] sm:$0xff] %vm440_vm1, %v6899_v2  ;;  %6763 = vmatprep.subr.msk.bf16.mxu0 %vm847_vm0, %v5397_v3  ;;  %v1225_v15 = vld [vmem:[#allocation2 + $0x11] sm:$0xff] }
  0x1b   : > { %461 = vst.msk [vmem:[#allocation2 + $0x160] sm:$0xff] %vm440_vm1, %v6899_v2  ;;  %462 = vst.msk [vmem:[#allocation2 + $0x180] sm:$0xff] %vm440_vm1, %v6899_v2  ;;  %s5606_s30 = sshll.u32 %s435_s24, 7  ;;  %v1256_v21 = vpack.c.bf16 %v1225_v15, %v1224_v14 }
  0x1c   : > { %463 = vst.msk [vmem:[#allocation2 + $0x1a0] sm:$0xff] %vm440_vm1, %v6899_v2  ;;  %464 = vst.msk [vmem:[#allocation2 + $0x1c0] sm:$0xff] %vm440_vm1, %v6899_v2  ;;  %s7115_s20 = scalar_lea.vmem %s8360_s0, %s5606_s30  ;;  %s5603_s30 = sshll.u32 %s6992_s29, 7 }
  0x1d   : > { %465 = vst.msk [vmem:[#allocation2 + $0x1e0] sm:$0xff] %vm440_vm1, %v6899_v2  ;;  %466 = vst.msk [vmem:[#allocation2 + $0x200] sm:$0xff] %vm440_vm1, %v6899_v2  ;;  %v526_v5 = vld [vmem:[%s7115_s20] sm:$0xff]   ;;  %v5639_v7 = vld [vmem:[%s7115_s20 + $0x8] sm:$0xff]   ;;  %5960 = vmatprep.mubr.msk.bf16.mxu0 %vm440_vm1, %v1256_v21  ;;  %s8300_s21 = scalar_lea.hbm %s8353_s13, %s5603_s30 }
  0x1e   : > { %467 = vst.msk [vmem:[#allocation2 + $0x38] sm:$0xff] %vm440_vm1, %v6899_v2  ;;  %468 = vst.msk [vmem:[#allocation2 + $0x58] sm:$0xff] %vm440_vm1, %v6899_v2  ;;  %v530_v8 = vld [vmem:[%s7115_s20 + $0x10] sm:$0xff]   ;;  %v558_v9 = vunpack.c.l.bf16 %v526_v5  ;;  %v559_v10 = vunpack.c.h.bf16 %v526_v5  ;;  %v5609_v11 = vunpack.c.l.bf16 %v5639_v7  ;;  %v5610_v12 = vunpack.c.h.bf16 %v5639_v7  ;;  %v5640_v13 = vld [vmem:[%s7115_s20 + $0x18] sm:$0xff]  }
  0x1f   : > { %469 = vst.msk [vmem:[#allocation2 + $0x78] sm:$0xff] %vm440_vm1, %v6899_v2  ;;  %470 = vst.msk [vmem:[#allocation2 + $0x98] sm:$0xff] %vm440_vm1, %v6899_v2  ;;  %v562_v17 = vunpack.c.l.bf16 %v530_v8  ;;  %v563_v18 = vunpack.c.h.bf16 %v530_v8  ;;  %v5613_v19 = vunpack.c.l.bf16 %v5640_v13  ;;  %v5614_v20 = vunpack.c.h.bf16 %v5640_v13  ;;  %v534_v29 = vld [vmem:[%s7115_s20 + $0x20] sm:$0xff]   ;;  %v5641_v30 = vld [vmem:[%s7115_s20 + $0x28] sm:$0xff]  }
  0x20   : > { %471 = vst.msk [vmem:[#allocation2 + $0xb8] sm:$0xff] %vm440_vm1, %v6899_v2  ;;  %472 = vst.msk [vmem:[#allocation2 + $0xd8] sm:$0xff] %vm440_vm1, %v6899_v2  ;;  %v597_v22 = vmul.f32 %v7120_v4, %v558_v9  ;;  %v598_v23 = vmul.f32 %v7120_v4, %v559_v10  ;;  %v599_v24 = vmul.f32 %v5609_v11, %v7120_v4  ;;  %v538_v35 = vld [vmem:[%s7115_s20 + $0x30] sm:$0xff]   ;;  %v5642_v36 = vld [vmem:[%s7115_s20 + $0x38] sm:$0xff]   ;;  %v566_v42 = vunpack.c.l.bf16 %v534_v29 }
  0x21   : > { %473 = vst.msk [vmem:[#allocation2 + $0xf8] sm:$0xff] %vm440_vm1, %v6899_v2  ;;  %474 = vst.msk [vmem:[#allocation2 + $0x118] sm:$0xff] %vm440_vm1, %v6899_v2  ;;  %v600_v25 = vmul.f32 %v5610_v12, %v7120_v4  ;;  %v601_v26 = vmul.f32 %v7120_v4, %v562_v17  ;;  %v602_v27 = vmul.f32 %v7120_v4, %v563_v18  ;;  %v567_v43 = vunpack.c.h.bf16 %v534_v29  ;;  %v542_v57 = vld [vmem:[%s7115_s20 + $0x40] sm:$0xff]   ;;  %v5643_v58 = vld [vmem:[%s7115_s20 + $0x48] sm:$0xff]  }
  0x22   : > { %475 = vst.msk [vmem:[#allocation2 + $0x138] sm:$0xff] %vm440_vm1, %v6899_v2  ;;  %476 = vst.msk [vmem:[#allocation2 + $0x158] sm:$0xff] %vm440_vm1, %v6899_v2  ;;  %v603_v28 = vmul.f32 %v5613_v19, %v7120_v4  ;;  %v636_v31 = vadd.f32 %v7132_v16, %v597_v22  ;;  %v637_v32 = vadd.f32 %v7132_v16, %v598_v23  ;;  %v5617_v44 = vunpack.c.l.bf16 %v5641_v30  ;;  %v546_v63 = vld [vmem:[%s7115_s20 + $0x50] sm:$0xff]   ;;  %v5644_v0 = vld [vmem:[%s7115_s20 + $0x58] sm:$0xff]  }
  0x23   : > { %477 = vst.msk [vmem:[#allocation2 + $0x178] sm:$0xff] %vm440_vm1, %v6899_v2  ;;  %478 = vst.msk [vmem:[#allocation2 + $0x198] sm:$0xff] %vm440_vm1, %v6899_v2  ;;  %v638_v33 = vadd.f32 %v7132_v16, %v599_v24  ;;  %v604_v34 = vmul.f32 %v5614_v20, %v7120_v4  ;;  %v639_v37 = vadd.f32 %v7132_v16, %v600_v25  ;;  %v5618_v45 = vunpack.c.h.bf16 %v5641_v30  ;;  %v550_v29 = vld [vmem:[%s7115_s20 + $0x60] sm:$0xff]   ;;  %v7205_v30 = vld [vmem:[%s8359_s1 + $0x8] sm:$0x3] }
  0x24   : > { %479 = vst.msk [vmem:[#allocation2 + $0x1b8] sm:$0xff] %vm440_vm1, %v6899_v2  ;;  %480 = vst.msk [vmem:[#allocation2 + $0x1d8] sm:$0xff] %vm440_vm1, %v6899_v2  ;;  %v640_v38 = vadd.f32 %v7132_v16, %v601_v26  ;;  %v641_v39 = vadd.f32 %v7132_v16, %v602_v27  ;;  %v642_v40 = vadd.f32 %v7132_v16, %v603_v28  ;;  %v570_v46 = vunpack.c.l.bf16 %v538_v35 }
  0x25   : > { %481 = vst.msk [vmem:[#allocation2 + $0x1f8] sm:$0xff] %vm440_vm1, %v6899_v2  ;;  %482 = vst.msk [vmem:[#allocation2 + $0x218] sm:$0xff] %vm440_vm1, %v6899_v2  ;;  %v643_v41 = vadd.f32 %v7132_v16, %v604_v34  ;;  %v571_v47 = vunpack.c.h.bf16 %v538_v35  ;;  %v5621_v48 = vunpack.c.l.bf16 %v5642_v36  ;;  %v605_v49 = vmul.f32 %v7120_v4, %v566_v42  ;;  %v554_v34 = vld [vmem:[%s7115_s20 + $0x70] sm:$0xff]  }
  0x26   : > { %668 = vst.msk [vmem:[#allocation2 + $0x28] sm:$0xff] %vm440_vm1, %v636_v31  ;;  %669 = vst.msk [vmem:[#allocation2 + $0x30] sm:$0xff] %vm440_vm1, %v637_v32  ;;  %v606_v50 = vmul.f32 %v7120_v4, %v567_v43  ;;  %v607_v51 = vmul.f32 %v5617_v44, %v7120_v4  ;;  %v5622_v52 = vunpack.c.h.bf16 %v5642_v36  ;;  %v608_v53 = vmul.f32 %v5618_v45, %v7120_v4 }
  0x27   : > { %670 = vst.msk [vmem:[#allocation2 + $0x48] sm:$0xff] %vm440_vm1, %v638_v33  ;;  %671 = vst.msk [vmem:[#allocation2 + $0x50] sm:$0xff] %vm440_vm1, %v639_v37  ;;  %v609_v54 = vmul.f32 %v7120_v4, %v570_v46  ;;  %v610_v55 = vmul.f32 %v7120_v4, %v571_v47  ;;  %v611_v56 = vmul.f32 %v5621_v48, %v7120_v4  ;;  %v574_v9 = vunpack.c.l.bf16 %v542_v57  ;;  %v5645_v33 = vld [vmem:[%s7115_s20 + $0x68] sm:$0xff]  }
  0x28   : > { %672 = vst.msk [vmem:[#allocation2 + $0x68] sm:$0xff] %vm440_vm1, %v640_v38  ;;  %673 = vst.msk [vmem:[#allocation2 + $0x70] sm:$0xff] %vm440_vm1, %v641_v39  ;;  %v644_v59 = vadd.f32 %v7132_v16, %v605_v49  ;;  %v645_v60 = vadd.f32 %v7132_v16, %v606_v50  ;;  %v646_v61 = vadd.f32 %v7132_v16, %v607_v51  ;;  %v575_v10 = vunpack.c.h.bf16 %v542_v57 }
  0x29   : > { %674 = vst.msk [vmem:[#allocation2 + $0x88] sm:$0xff] %vm440_vm1, %v642_v40  ;;  %675 = vst.msk [vmem:[#allocation2 + $0x90] sm:$0xff] %vm440_vm1, %v643_v41  ;;  %v612_v62 = vmul.f32 %v5622_v52, %v7120_v4  ;;  %v647_v1 = vadd.f32 %v7132_v16, %v608_v53  ;;  %v648_v3 = vadd.f32 %v7132_v16, %v609_v54  ;;  %v5625_v11 = vunpack.c.l.bf16 %v5643_v58 }
  0x2a   : > { %v649_v5 = vadd.f32 %v7132_v16, %v610_v55  ;;  %v650_v7 = vadd.f32 %v7132_v16, %v611_v56  ;;  %676 = vst.msk [vmem:[#allocation2 + $0xa8] sm:$0xff] %vm440_vm1, %v644_v59  ;;  %677 = vst.msk [vmem:[#allocation2 + $0xb0] sm:$0xff] %vm440_vm1, %v645_v60  ;;  %v5626_v14 = vunpack.c.h.bf16 %v5643_v58  ;;  %v578_v15 = vunpack.c.l.bf16 %v546_v63 }
  0x2b   : > { %678 = vst.msk [vmem:[#allocation2 + $0xc8] sm:$0xff] %vm440_vm1, %v646_v61  ;;  %v651_v8 = vadd.f32 %v7132_v16, %v612_v62  ;;  %679 = vst.msk [vmem:[#allocation2 + $0xd0] sm:$0xff] %vm440_vm1, %v647_v1  ;;  %v579_v17 = vunpack.c.h.bf16 %v546_v63  ;;  %v5629_v18 = vunpack.c.l.bf16 %v5644_v0  ;;  %v613_v22 = vmul.f32 %v7120_v4, %v574_v9 }
  0x2c   : > { %680 = vst.msk [vmem:[#allocation2 + $0xe8] sm:$0xff] %vm440_vm1, %v648_v3  ;;  %681 = vst.msk [vmem:[#allocation2 + $0xf0] sm:$0xff] %vm440_vm1, %v649_v5  ;;  %v614_v23 = vmul.f32 %v7120_v4, %v575_v10  ;;  %v615_v24 = vmul.f32 %v5625_v11, %v7120_v4  ;;  %v616_v26 = vmul.f32 %v5626_v14, %v7120_v4  ;;  %v5630_v40 = vunpack.c.h.bf16 %v5644_v0  ;;  %v5646_v0 = vld [vmem:[%s7115_s20 + $0x78] sm:$0xff]  }
  0x2d   : > { %v1226_v12 = vld [vmem:[#allocation2 + $0x29] sm:$0xff]  ;;  %v1227_v13 = vld [vmem:[#allocation2 + $0x31] sm:$0xff]  ;;  %682 = vst.msk [vmem:[#allocation2 + $0x108] sm:$0xff] %vm440_vm1, %v650_v7  ;;  %683 = vst.msk [vmem:[#allocation2 + $0x110] sm:$0xff] %vm440_vm1, %v651_v8  ;;  %v617_v27 = vmul.f32 %v7120_v4, %v578_v15  ;;  %v618_v28 = vmul.f32 %v7120_v4, %v579_v17  ;;  %v652_v31 = vadd.f32 %v7132_v16, %v613_v22  ;;  %v582_v44 = vunpack.c.l.bf16 %v550_v29 }
  0x2e   : > { %v7190_v19 = vpack.c.bf16 %v1227_v13, %v1226_v12  ;;  %v1228_v20 = vld [vmem:[#allocation2 + $0x49] sm:$0xff]  ;;  %v1229_v21 = vld [vmem:[#allocation2 + $0x51] sm:$0xff]  ;;  %v653_v32 = vadd.f32 %v7132_v16, %v614_v23  ;;  %v654_v37 = vadd.f32 %v7132_v16, %v615_v24  ;;  %v655_v38 = vadd.f32 %v7132_v16, %v616_v26  ;;  %484 = vst.msk [vmem:[#allocation3] sm:$0xff] %vm483_vm3, %v6899_v2 }
  0x2f   : > { %v7196_v25 = vpack.c.bf16 %v1229_v21, %v1228_v20  ;;  %v1230_v35 = vld [vmem:[#allocation2 + $0x69] sm:$0xff]  ;;  %v1231_v36 = vld [vmem:[#allocation2 + $0x71] sm:$0xff]  ;;  %v656_v39 = vadd.f32 %v7132_v16, %v617_v27  ;;  %684 = vst.msk [vmem:[#allocation2 + $0x128] sm:$0xff] %vm440_vm1, %v652_v31  ;;  %v619_v43 = vmul.f32 %v5629_v18, %v7120_v4  ;;  %v583_v45 = vunpack.c.h.bf16 %v550_v29 }
  0x30   : > { %5961 = vmatmul.mubr.msk.bf16.vlgmr.msra.gmra.mrb[0].mxu0 %vm440_vm1, %v7190_v19  ;;  %v1232_v41 = vld [vmem:[#allocation2 + $0x89] sm:$0xff]  ;;  %v1233_v42 = vld [vmem:[#allocation2 + $0x91] sm:$0xff]  ;;  %685 = vst.msk [vmem:[#allocation2 + $0x130] sm:$0xff] %vm440_vm1, %v653_v32  ;;  %686 = vst.msk [vmem:[#allocation2 + $0x148] sm:$0xff] %vm440_vm1, %v654_v37  ;;  %v620_v46 = vmul.f32 %v5630_v40, %v7120_v4  ;;  %v5633_v47 = vunpack.c.l.bf16 %v5645_v33  ;;  %v5634_v48 = vunpack.c.h.bf16 %v5645_v33  ;;  %v586_v49 = vunpack.c.l.bf16 %v554_v34 }
  0x31   : > { %5993 = vmatpush3.bf16.msra.mxu0 %v7124_v6  ;;  %5964 = vmatprep.mubr.msk.bf16.mxu0 %vm440_vm1, %v7196_v25  ;;  %v657_v6 = vadd.f32 %v7132_v16, %v618_v28  ;;  %687 = vst.msk [vmem:[#allocation2 + $0x150] sm:$0xff] %vm440_vm1, %v655_v38  ;;  %688 = vst.msk [vmem:[#allocation2 + $0x168] sm:$0xff] %vm440_vm1, %v656_v39  ;;  %v7229_v50 = vpack.c.bf16 %v1231_v36, %v1230_v35  ;;  %v587_v62 = vunpack.c.h.bf16 %v554_v34  ;;  %v1234_v1 = vld [vmem:[#allocation2 + $0xa9] sm:$0xff]  ;;  %v1235_v3 = vld [vmem:[#allocation2 + $0xb1] sm:$0xff] }
  0x32   : > { %6764 = vmatprep.subr.msk.bf16.mxu0 %vm847_vm0, %v7205_v30  ;;  %v658_v51 = vadd.f32 %v7132_v16, %v619_v43  ;;  %v621_v52 = vmul.f32 %v7120_v4, %v582_v44  ;;  %v622_v53 = vmul.f32 %v7120_v4, %v583_v45  ;;  %v7235_v54 = vpack.c.bf16 %v1233_v42, %v1232_v41  ;;  %v1236_v8 = vld [vmem:[#allocation2 + $0xc9] sm:$0xff]  ;;  %v1237_v9 = vld [vmem:[#allocation2 + $0xd1] sm:$0xff] }
  0x33   : > { %689 = vst.msk [vmem:[#allocation2 + $0x170] sm:$0xff] %vm440_vm1, %v657_v6  ;;  %v659_v55 = vadd.f32 %v7132_v16, %v620_v46  ;;  %v623_v56 = vmul.f32 %v5633_v47, %v7120_v4  ;;  %v624_v57 = vmul.f32 %v5634_v48, %v7120_v4  ;;  %v625_v63 = vmul.f32 %v7120_v4, %v586_v49  ;;  %v1238_v21 = vld [vmem:[#allocation2 + $0xe9] sm:$0xff]  ;;  %v1239_v22 = vld [vmem:[#allocation2 + $0xf1] sm:$0xff] }
  0x34   : > { %690 = vst.msk [vmem:[#allocation2 + $0x188] sm:$0xff] %vm440_vm1, %v658_v51  ;;  %v660_v58 = vadd.f32 %v7132_v16, %v621_v52  ;;  %v661_v59 = vadd.f32 %v7132_v16, %v622_v53  ;;  %v626_v5 = vmul.f32 %v7120_v4, %v587_v62  ;;  %v5637_v10 = vunpack.c.l.bf16 %v5646_v0  ;;  %v1240_v23 = vld [vmem:[#allocation2 + $0x109] sm:$0xff]  ;;  %v1241_v24 = vld [vmem:[#allocation2 + $0x111] sm:$0xff] }
  0x35   : > { %691 = vst.msk [vmem:[#allocation2 + $0x190] sm:$0xff] %vm440_vm1, %v659_v55  ;;  %v662_v60 = vadd.f32 %v7132_v16, %v623_v56  ;;  %v663_v61 = vadd.f32 %v7132_v16, %v624_v57  ;;  %v664_v7 = vadd.f32 %v7132_v16, %v625_v63  ;;  %v5638_v12 = vunpack.c.h.bf16 %v5646_v0  ;;  %v1518_v46 = vld [vmem:[#allocation2 + $0x27] sm:$0xff]  ;;  %v1519_v47 = vld [vmem:[#allocation2 + $0x2f] sm:$0xff] }
  0x36   : > { %692 = vst.msk [vmem:[#allocation2 + $0x1a8] sm:$0xff] %vm440_vm1, %v660_v58  ;;  %693 = vst.msk [vmem:[#allocation2 + $0x1b0] sm:$0xff] %vm440_vm1, %v661_v59  ;;  %v665_v11 = vadd.f32 %v7132_v16, %v626_v5  ;;  %v7260_v13 = vpack.c.bf16 %v1235_v3, %v1234_v1  ;;  %v627_v14 = vmul.f32 %v5637_v10, %v7120_v4  ;;  %v1520_v51 = vld [vmem:[#allocation2 + $0x47] sm:$0xff]  ;;  %v1521_v52 = vld [vmem:[#allocation2 + $0x4f] sm:$0xff]  ;;  %v1911_v58 = vsel %vm847_vm0, %v7205_v30, 0 }
  0x37   : > { %694 = vst.msk [vmem:[#allocation2 + $0x1c8] sm:$0xff] %vm440_vm1, %v662_v60  ;;  %695 = vst.msk [vmem:[#allocation2 + $0x1d0] sm:$0xff] %vm440_vm1, %v663_v61  ;;  %v7263_v15 = vpack.c.bf16 %v1237_v9, %v1236_v8  ;;  %v628_v17 = vmul.f32 %v5638_v12, %v7120_v4  ;;  %v7275_v26 = vpack.c.bf16 %v1239_v22, %v1238_v21  ;;  %v1243_v27 = vld [vmem:[#allocation2 + $0x131] sm:$0xff]  ;;  %v1522_v53 = vld [vmem:[#allocation2 + $0x67] sm:$0xff] }
  0x38   : > { %5965 = vmatmul.mubr.msk.bf16.gmra.mrb[4].mxu0 %vm440_vm1, %v7229_v50  ;;  %696 = vst.msk [vmem:[#allocation2 + $0x1e8] sm:$0xff] %vm440_vm1, %v664_v7  ;;  %697 = vst.msk [vmem:[#allocation2 + $0x1f0] sm:$0xff] %vm440_vm1, %v665_v11  ;;  %v666_v18 = vadd.f32 %v7132_v16, %v627_v14  ;;  %v7277_v4 = vpack.c.bf16 %v1241_v24, %v1240_v23  ;;  %v1244_v28 = vld [vmem:[#allocation2 + $0x149] sm:$0xff]  ;;  %v1245_v29 = vld [vmem:[#allocation2 + $0x151] sm:$0xff]  ;;  %v7309_v49 = vpack.c.bf16 %v1519_v47, %v1518_v46 }
  0x39   : > { %5968 = vmatprep.mubr.msk.bf16.mxu0 %vm440_vm1, %v7235_v54  ;;  %v667_v20 = vadd.f32 %v7132_v16, %v628_v17  ;;  %v1242_v16 = vld [vmem:[#allocation2 + $0x129] sm:$0xff]  ;;  %v7285_v32 = vpack.c.bf16 %v1245_v29, %v1244_v28  ;;  %v7315_v56 = vpack.c.bf16 %v1521_v52, %v1520_v51  ;;  %485 = vst.msk [vmem:[#allocation3 + $0x8] sm:$0xff] %vm483_vm3, %v6899_v2  ;;  %486 = vst.msk [vmem:[#allocation3 + $0x10] sm:$0xff] %vm483_vm3, %v6899_v2 }
  0x3a   : > { %698 = vst.msk [vmem:[#allocation2 + $0x208] sm:$0xff] %vm440_vm1, %v666_v18  ;;  %v7283_v31 = vpack.c.bf16 %v1243_v27, %v1242_v16  ;;  %v1246_v33 = vld [vmem:[#allocation2 + $0x169] sm:$0xff]  ;;  %v1247_v34 = vld [vmem:[#allocation2 + $0x171] sm:$0xff] }
  0x3b   : > { %699 = vst.msk [vmem:[#allocation2 + $0x210] sm:$0xff] %vm440_vm1, %v667_v20  ;;  %v7291_v37 = vpack.c.bf16 %v1247_v34, %v1246_v33  ;;  %v1523_v55 = vld [vmem:[#allocation2 + $0x6f] sm:$0xff]  ;;  %v7324_v59 = vld [vmem:[%s8359_s1 + $0xa] sm:$0x3] }
  0x3c   : > { %v1248_v35 = vld [vmem:[#allocation2 + $0x189] sm:$0xff]  ;;  %v1249_v36 = vld [vmem:[#allocation2 + $0x191] sm:$0xff]  ;;  %v7317_v57 = vpack.c.bf16 %v1523_v55, %v1522_v53  ;;  %v5347_v55 = vld [vmem:[%s8359_s1 + $0x2] sm:$0x3]  ;;  %487 = vst.msk [vmem:[#allocation3 + $0x18] sm:$0xff] %vm483_vm3, %v6899_v2 }
  0x3d   : > { %v7293_v38 = vpack.c.bf16 %v1249_v36, %v1248_v35  ;;  %v1250_v39 = vld [vmem:[#allocation2 + $0x1a9] sm:$0xff]  ;;  %v1251_v40 = vld [vmem:[#allocation2 + $0x1b1] sm:$0xff]  ;;  %6760 = vmatprep.subr.msk.bf16.mxu1 %vm847_vm0, %v5347_v55  ;;  %494 = vst.msk [vmem:[#allocation3 + $0x20] sm:$0xff] %vm483_vm3, %v6899_v2  ;;  %495 = vst.msk [vmem:[#allocation3 + $0x40] sm:$0xff] %vm483_vm3, %v6899_v2 }
  0x3e   : > { %v1252_v41 = vld [vmem:[#allocation2 + $0x1c9] sm:$0xff]  ;;  %v1253_v42 = vld [vmem:[#allocation2 + $0x1d1] sm:$0xff]  ;;  %v7299_v6 = vpack.c.bf16 %v1251_v40, %v1250_v39  ;;  %496 = vst.msk [vmem:[#allocation3 + $0x60] sm:$0xff] %vm483_vm3, %v6899_v2  ;;  %497 = vst.msk [vmem:[#allocation3 + $0x80] sm:$0xff] %vm483_vm3, %v6899_v2 }
  0x3f   : > { %v7301_v43 = vpack.c.bf16 %v1253_v42, %v1252_v41  ;;  %v1254_v44 = vld [vmem:[#allocation2 + $0x1e9] sm:$0xff]  ;;  %v1255_v45 = vld [vmem:[#allocation2 + $0x1f1] sm:$0xff]  ;;  %498 = vst.msk [vmem:[#allocation3 + $0xa0] sm:$0xff] %vm483_vm3, %v6899_v2  ;;  %499 = vst.msk [vmem:[#allocation3 + $0xc0] sm:$0xff] %vm483_vm3, %v6899_v2 }
  0x40   : > { %5969 = vmatmul.mubr.msk.bf16.gmra.mrb[8].mxu0 %vm440_vm1, %v7260_v13  ;;  %v7307_v48 = vpack.c.bf16 %v1255_v45, %v1254_v44  ;;  %v1524_v60 = vld [vmem:[#allocation2 + $0x87] sm:$0xff]  ;;  %v1525_v61 = vld [vmem:[#allocation2 + $0x8f] sm:$0xff]  ;;  %500 = vst.msk [vmem:[#allocation3 + $0xe0] sm:$0xff] %vm483_vm3, %v6899_v2  ;;  %501 = vst.msk [vmem:[#allocation3 + $0x100] sm:$0xff] %vm483_vm3, %v6899_v2 }
  0x41   : > { %5972 = vmatprep.mubr.msk.bf16.mxu0 %vm440_vm1, %v7263_v15  ;;  %v1526_v62 = vld [vmem:[#allocation2 + $0xa7] sm:$0xff]  ;;  %v1527_v63 = vld [vmem:[#allocation2 + $0xaf] sm:$0xff]  ;;  %v7332_v30 = vpack.c.bf16 %v1525_v61, %v1524_v60  ;;  %502 = vst.msk [vmem:[#allocation3 + $0x120] sm:$0xff] %vm483_vm3, %v6899_v2  ;;  %503 = vst.msk [vmem:[#allocation3 + $0x140] sm:$0xff] %vm483_vm3, %v6899_v2 }
  0x42   : > { %v7334_v0 = vpack.c.bf16 %v1527_v63, %v1526_v62  ;;  %v1528_v1 = vld [vmem:[#allocation2 + $0xc7] sm:$0xff]  ;;  %v1529_v3 = vld [vmem:[#allocation2 + $0xcf] sm:$0xff]  ;;  %v849_v63 = vsel %vm847_vm0, %v5347_v55, 0  ;;  %504 = vst.msk [vmem:[#allocation3 + $0x160] sm:$0xff] %vm483_vm3, %v6899_v2  ;;  %505 = vst.msk [vmem:[#allocation3 + $0x180] sm:$0xff] %vm483_vm3, %v6899_v2 }
  0x43   : > { %v1530_v5 = vld [vmem:[#allocation2 + $0xe7] sm:$0xff]  ;;  %v1531_v7 = vld [vmem:[#allocation2 + $0xef] sm:$0xff]  ;;  %v7340_v8 = vpack.c.bf16 %v1529_v3, %v1528_v1  ;;  %5891 = vmatpush3.bf16.msra.mxu1 %v849_v63  ;;  %506 = vst.msk [vmem:[#allocation3 + $0x1a0] sm:$0xff] %vm483_vm3, %v6899_v2  ;;  %507 = vst.msk [vmem:[#allocation3 + $0x1c0] sm:$0xff] %vm483_vm3, %v6899_v2 }
  0x44   : > { %v7342_v9 = vpack.c.bf16 %v1531_v7, %v1530_v5  ;;  %v1532_v10 = vld [vmem:[#allocation2 + $0x107] sm:$0xff]  ;;  %v1533_v11 = vld [vmem:[#allocation2 + $0x10f] sm:$0xff]  ;;  %508 = vst.msk [vmem:[#allocation3 + $0x1e0] sm:$0xff] %vm483_vm3, %v6899_v2  ;;  %509 = vst.msk [vmem:[#allocation3 + $0x200] sm:$0xff] %vm483_vm3, %v6899_v2 }
  0x45   : > { %v1534_v12 = vld [vmem:[#allocation2 + $0x127] sm:$0xff]  ;;  %v1535_v14 = vld [vmem:[#allocation2 + $0x12f] sm:$0xff]  ;;  %v7348_v17 = vpack.c.bf16 %v1533_v11, %v1532_v10  ;;  %v2205_v11 = vsel %vm847_vm0, %v7324_v59, 0  ;;  %510 = vst.msk [vmem:[#allocation3 + $0x38] sm:$0xff] %vm483_vm3, %v6899_v2  ;;  %511 = vst.msk [vmem:[#allocation3 + $0x58] sm:$0xff] %vm483_vm3, %v6899_v2 }
  0x46   : > { %v7350_v18 = vpack.c.bf16 %v1535_v14, %v1534_v12  ;;  %v1536_v20 = vld [vmem:[#allocation2 + $0x147] sm:$0xff]  ;;  %v1537_v21 = vld [vmem:[#allocation2 + $0x14f] sm:$0xff]  ;;  %512 = vst.msk [vmem:[#allocation3 + $0x78] sm:$0xff] %vm483_vm3, %v6899_v2  ;;  %513 = vst.msk [vmem:[#allocation3 + $0x98] sm:$0xff] %vm483_vm3, %v6899_v2 }
  0x47   : > { %v1538_v22 = vld [vmem:[#allocation2 + $0x167] sm:$0xff]  ;;  %v1539_v23 = vld [vmem:[#allocation2 + $0x16f] sm:$0xff]  ;;  %v7356_v24 = vpack.c.bf16 %v1537_v21, %v1536_v20  ;;  %514 = vst.msk [vmem:[#allocation3 + $0xb8] sm:$0xff] %vm483_vm3, %v6899_v2  ;;  %515 = vst.msk [vmem:[#allocation3 + $0xd8] sm:$0xff] %vm483_vm3, %v6899_v2 }
  0x48   : > { %5973 = vmatmul.mubr.msk.bf16.gmra.mrb[12].mxu0 %vm440_vm1, %v7275_v26  ;;  %v7358_v16 = vpack.c.bf16 %v1539_v23, %v1538_v22  ;;  %v1540_v27 = vld [vmem:[#allocation2 + $0x187] sm:$0xff]  ;;  %v1541_v28 = vld [vmem:[#allocation2 + $0x18f] sm:$0xff]  ;;  %516 = vst.msk [vmem:[#allocation3 + $0xf8] sm:$0xff] %vm483_vm3, %v6899_v2  ;;  %517 = vst.msk [vmem:[#allocation3 + $0x118] sm:$0xff] %vm483_vm3, %v6899_v2 }
  0x49   : > { %5976 = vmatprep.mubr.msk.bf16.mxu0 %vm440_vm1, %v7277_v4  ;;  %v1542_v29 = vld [vmem:[#allocation2 + $0x1a7] sm:$0xff]  ;;  %v1543_v33 = vld [vmem:[#allocation2 + $0x1af] sm:$0xff]  ;;  %v7364_v34 = vpack.c.bf16 %v1541_v28, %v1540_v27  ;;  %518 = vst.msk [vmem:[#allocation3 + $0x138] sm:$0xff] %vm483_vm3, %v6899_v2  ;;  %519 = vst.msk [vmem:[#allocation3 + $0x158] sm:$0xff] %vm483_vm3, %v6899_v2 }
  0x4a   : > { %v7366_v35 = vpack.c.bf16 %v1543_v33, %v1542_v29  ;;  %v1544_v36 = vld [vmem:[#allocation2 + $0x1c7] sm:$0xff]  ;;  %v1545_v39 = vld [vmem:[#allocation2 + $0x1cf] sm:$0xff]  ;;  %520 = vst.msk [vmem:[#allocation3 + $0x178] sm:$0xff] %vm483_vm3, %v6899_v2  ;;  %521 = vst.msk [vmem:[#allocation3 + $0x198] sm:$0xff] %vm483_vm3, %v6899_v2 }
  0x4b   : > { %v1546_v40 = vld [vmem:[#allocation2 + $0x1e7] sm:$0xff]  ;;  %v1547_v41 = vld [vmem:[#allocation2 + $0x1ef] sm:$0xff]  ;;  %v7372_v42 = vpack.c.bf16 %v1545_v39, %v1544_v36  ;;  %522 = vst.msk [vmem:[#allocation3 + $0x1b8] sm:$0xff] %vm483_vm3, %v6899_v2  ;;  %523 = vst.msk [vmem:[#allocation3 + $0x1d8] sm:$0xff] %vm483_vm3, %v6899_v2 }
  0x4c   : > { %v7374_v44 = vpack.c.bf16 %v1547_v41, %v1546_v40  ;;  %v1548_v45 = vld [vmem:[#allocation2 + $0x207] sm:$0xff]  ;;  %v1549_v46 = vld [vmem:[#allocation2 + $0x20f] sm:$0xff]  ;;  %524 = vst.msk [vmem:[#allocation3 + $0x1f8] sm:$0xff] %vm483_vm3, %v6899_v2  ;;  %525 = vst.msk [vmem:[#allocation3 + $0x218] sm:$0xff] %vm483_vm3, %v6899_v2 }
  0x4d   : > { %v1812_v47 = vld [vmem:[#allocation2 + $0x28] sm:$0xff]  ;;  %v1813_v51 = vld [vmem:[#allocation2 + $0x30] sm:$0xff]  ;;  %v7380_v52 = vpack.c.bf16 %v1549_v46, %v1548_v45 }
  0x4e   : > { %v1844_v53 = vpack.c.bf16 %v1813_v51, %v1812_v47  ;;  %v750_v60 = vld [vmem:[#allocation2 + $0x10] sm:$0xff]  ;;  %v1814_v61 = vld [vmem:[#allocation2 + $0x48] sm:$0xff] }
  0x4f   : > { %v1815_v62 = vld [vmem:[#allocation2 + $0x50] sm:$0xff]  ;;  %v1816_v3 = vld [vmem:[#allocation2 + $0x68] sm:$0xff] }
  0x50   : > { %5977 = vmatmul.mubr.msk.bf16.gmra.mrb[16].mxu0 %vm440_vm1, %v7283_v31  ;;  %v1817_v5 = vld [vmem:[#allocation2 + $0x70] sm:$0xff]  ;;  %v7391_v7 = vpack.c.bf16 %v1815_v62, %v1814_v61  ;;  %v7403_v12 = vld [vmem:[%s8359_s1 + $0xc] sm:$0x3] }
  0x51   : > { %5980 = vmatprep.mubr.msk.bf16.mxu0 %vm440_vm1, %v7285_v32  ;;  %v7393_v10 = vpack.c.bf16 %v1817_v5, %v1816_v3  ;;  %v1818_v14 = vld [vmem:[#allocation2 + $0x88] sm:$0xff]  ;;  %v1819_v20 = vld [vmem:[#allocation2 + $0x90] sm:$0xff] }
  0x52   : > { %v1820_v21 = vld [vmem:[#allocation2 + $0xa8] sm:$0xff]  ;;  %v1821_v22 = vld [vmem:[#allocation2 + $0xb0] sm:$0xff] }
  0x53   : > { %v7413_v23 = vpack.c.bf16 %v1821_v22, %v1820_v21  ;;  %v1822_v27 = vld [vmem:[#allocation2 + $0xc8] sm:$0xff]  ;;  %v1823_v28 = vld [vmem:[#allocation2 + $0xd0] sm:$0xff] }
  0x54   : > { %v1824_v29 = vld [vmem:[#allocation2 + $0xe8] sm:$0xff]  ;;  %v1825_v33 = vld [vmem:[#allocation2 + $0xf0] sm:$0xff]  ;;  %v7423_v36 = vpack.c.bf16 %v1823_v28, %v1822_v27 }
  0x55   : > { %v7425_v39 = vpack.c.bf16 %v1825_v33, %v1824_v29  ;;  %v1826_v40 = vld [vmem:[#allocation2 + $0x108] sm:$0xff]  ;;  %v1827_v41 = vld [vmem:[#allocation2 + $0x110] sm:$0xff] }
  0x56   : > { %v1828_v45 = vld [vmem:[#allocation2 + $0x128] sm:$0xff]  ;;  %v1829_v46 = vld [vmem:[#allocation2 + $0x130] sm:$0xff]  ;;  %v7435_v47 = vpack.c.bf16 %v1827_v41, %v1826_v40 }
  0x57   : > { %v7437_v51 = vpack.c.bf16 %v1829_v46, %v1828_v45  ;;  %v1831_v55 = vld [vmem:[#allocation2 + $0x150] sm:$0xff]  ;;  %v1834_v63 = vld [vmem:[#allocation2 + $0x188] sm:$0xff]  ;;  %v748_v45 = vld [vmem:[%s8359_s1] sm:$0x3] }
  0x58   : > { %5981 = vmatmul.mubr.msk.bf16.gmra.mrb[20].mxu0 %vm440_vm1, %v7291_v37  ;;  %v1836_v3 = vld [vmem:[#allocation2 + $0x1a8] sm:$0xff]  ;;  %v1837_v5 = vld [vmem:[#allocation2 + $0x1b0] sm:$0xff]  ;;  %6761 = vmatprep.subr.msk.bf16.mxu1 %vm847_vm0, %v748_v45 }
  0x59   : > { %5984 = vmatprep.mubr.msk.bf16.mxu0 %vm440_vm1, %v7293_v38  ;;  %v1839_v21 = vld [vmem:[#allocation2 + $0x1d0] sm:$0xff]  ;;  %v1840_v22 = vld [vmem:[#allocation2 + $0x1e8] sm:$0xff] }
  0x5a   : > { %v1841_v27 = vld [vmem:[#allocation2 + $0x1f0] sm:$0xff]  ;;  %v1842_v33 = vld [vmem:[#allocation2 + $0x208] sm:$0xff] }
  0x5b   : > { %v7473_v29 = vpack.c.bf16 %v1841_v27, %v1840_v22  ;;  %v1843_v40 = vld [vmem:[#allocation2 + $0x210] sm:$0xff]  ;;  %v700_v46 = vld [vmem:[#allocation2 + $0x7] sm:$0xff] }
  0x5c   : > { %v7483_v41 = vpack.c.bf16 %v1843_v40, %v1842_v33  ;;  %v2725_v2 = vld [vmem:[#allocation2 + $0x228] sm:$0xff]  ;;  %v3010_v22 = vld [vmem:[#allocation2 + $0x191] sm:$0xff] }
  0x60   : > { %5985 = vmatmul.mubr.msk.bf16.gmra.mrb[24].mxu0 %vm440_vm1, %v7299_v6 }
  0x61   : > { %5988 = vmatprep.mubr.msk.bf16.mxu0 %vm440_vm1, %v7301_v43 }
  0x68   : > { %5989 = vmatmul.mubr.msk.bf16.gmra.mrb[28].mxu0 %vm440_vm1, %v7307_v48 }
  0x69   : > { %5994 = vmatprep.mubr.msk.bf16.mxu0 %vm440_vm1, %v7309_v49 }
  0x70   : > { %5995 = vmatmul.mubr.msk.bf16.vlgmr.msra.gmra.mrb[0].mxu0 %vm440_vm1, %v7315_v56 }
  0x71   : > { %6027 = vmatpush3.bf16.msra.mxu0 %v1911_v58  ;;  %5998 = vmatprep.mubr.msk.bf16.mxu0 %vm440_vm1, %v7317_v57  ;;  %v749_v58 = vld [vmem:[#allocation2 + $0x8] sm:$0xff] }
  0x72   : > { %6765 = vmatprep.subr.msk.bf16.mxu0 %vm847_vm0, %v7324_v59  ;;  %v781_v1 = vpack.c.bf16 %v750_v60, %v749_v58  ;;  %v7411_v59 = vpack.c.bf16 %v1819_v20, %v1818_v14  ;;  %v1832_v58 = vld [vmem:[#allocation2 + $0x168] sm:$0xff]  ;;  %v1833_v60 = vld [vmem:[#allocation2 + $0x170] sm:$0xff]  ;;  %v7461_v14 = vpack.c.bf16 %v1837_v5, %v1836_v3 }
  0x73   : > { %v7449_v62 = vpack.c.bf16 %v1833_v60, %v1832_v58  ;;  %v1838_v20 = vld [vmem:[#allocation2 + $0x1c8] sm:$0xff]  ;;  %v2500_v60 = vsel %vm847_vm0, %v7403_v12, 0 }
  0x74   : > { %5892 = vmatprep.mubr.msk.bf16.mxu1 %vm440_vm1, %v781_v1  ;;  %v1835_v1 = vld [vmem:[#allocation2 + $0x190] sm:$0xff]  ;;  %v7471_v28 = vpack.c.bf16 %v1839_v21, %v1838_v20 }
  0x75   : > { %5893 = vmatmul.mubr.msk.bf16.vlgmr.msra.gmra.mrb[0].mxu1 %vm440_vm1, %v1844_v53  ;;  %v3009_v21 = vld [vmem:[#allocation2 + $0x189] sm:$0xff] }
  0x76   : > { %5896 = vmatprep.mubr.msk.bf16.mxu1 %vm440_vm1, %v7391_v7  ;;  %v3031_v33 = vpack.c.bf16 %v3010_v22, %v3009_v21 }
  0x78   : > { %5999 = vmatmul.mubr.msk.bf16.gmra.mrb[4].mxu0 %vm440_vm1, %v7332_v30 }
  0x79   : > { %6002 = vmatprep.mubr.msk.bf16.mxu0 %vm440_vm1, %v7334_v0 }
  0x7d   : > { %5897 = vmatmul.mubr.msk.bf16.gmra.mrb[4].mxu1 %vm440_vm1, %v7393_v10 }
  0x7e   : > { %5900 = vmatprep.mubr.msk.bf16.mxu1 %vm440_vm1, %v7411_v59 }
  0x80   : > { %6003 = vmatmul.mubr.msk.bf16.gmra.mrb[8].mxu0 %vm440_vm1, %v7340_v8 }
  0x81   : > { %6006 = vmatprep.mubr.msk.bf16.mxu0 %vm440_vm1, %v7342_v9 }
  0x85   : > { %5901 = vmatmul.mubr.msk.bf16.gmra.mrb[8].mxu1 %vm440_vm1, %v7413_v23 }
  0x86   : > { %5904 = vmatprep.mubr.msk.bf16.mxu1 %vm440_vm1, %v7423_v36 }
  0x88   : > { %6007 = vmatmul.mubr.msk.bf16.gmra.mrb[12].mxu0 %vm440_vm1, %v7348_v17 }
  0x89   : > { %6010 = vmatprep.mubr.msk.bf16.mxu0 %vm440_vm1, %v7350_v18 }
  0x8d   : > { %5905 = vmatmul.mubr.msk.bf16.gmra.mrb[12].mxu1 %vm440_vm1, %v7425_v39 }
  0x8e   : > { %5908 = vmatprep.mubr.msk.bf16.mxu1 %vm440_vm1, %v7435_v47 }
  0x90   : > { %6011 = vmatmul.mubr.msk.bf16.gmra.mrb[16].mxu0 %vm440_vm1, %v7356_v24 }
  0x91   : > { %6014 = vmatprep.mubr.msk.bf16.mxu0 %vm440_vm1, %v7358_v16 }
  0x95   : > { %5909 = vmatmul.mubr.msk.bf16.gmra.mrb[16].mxu1 %vm440_vm1, %v7437_v51 }
  0x98   : > { %6015 = vmatmul.mubr.msk.bf16.gmra.mrb[20].mxu0 %vm440_vm1, %v7364_v34 }
  0x99   : > { %6018 = vmatprep.mubr.msk.bf16.mxu0 %vm440_vm1, %v7366_v35 }
  0xa0   : > { %6019 = vmatmul.mubr.msk.bf16.gmra.mrb[24].mxu0 %vm440_vm1, %v7372_v42 }
  0xa1   : > { %6022 = vmatprep.mubr.msk.bf16.mxu0 %vm440_vm1, %v7374_v44 }
  0xa8   : > { %6023 = vmatmul.mubr.msk.bf16.gmra.mrb[28].mxu0 %vm440_vm1, %v7380_v52 }
  0xa9   : > { %6028 = vmatprep.mubr.msk.bf16.mxu0 %vm440_vm1, %v1844_v53  ;;  %v1830_v53 = vld [vmem:[#allocation2 + $0x148] sm:$0xff] }
  0xaa   : > { %v7447_v61 = vpack.c.bf16 %v1831_v55, %v1830_v53  ;;  %v701_v53 = vld [vmem:[#allocation2 + $0xf] sm:$0xff]  ;;  %v1061_v55 = vsel %vm847_vm0, %v748_v45, 0 }
  0xab   : > { %v732_v58 = vpack.c.bf16 %v701_v53, %v700_v46  ;;  %5925 = vmatpush3.bf16.msra.mxu1 %v1061_v55  ;;  %v3012_v45 = vld [vmem:[#allocation2 + $0x1b1] sm:$0xff]  ;;  %v3013_v53 = vld [vmem:[#allocation2 + $0x1c9] sm:$0xff] }
  0xac   : > { %5912 = vmatprep.mubr.msk.bf16.mxu1 %vm440_vm1, %v7447_v61  ;;  %v3014_v55 = vld [vmem:[#allocation2 + $0x1d1] sm:$0xff] }
  0xad   : > { %5913 = vmatmul.mubr.msk.bf16.gmra.mrb[20].mxu1 %vm440_vm1, %v7449_v62 }
  0xb0   : > { %6029 = vmatmul.mubr.msk.bf16.vlgmr.msra.gmra.mrb[0].mxu0 %vm440_vm1, %v7391_v7 }
  0xb1   : > { %6061 = vmatpush3.bf16.msra.mxu0 %v2205_v11  ;;  %6032 = vmatprep.mubr.msk.bf16.mxu0 %vm440_vm1, %v7393_v10  ;;  %v7459_v11 = vpack.c.bf16 %v1835_v1, %v1834_v63 }
  0xb2   : > { %6766 = vmatprep.subr.msk.bf16.mxu0 %vm847_vm0, %v7403_v12 }
  0xb3   : > { %5916 = vmatprep.mubr.msk.bf16.mxu1 %vm440_vm1, %v7459_v11 }
  0xb5   : > { %5917 = vmatmul.mubr.msk.bf16.gmra.mrb[24].mxu1 %vm440_vm1, %v7461_v14 }
  0xb6   : > { %5920 = vmatprep.mubr.msk.bf16.mxu1 %vm440_vm1, %v7471_v28 }
  0xb8   : > { %6033 = vmatmul.mubr.msk.bf16.gmra.mrb[4].mxu0 %vm440_vm1, %v7411_v59 }
  0xb9   : > { %6036 = vmatprep.mubr.msk.bf16.mxu0 %vm440_vm1, %v7413_v23 }
  0xbd   : > { %5921 = vmatmul.mubr.msk.bf16.gmra.mrb[28].mxu1 %vm440_vm1, %v7473_v29 }
  0xbe   : > { %5926 = vmatprep.mubr.msk.bf16.mxu1 %vm440_vm1, %v732_v58 }
  0xc0   : > { %6037 = vmatmul.mubr.msk.bf16.gmra.mrb[8].mxu0 %vm440_vm1, %v7423_v36 }
  0xc1   : > { %6040 = vmatprep.mubr.msk.bf16.mxu0 %vm440_vm1, %v7425_v39 }
  0xc5   : > { %5927 = vmatmul.mubr.msk.bf16.vlgmr.msra.gmra.mrb[0].mxu1 %vm440_vm1, %v7309_v49 }
  0xc6   : > { %5930 = vmatprep.mubr.msk.bf16.mxu1 %vm440_vm1, %v7315_v56 }
  0xc8   : > { %6041 = vmatmul.mubr.msk.bf16.gmra.mrb[12].mxu0 %vm440_vm1, %v7435_v47 }
  0xc9   : > { %6044 = vmatprep.mubr.msk.bf16.mxu0 %vm440_vm1, %v7437_v51 }
  0xcd   : > { %5931 = vmatmul.mubr.msk.bf16.gmra.mrb[4].mxu1 %vm440_vm1, %v7317_v57 }
  0xce   : > { %5934 = vmatprep.mubr.msk.bf16.mxu1 %vm440_vm1, %v7332_v30 }
  0xd0   : > { %6045 = vmatmul.mubr.msk.bf16.gmra.mrb[16].mxu0 %vm440_vm1, %v7447_v61 }
  0xd1   : > { %6048 = vmatprep.mubr.msk.bf16.mxu0 %vm440_vm1, %v7449_v62 }
  0xd5   : > { %5935 = vmatmul.mubr.msk.bf16.gmra.mrb[8].mxu1 %vm440_vm1, %v7334_v0 }
  0xd6   : > { %5938 = vmatprep.mubr.msk.bf16.mxu1 %vm440_vm1, %v7340_v8 }
  0xd8   : > { %6049 = vmatmul.mubr.msk.bf16.gmra.mrb[20].mxu0 %vm440_vm1, %v7459_v11 }
  0xd9   : > { %6052 = vmatprep.mubr.msk.bf16.mxu0 %vm440_vm1, %v7461_v14 }
  0xdd   : > { %5939 = vmatmul.mubr.msk.bf16.gmra.mrb[12].mxu1 %vm440_vm1, %v7342_v9 }
  0xde   : > { %5942 = vmatprep.mubr.msk.bf16.mxu1 %vm440_vm1, %v7348_v17 }
  0xe0   : > { %6053 = vmatmul.mubr.msk.bf16.gmra.mrb[24].mxu0 %vm440_vm1, %v7471_v28 }
  0xe1   : > { %6056 = vmatprep.mubr.msk.bf16.mxu0 %vm440_vm1, %v7473_v29 }
  0xe5   : > { %5943 = vmatmul.mubr.msk.bf16.gmra.mrb[16].mxu1 %vm440_vm1, %v7350_v18 }
  0xe6   : > { %5946 = vmatprep.mubr.msk.bf16.mxu1 %vm440_vm1, %v7356_v24 }
  0xe8   : > { %6057 = vmatmul.mubr.msk.bf16.gmra.mrb[28].mxu0 %vm440_vm1, %v7483_v41 }
  0xe9   : > { %6062 = vmatprep.mubr.msk.bf16.mxu0 %vm440_vm1, %v7190_v19  ;;  %v5465_v19 = vld [vmem:[%s8359_s1 + $0xe] sm:$0x3] }
  0xed   : > { %5947 = vmatmul.mubr.msk.bf16.gmra.mrb[20].mxu1 %vm440_vm1, %v7358_v16 }
  0xee   : > { %5950 = vmatprep.mubr.msk.bf16.mxu1 %vm440_vm1, %v7364_v34 }
  0xf0   : > { %6063 = vmatmul.mubr.msk.bf16.vlgmr.msra.gmra.mrb[0].mxu0 %vm440_vm1, %v7196_v25  ;;  %v2136_v25 = vld [vmem:[#allocation2 + $0x209] sm:$0xff] }
  0xf1   : > { %6095 = vmatpush3.bf16.msra.mxu0 %v2500_v60  ;;  %6066 = vmatprep.mubr.msk.bf16.mxu0 %vm440_vm1, %v7229_v50  ;;  %v2137_v50 = vld [vmem:[#allocation2 + $0x211] sm:$0xff] }
  0xf2   : > { %6767 = vmatprep.subr.msk.bf16.mxu0 %vm847_vm0, %v5465_v19 }
  0xf5   : > { %5951 = vmatmul.mubr.msk.bf16.gmra.mrb[24].mxu1 %vm440_vm1, %v7366_v35 }
  0xf6   : > { %5954 = vmatprep.mubr.msk.bf16.mxu1 %vm440_vm1, %v7372_v42 }
  0xf8   : > { %6067 = vmatmul.mubr.msk.bf16.gmra.mrb[4].mxu0 %vm440_vm1, %v7235_v54  ;;  %v7559_v54 = vpack.c.bf16 %v2137_v50, %v2136_v25  ;;  %v3033_v25 = vpack.c.bf16 %v3014_v55, %v3013_v53 }
  0xf9   : > { %6070 = vmatprep.mubr.msk.bf16.mxu0 %vm440_vm1, %v7260_v13  ;;  %v2794_v13 = vsel %vm847_vm0, %v5465_v19, 0 }
  0xfd   : > { %5955 = vmatmul.mubr.msk.bf16.gmra.mrb[28].mxu1 %vm440_vm1, %v7374_v44 }
 0x100   : > { %6071 = vmatmul.mubr.msk.bf16.gmra.mrb[8].mxu0 %vm440_vm1, %v7263_v15  ;;  %v5482_v15 = vld [vmem:[%s8359_s1 + $0x10] sm:$0x3] }
 0x101   : > { %6074 = vmatprep.mubr.msk.bf16.mxu0 %vm440_vm1, %v7275_v26  ;;  %v2431_v26 = vld [vmem:[#allocation2 + $0x227] sm:$0xff] }
 0x108   : > { %6075 = vmatmul.mubr.msk.bf16.gmra.mrb[12].mxu0 %vm440_vm1, %v7277_v4  ;;  %v2432_v4 = vld [vmem:[#allocation2 + $0x22f] sm:$0xff] }
 0x109   : > { %6078 = vmatprep.mubr.msk.bf16.mxu0 %vm440_vm1, %v7283_v31  ;;  %v2448_v31 = vpack.c.bf16 %v2432_v4, %v2431_v26 }
 0x110   : > { %6079 = vmatmul.mubr.msk.bf16.gmra.mrb[16].mxu0 %vm440_vm1, %v7285_v32  ;;  %v3088_v32 = vsel %vm847_vm0, %v5482_v15, 0 }
 0x111   : > { %6082 = vmatprep.mubr.msk.bf16.mxu0 %vm440_vm1, %v7291_v37  ;;  %v5502_v37 = vld [vmem:[%s8342_s2 + $0x4] sm:$0xf] }
 0x112   : > { %6769 = vmatprep.subr.msk.bf16.mxu1 %vm3571_vm2, %v5502_v37 }
 0x118   : > { %6083 = vmatmul.mubr.msk.bf16.gmra.mrb[20].mxu0 %vm440_vm1, %v7293_v38  ;;  %v3573_v38 = vsel %vm3571_vm2, %v5502_v37, 0 }
 0x119   : > { %6086 = vmatprep.mubr.msk.bf16.mxu0 %vm440_vm1, %v7299_v6  ;;  %6197 = vmatpush3.bf16.msra.mxu1 %v3573_v38  ;;  %v2726_v6 = vld [vmem:[#allocation2 + $0x230] sm:$0xff] }
 0x11a   : > { %v2742_v49 = vpack.c.bf16 %v2726_v6, %v2725_v2  ;;  %v3019_v38 = vld [vmem:[#allocation2 + $0x229] sm:$0xff]  ;;  %v3020_v2 = vld [vmem:[#allocation2 + $0x231] sm:$0xff] }
 0x120   : > { %6087 = vmatmul.mubr.msk.bf16.gmra.mrb[24].mxu0 %vm440_vm1, %v7301_v43  ;;  %v2989_v43 = vld [vmem:[#allocation2 + $0x49] sm:$0xff] }
 0x121   : > { %6090 = vmatprep.mubr.msk.bf16.mxu0 %vm440_vm1, %v7307_v48  ;;  %v2990_v48 = vld [vmem:[#allocation2 + $0x51] sm:$0xff] }
 0x128   : > { %6091 = vmatmul.mubr.msk.bf16.gmra.mrb[28].mxu0 %vm440_vm1, %v7559_v54 }
 0x129   : > { %6096 = vmatprep.mubr.msk.bf16.mxu0 %vm440_vm1, %v7315_v56  ;;  %v3021_v56 = vpack.c.bf16 %v2990_v48, %v2989_v43 }
 0x130   : > { %6097 = vmatmul.mubr.msk.bf16.vlgmr.msra.gmra.mrb[0].mxu0 %vm440_vm1, %v7317_v57  ;;  %v2991_v57 = vld [vmem:[#allocation2 + $0x69] sm:$0xff] }
 0x131   : > { %6129 = vmatpush3.bf16.msra.mxu0 %v2794_v13  ;;  %6100 = vmatprep.mubr.msk.bf16.mxu0 %vm440_vm1, %v7332_v30  ;;  %v2992_v30 = vld [vmem:[#allocation2 + $0x71] sm:$0xff]  ;;  %v3015_v13 = vld [vmem:[#allocation2 + $0x1e9] sm:$0xff] }
 0x132   : > { %6768 = vmatprep.subr.msk.bf16.mxu0 %vm847_vm0, %v5482_v15  ;;  %v3016_v15 = vld [vmem:[#allocation2 + $0x1f1] sm:$0xff] }
 0x138   : > { %6101 = vmatmul.mubr.msk.bf16.gmra.mrb[4].mxu0 %vm440_vm1, %v7334_v0  ;;  %v2993_v0 = vld [vmem:[#allocation2 + $0x89] sm:$0xff] }
 0x139   : > { %6104 = vmatprep.mubr.msk.bf16.mxu0 %vm440_vm1, %v7340_v8  ;;  %v2994_v8 = vld [vmem:[#allocation2 + $0x91] sm:$0xff] }
 0x140   : > { %6105 = vmatmul.mubr.msk.bf16.gmra.mrb[8].mxu0 %vm440_vm1, %v7342_v9  ;;  %v3022_v9 = vpack.c.bf16 %v2992_v30, %v2991_v57 }
 0x141   : > { %6108 = vmatprep.mubr.msk.bf16.mxu0 %vm440_vm1, %v7348_v17  ;;  %v3023_v17 = vpack.c.bf16 %v2994_v8, %v2993_v0 }
 0x148   : > { %6109 = vmatmul.mubr.msk.bf16.gmra.mrb[12].mxu0 %vm440_vm1, %v7350_v18  ;;  %v2995_v18 = vld [vmem:[#allocation2 + $0xa9] sm:$0xff] }
 0x149   : > { %6112 = vmatprep.mubr.msk.bf16.mxu0 %vm440_vm1, %v7356_v24  ;;  %v2996_v24 = vld [vmem:[#allocation2 + $0xb1] sm:$0xff] }
 0x150   : > { %6113 = vmatmul.mubr.msk.bf16.gmra.mrb[16].mxu0 %vm440_vm1, %v7358_v16  ;;  %v2997_v16 = vld [vmem:[#allocation2 + $0xc9] sm:$0xff] }
 0x151   : > { %6116 = vmatprep.mubr.msk.bf16.mxu0 %vm440_vm1, %v7364_v34  ;;  %v2998_v34 = vld [vmem:[#allocation2 + $0xd1] sm:$0xff] }
 0x158   : > { %6117 = vmatmul.mubr.msk.bf16.gmra.mrb[20].mxu0 %vm440_vm1, %v7366_v35  ;;  %v3024_v35 = vpack.c.bf16 %v2996_v24, %v2995_v18 }
 0x159   : > { %6120 = vmatprep.mubr.msk.bf16.mxu0 %vm440_vm1, %v7372_v42  ;;  %v3025_v42 = vpack.c.bf16 %v2998_v34, %v2997_v16 }
 0x160   : > { %6121 = vmatmul.mubr.msk.bf16.gmra.mrb[24].mxu0 %vm440_vm1, %v7374_v44  ;;  %v2999_v44 = vld [vmem:[#allocation2 + $0xe9] sm:$0xff] }
 0x161   : > { %6124 = vmatprep.mubr.msk.bf16.mxu0 %vm440_vm1, %v7380_v52  ;;  %v3000_v52 = vld [vmem:[#allocation2 + $0xf1] sm:$0xff] }
 0x162   : > { %v3026_v12 = vpack.c.bf16 %v3000_v52, %v2999_v44  ;;  %v7795_v52 = vld [vmem:[%s8342_s2] sm:$0xf] }
 0x163   : > { %6770 = vmatprep.subr.msk.bf16.mxu1 %vm3571_vm2, %v7795_v52 }
 0x168   : > { %6125 = vmatmul.mubr.msk.bf16.gmra.mrb[28].mxu0 %vm440_vm1, %v2448_v31 }
 0x169   : > { %6130 = vmatprep.mubr.msk.bf16.mxu0 %vm440_vm1, %v7391_v7  ;;  %v3001_v7 = vld [vmem:[#allocation2 + $0x109] sm:$0xff] }
 0x170   : > { %6131 = vmatmul.mubr.msk.bf16.vlgmr.msra.gmra.mrb[0].mxu0 %vm440_vm1, %v7393_v10  ;;  %v3002_v10 = vld [vmem:[#allocation2 + $0x111] sm:$0xff] }
 0x171   : > { %6163 = vmatpush3.bf16.msra.mxu0 %v3088_v32  ;;  %6134 = vmatprep.mubr.msk.bf16.mxu0 %vm440_vm1, %v7411_v59  ;;  %v3027_v59 = vpack.c.bf16 %v3002_v10, %v3001_v7  ;;  %v3034_v32 = vpack.c.bf16 %v3016_v15, %v3015_v13  ;;  %v7802_v10 = vld [vmem:[%s8346_s6] ss:$0 sm:$0xff] }
 0x178   : > { %6135 = vmatmul.mubr.msk.bf16.gmra.mrb[4].mxu0 %vm440_vm1, %v7413_v23 }
 0x179   : > { %6138 = vmatprep.mubr.msk.bf16.mxu0 %vm440_vm1, %v7423_v36  ;;  %v3003_v36 = vld [vmem:[#allocation2 + $0x129] sm:$0xff] }
 0x180   : > { %6139 = vmatmul.mubr.msk.bf16.gmra.mrb[8].mxu0 %vm440_vm1, %v7425_v39  ;;  %v3004_v39 = vld [vmem:[#allocation2 + $0x131] sm:$0xff] }
 0x181   : > { %6142 = vmatprep.mubr.msk.bf16.mxu0 %vm440_vm1, %v7435_v47  ;;  %v3028_v1 = vpack.c.bf16 %v3004_v39, %v3003_v36  ;;  %v7808_v36 = vld [vmem:[%s8347_s7] ss:$0 sm:$0xff] }
 0x188   : > { %6143 = vmatmul.mubr.msk.bf16.gmra.mrb[12].mxu0 %vm440_vm1, %v7437_v51  ;;  %v3005_v51 = vld [vmem:[#allocation2 + $0x149] sm:$0xff] }
 0x189   : > { %6146 = vmatprep.mubr.msk.bf16.mxu0 %vm440_vm1, %v7447_v61  ;;  %v3006_v61 = vld [vmem:[#allocation2 + $0x151] sm:$0xff] }
 0x18a   : > { %v3029_v3 = vpack.c.bf16 %v3006_v61, %v3005_v51 }
 0x190   : > { %6147 = vmatmul.mubr.msk.bf16.gmra.mrb[16].mxu0 %vm440_vm1, %v7449_v62 }
 0x191   : > { %6150 = vmatprep.mubr.msk.bf16.mxu0 %vm440_vm1, %v7459_v11  ;;  %v3007_v11 = vld [vmem:[#allocation2 + $0x169] sm:$0xff] }
 0x198   : > { %6151 = vmatmul.mubr.msk.bf16.gmra.mrb[20].mxu0 %vm440_vm1, %v7461_v14  ;;  %v7716_v23 = vpop.f32.mrb[0].mxu1  ;;  %v3008_v14 = vld [vmem:[#allocation2 + $0x171] sm:$0xff] }
 0x199   : > { %6154 = vmatprep.mubr.msk.bf16.mxu0 %vm440_vm1, %v7471_v28  ;;  %v7719_v47 = vpop.f32.mrb[1].mxu1 }
 0x19a   : > { %v7721_v62 = vpop.f32.mrb[2].mxu1 }
 0x19b   : > { %v7723_v63 = vpop.f32.mrb[3].mxu1 }
 0x1a0   : > { %6155 = vmatmul.mubr.msk.bf16.gmra.mrb[24].mxu0 %vm440_vm1, %v7473_v29  ;;  %v7726_v5 = vpop.f32.mrb[4].mxu1  ;;  %v3030_v29 = vpack.c.bf16 %v3008_v14, %v3007_v11  ;;  %v7816_v11 = vld [vmem:[%s8352_s12] ss:$0 sm:$0xff] }
 0x1a1   : > { %6158 = vmatprep.mubr.msk.bf16.mxu0 %vm440_vm1, %v7483_v41  ;;  %v7729_v20 = vpop.f32.mrb[5].mxu1  ;;  %v3011_v41 = vld [vmem:[#allocation2 + $0x1a9] sm:$0xff] }
 0x1a2   : > { %v7731_v27 = vpop.f32.mrb[6].mxu1  ;;  %v3032_v19 = vpack.c.bf16 %v3012_v45, %v3011_v41 }
 0x1a3   : > { %v7733_v28 = vpop.f32.mrb[7].mxu1 }
 0x1a8   : > { %6159 = vmatmul.mubr.msk.bf16.gmra.mrb[28].mxu0 %vm440_vm1, %v2742_v49  ;;  %v7736_v40 = vpop.f32.mrb[8].mxu1  ;;  %v3036_v49 = vpack.c.bf16 %v3020_v2, %v3019_v38 }
 0x1a9   : > { %6164 = vmatprep.mubr.msk.bf16.mxu0 %vm440_vm1, %v3021_v56  ;;  %v7739_v46 = vpop.f32.mrb[9].mxu1 }
 0x1aa   : > { %v7741_v58 = vpop.f32.mrb[10].mxu1 }
 0x1ab   : > { %v7743_v60 = vpop.f32.mrb[11].mxu1 }
 0x1b0   : > { %6165 = vmatmul.mubr.msk.bf16.vlgmr.msra.gmra.mrb[0].mxu0 %vm440_vm1, %v3022_v9  ;;  %v7746_v50 = vpop.f32.mrb[12].mxu1 }
 0x1b1   : > { %6168 = vmatprep.mubr.msk.bf16.mxu0 %vm440_vm1, %v3023_v17  ;;  %v7749_v26 = vpop.f32.mrb[13].mxu1 }
 0x1b2   : > { %v7751_v4 = vpop.f32.mrb[14].mxu1 }
 0x1b3   : > { %v7753_v31 = vpop.f32.mrb[15].mxu1 }
 0x1b8   : > { %6169 = vmatmul.mubr.msk.bf16.gmra.mrb[4].mxu0 %vm440_vm1, %v3024_v35  ;;  %v7756_v37 = vpop.f32.mrb[16].mxu1  ;;  %v3521_v35 = vld [vmem:[#allocation3 + $0x8] sm:$0xff] }
 0x1b9   : > { %6172 = vmatprep.mubr.msk.bf16.mxu0 %vm440_vm1, %v3025_v42  ;;  %v7760_v6 = vpop.f32.mrb[17].mxu1  ;;  %v3522_v42 = vld [vmem:[#allocation3 + $0x10] sm:$0xff] }
 0x1ba   : > { %v7762_v43 = vpop.f32.mrb[18].mxu1  ;;  %v3537_v44 = vpack.c.bf16 %v3522_v42, %v3521_v35 }
 0x1bb   : > { %v7764_v48 = vpop.f32.mrb[19].mxu1 }
 0x1bc   : > { %6198 = vmatprep.mubr.msk.bf16.mxu1 %vm483_vm3, %v3537_v44 }
 0x1c0   : > { %6173 = vmatmul.mubr.msk.bf16.gmra.mrb[8].mxu0 %vm440_vm1, %v3026_v12  ;;  %v7767_v56 = vpop.f32.mrb[20].mxu1 }
 0x1c1   : > { %6176 = vmatprep.mubr.msk.bf16.mxu0 %vm440_vm1, %v3027_v59  ;;  %v7769_v57 = vpop.f32.mrb[21].mxu1 }
 0x1c2   : > { %v7771_v30 = vpop.f32.mrb[22].mxu1 }
 0x1c3   : > { %v7773_v0 = vpop.f32.mrb[23].mxu1 }
 0x1c8   : > { %6177 = vmatmul.mubr.msk.bf16.gmra.mrb[12].mxu0 %vm440_vm1, %v3028_v1 }
 0x1c9   : > { %6180 = vmatprep.mubr.msk.bf16.mxu0 %vm440_vm1, %v3029_v3 }
 0x1d0   : > { %6181 = vmatmul.mubr.msk.bf16.gmra.mrb[16].mxu0 %vm440_vm1, %v3030_v29 }
 0x1d1   : > { %6184 = vmatprep.mubr.msk.bf16.mxu0 %vm440_vm1, %v3031_v33 }
 0x1d8   : > { %6185 = vmatmul.mubr.msk.bf16.gmra.mrb[20].mxu0 %vm440_vm1, %v3032_v19 }
 0x1d9   : > { %6188 = vmatprep.mubr.msk.bf16.mxu0 %vm440_vm1, %v3033_v25 }
 0x1e0   : > { %6189 = vmatmul.mubr.msk.bf16.gmra.mrb[24].mxu0 %vm440_vm1, %v3034_v32 }
 0x1e1   : > { %6192 = vmatprep.mubr.msk.bf16.mxu0 %vm440_vm1, %v7559_v54  ;;  %v7775_v54 = vpop.f32.mrb[24].mxu1 }
 0x1e2   : > { %v7777_v8 = vpop.f32.mrb[25].mxu1 }
 0x1e3   : > { %v7779_v9 = vpop.f32.mrb[26].mxu1 }
 0x1e4   : > { %v7781_v17 = vpop.f32.mrb[27].mxu1 }
 0x1e5   : > { %v7783_v18 = vpop.f32.mrb[28].mxu1 }
 0x1e6   : > { %v7785_v24 = vpop.f32.mrb[29].mxu1 }
 0x1e7   : > { %v7787_v16 = vpop.f32.mrb[30].mxu1 }
 0x1e8   : > { %6193 = vmatmul.mubr.msk.bf16.gmra.mrb[28].mxu0 %vm440_vm1, %v3036_v49  ;;  %v7789_v34 = vpop.f32.mrb[31].mxu1 }
 0x283   : > { %v6166_v7 = vpop.f32.mrb[0].mxu0 }
 0x284   : > { %v6376_v12 = vadd.f32 %v6166_v7, %v7716_v23  ;;  %v3124_v59 = vpop.f32.mrb[1].mxu0 }
 0x285   : > { %v6377_v39 = vadd.f32 %v3124_v59, %v7719_v47  ;;  %v6167_v51 = vpop.f32.mrb[2].mxu0 }
 0x286   : > { %v3292_v61 = vmul.f32 %v6376_v12, %v7802_v10  ;;  %v6378_v1 = vadd.f32 %v6167_v51, %v7721_v62  ;;  %v3127_v3 = vpop.f32.mrb[3].mxu0 }
 0x287   : > { %v3290_v23 = vmul.f32 %v6377_v39, %v7802_v10  ;;  %v6379_v14 = vadd.f32 %v3127_v3, %v7723_v63 }
 0x288   : > { %v3331_v21 = vadd.f32 %v7808_v36, %v3292_v61  ;;  %v3293_v22 = vmul.f32 %v6378_v1, %v7802_v10 }
 0x289   : > { %v3329_v47 = vadd.f32 %v7808_v36, %v3290_v23  ;;  %v3291_v29 = vmul.f32 %v6379_v14, %v7802_v10 }
 0x28a   : > { %vm3363_vm4 = vcmp.gt.f32.partialorder %v3331_v21, 0.0  ;;  %v3402_v62 = vmul.f32 %v7816_v11, %v3331_v21  ;;  %v3332_v33 = vadd.f32 %v7808_v36, %v3293_v22 }
 0x28b   : > { %vm3361_vm5 = vcmp.gt.f32.partialorder %v3329_v47, 0.0  ;;  %v3400_v41 = vmul.f32 %v7816_v11, %v3329_v47  ;;  %v3330_v45 = vadd.f32 %v7808_v36, %v3291_v29  ;;  %v6170_v53 = vpop.f32.mrb[4].mxu0 }
 0x28c   : > { %v3434_v63 = vsel %vm3363_vm4, %v3331_v21, %v3402_v62  ;;  %vm3364_vm6 = vcmp.gt.f32.partialorder %v3332_v33, 0.0  ;;  %v3403_v55 = vmul.f32 %v7816_v11, %v3332_v33  ;;  %v6380_v19 = vadd.f32 %v6170_v53, %v7726_v5  ;;  %v3140_v25 = vpop.f32.mrb[5].mxu0 }
 0x28d   : > { %3466 = vst.msk [vmem:[#allocation3 + $0x48] sm:$0xff] %vm483_vm3, %v3434_v63  ;;  %v3432_v13 = vsel %vm3361_vm5, %v3329_v47, %v3400_v41  ;;  %vm3362_vm7 = vcmp.gt.f32.partialorder %v3330_v45, 0.0  ;;  %v3401_v15 = vmul.f32 %v7816_v11, %v3330_v45  ;;  %v6381_v32 = vadd.f32 %v3140_v25, %v7729_v20  ;;  %v6171_v38 = vpop.f32.mrb[6].mxu0 }
 0x28e   : > { %3464 = vst.msk [vmem:[#allocation3 + $0x28] sm:$0xff] %vm483_vm3, %v3432_v13  ;;  %v3435_v2 = vsel %vm3364_vm6, %v3332_v33, %v3403_v55  ;;  %v3296_v49 = vmul.f32 %v6380_v19, %v7802_v10  ;;  %v6382_v35 = vadd.f32 %v6171_v38, %v7731_v27  ;;  %v3143_v42 = vpop.f32.mrb[7].mxu0  ;;  %v3697_v55 = vsel %vm3571_vm2, %v7795_v52, 0 }
 0x28f   : > { %3467 = vst.msk [vmem:[#allocation3 + $0x50] sm:$0xff] %vm483_vm3, %v3435_v2  ;;  %v3433_v5 = vsel %vm3362_vm7, %v3330_v45, %v3401_v15  ;;  %v3294_v44 = vmul.f32 %v6381_v32, %v7802_v10  ;;  %v6383_v7 = vadd.f32 %v3143_v42, %v7733_v28  ;;  %v7869_v32 = vld [vmem:[%s8342_s2 + $0x8] sm:$0xf] }
 0x290   : > { %3465 = vst.msk [vmem:[#allocation3 + $0x30] sm:$0xff] %vm483_vm3, %v3433_v5  ;;  %v3335_v20 = vadd.f32 %v7808_v36, %v3296_v49  ;;  %v3297_v12 = vmul.f32 %v6382_v35, %v7802_v10 }
 0x291   : > { %v3333_v59 = vadd.f32 %v7808_v36, %v3294_v44  ;;  %v3295_v39 = vmul.f32 %v6383_v7, %v7802_v10 }
 0x292   : > { %vm3367_vm8 = vcmp.gt.f32.partialorder %v3335_v20, 0.0  ;;  %v3406_v27 = vmul.f32 %v7816_v11, %v3335_v20  ;;  %v3336_v51 = vadd.f32 %v7808_v36, %v3297_v12 }
 0x293   : > { %vm3365_vm9 = vcmp.gt.f32.partialorder %v3333_v59, 0.0  ;;  %v3404_v61 = vmul.f32 %v7816_v11, %v3333_v59  ;;  %v3334_v28 = vadd.f32 %v7808_v36, %v3295_v39  ;;  %v6174_v1 = vpop.f32.mrb[8].mxu0 }
 0x294   : > { %v3438_v3 = vsel %vm3367_vm8, %v3335_v20, %v3406_v27  ;;  %vm3368_vm10 = vcmp.gt.f32.partialorder %v3336_v51, 0.0  ;;  %v3407_v23 = vmul.f32 %v7816_v11, %v3336_v51  ;;  %v6384_v14 = vadd.f32 %v6174_v1, %v7736_v40  ;;  %v3156_v21 = vpop.f32.mrb[9].mxu0  ;;  %v3523_v63 = vld [vmem:[#allocation3 + $0x48] sm:$0xff] }
 0x295   : > { %3470 = vst.msk [vmem:[#allocation3 + $0x88] sm:$0xff] %vm483_vm3, %v3438_v3  ;;  %v3436_v22 = vsel %vm3365_vm9, %v3333_v59, %v3404_v61  ;;  %vm3366_vm11 = vcmp.gt.f32.partialorder %v3334_v28, 0.0  ;;  %v3405_v47 = vmul.f32 %v7816_v11, %v3334_v28  ;;  %v6385_v29 = vadd.f32 %v3156_v21, %v7739_v46  ;;  %v6175_v62 = vpop.f32.mrb[10].mxu0 }
 0x296   : > { %3468 = vst.msk [vmem:[#allocation3 + $0x68] sm:$0xff] %vm483_vm3, %v3436_v22  ;;  %v3439_v33 = vsel %vm3368_vm10, %v3336_v51, %v3407_v23  ;;  %v3300_v41 = vmul.f32 %v6384_v14, %v7802_v10  ;;  %v6386_v45 = vadd.f32 %v6175_v62, %v7741_v58  ;;  %v3159_v53 = vpop.f32.mrb[11].mxu0  ;;  %v3524_v40 = vld [vmem:[#allocation3 + $0x50] sm:$0xff] }
 0x297   : > { %3471 = vst.msk [vmem:[#allocation3 + $0x90] sm:$0xff] %vm483_vm3, %v3439_v33  ;;  %v3437_v19 = vsel %vm3366_vm11, %v3334_v28, %v3405_v47  ;;  %v3298_v25 = vmul.f32 %v6385_v29, %v7802_v10  ;;  %v6387_v46 = vadd.f32 %v3159_v53, %v7743_v60  ;;  %v7861_v13 = vpack.c.bf16 %v3524_v40, %v3523_v63 }
 0x298   : > { %3469 = vst.msk [vmem:[#allocation3 + $0x70] sm:$0xff] %vm483_vm3, %v3437_v19  ;;  %v3339_v15 = vadd.f32 %v7808_v36, %v3300_v41  ;;  %v3301_v58 = vmul.f32 %v6386_v45, %v7802_v10 }
 0x299   : > { %v3337_v52 = vadd.f32 %v7808_v36, %v3298_v25  ;;  %v3299_v38 = vmul.f32 %v6387_v46, %v7802_v10  ;;  %6199 = vmatmul.mubr.msk.bf16.vlgmr.msra.gmra.mrb[32].mxu1 %vm483_vm3, %v7861_v13 }
 0x29a   : > { %vm3371_vm12 = vcmp.gt.f32.partialorder %v3339_v15, 0.0  ;;  %v3410_v60 = vmul.f32 %v7816_v11, %v3339_v15  ;;  %v3340_v2 = vadd.f32 %v7808_v36, %v3301_v58  ;;  %6215 = vmatpush3.bf16.msra.mxu1 %v3697_v55 }
 0x29b   : > { %vm3369_vm13 = vcmp.gt.f32.partialorder %v3337_v52, 0.0  ;;  %v3408_v49 = vmul.f32 %v7816_v11, %v3337_v52  ;;  %v3338_v35 = vadd.f32 %v7808_v36, %v3299_v38  ;;  %v6178_v42 = vpop.f32.mrb[12].mxu0  ;;  %6771 = vmatprep.subr.msk.bf16.mxu1 %vm3571_vm2, %v7869_v32 }
 0x29c   : > { %v3442_v5 = vsel %vm3371_vm12, %v3339_v15, %v3410_v60  ;;  %vm3372_vm14 = vcmp.gt.f32.partialorder %v3340_v2, 0.0  ;;  %v3411_v44 = vmul.f32 %v7816_v11, %v3340_v2  ;;  %v6388_v7 = vadd.f32 %v6178_v42, %v7746_v50  ;;  %v3172_v20 = vpop.f32.mrb[13].mxu0  ;;  %v3525_v3 = vld [vmem:[#allocation3 + $0x88] sm:$0xff] }
 0x29d   : > { %3474 = vst.msk [vmem:[#allocation3 + $0xc8] sm:$0xff] %vm483_vm3, %v3442_v5  ;;  %v3440_v12 = vsel %vm3369_vm13, %v3337_v52, %v3408_v49  ;;  %vm3370_vm15 = vcmp.gt.f32.partialorder %v3338_v35, 0.0  ;;  %v3409_v59 = vmul.f32 %v7816_v11, %v3338_v35  ;;  %v6389_v39 = vadd.f32 %v3172_v20, %v7749_v26  ;;  %v6179_v27 = vpop.f32.mrb[14].mxu0 }
 0x29e   : > { %3472 = vst.msk [vmem:[#allocation3 + $0xa8] sm:$0xff] %vm483_vm3, %v3440_v12  ;;  %v3443_v51 = vsel %vm3372_vm14, %v3340_v2, %v3411_v44  ;;  %v3304_v61 = vmul.f32 %v6388_v7, %v7802_v10  ;;  %v6390_v28 = vadd.f32 %v6179_v27, %v7751_v4  ;;  %v3175_v1 = vpop.f32.mrb[15].mxu0  ;;  %v3526_v50 = vld [vmem:[#allocation3 + $0x90] sm:$0xff] }
 0x29f   : > { %3475 = vst.msk [vmem:[#allocation3 + $0xd0] sm:$0xff] %vm483_vm3, %v3443_v51  ;;  %v3441_v23 = vsel %vm3370_vm15, %v3338_v35, %v3409_v59  ;;  %v3302_v14 = vmul.f32 %v6389_v39, %v7802_v10  ;;  %v6391_v21 = vadd.f32 %v3175_v1, %v7753_v31  ;;  %v7892_v22 = vpack.c.bf16 %v3526_v50, %v3525_v3 }
 0x2a0   : > { %3473 = vst.msk [vmem:[#allocation3 + $0xb0] sm:$0xff] %vm483_vm3, %v3441_v23  ;;  %v3343_v26 = vadd.f32 %v7808_v36, %v3304_v61  ;;  %v3305_v47 = vmul.f32 %v6390_v28, %v7802_v10 }
 0x2a1   : > { %v3341_v4 = vadd.f32 %v7808_v36, %v3302_v14  ;;  %v3303_v29 = vmul.f32 %v6391_v21, %v7802_v10  ;;  %6202 = vmatprep.mubr.msk.bf16.mxu1 %vm483_vm3, %v7892_v22 }
 0x2a2   : > { %vm3375_vm4 = vcmp.gt.f32.partialorder %v3343_v26, 0.0  ;;  %v3414_v62 = vmul.f32 %v7816_v11, %v3343_v26  ;;  %v3344_v31 = vadd.f32 %v7808_v36, %v3305_v47 }
 0x2a3   : > { %vm3373_vm5 = vcmp.gt.f32.partialorder %v3341_v4, 0.0  ;;  %v3412_v33 = vmul.f32 %v7816_v11, %v3341_v4  ;;  %v3342_v41 = vadd.f32 %v7808_v36, %v3303_v29  ;;  %v6182_v45 = vpop.f32.mrb[16].mxu0 }
 0x2a4   : > { %v3446_v53 = vsel %vm3375_vm4, %v3343_v26, %v3414_v62  ;;  %vm3376_vm6 = vcmp.gt.f32.partialorder %v3344_v31, 0.0  ;;  %v3415_v63 = vmul.f32 %v7816_v11, %v3344_v31  ;;  %v6392_v40 = vadd.f32 %v6182_v45, %v7756_v37  ;;  %v3188_v55 = vpop.f32.mrb[17].mxu0  ;;  %v3527_v2 = vld [vmem:[#allocation3 + $0xc8] sm:$0xff] }
 0x2a5   : > { %3478 = vst.msk [vmem:[#allocation3 + $0x108] sm:$0xff] %vm483_vm3, %v3446_v53  ;;  %v3444_v19 = vsel %vm3373_vm5, %v3341_v4, %v3412_v33  ;;  %vm3374_vm7 = vcmp.gt.f32.partialorder %v3342_v41, 0.0  ;;  %v3413_v25 = vmul.f32 %v7816_v11, %v3342_v41  ;;  %v6393_v46 = vadd.f32 %v3188_v55, %v7760_v6  ;;  %v6183_v15 = vpop.f32.mrb[18].mxu0 }
 0x2a6   : > { %3476 = vst.msk [vmem:[#allocation3 + $0xe8] sm:$0xff] %vm483_vm3, %v3444_v19  ;;  %v3447_v58 = vsel %vm3376_vm6, %v3344_v31, %v3415_v63  ;;  %v3308_v52 = vmul.f32 %v6392_v40, %v7802_v10  ;;  %v6394_v38 = vadd.f32 %v6183_v15, %v7762_v43  ;;  %v3191_v60 = vpop.f32.mrb[19].mxu0  ;;  %v3528_v37 = vld [vmem:[#allocation3 + $0xd0] sm:$0xff] }
 0x2a7   : > { %3479 = vst.msk [vmem:[#allocation3 + $0x110] sm:$0xff] %vm483_vm3, %v3447_v58  ;;  %v3445_v49 = vsel %vm3374_vm7, %v3342_v41, %v3413_v25  ;;  %v3306_v35 = vmul.f32 %v6393_v46, %v7802_v10  ;;  %v6395_v42 = vadd.f32 %v3191_v60, %v7764_v48  ;;  %v7916_v5 = vpack.c.bf16 %v3528_v37, %v3527_v2 }
 0x2a8   : > { %3477 = vst.msk [vmem:[#allocation3 + $0xf0] sm:$0xff] %vm483_vm3, %v3445_v49  ;;  %v3347_v6 = vadd.f32 %v7808_v36, %v3308_v52  ;;  %v3309_v44 = vmul.f32 %v6394_v38, %v7802_v10 }
 0x2a9   : > { %v3345_v43 = vadd.f32 %v7808_v36, %v3306_v35  ;;  %v3307_v7 = vmul.f32 %v6395_v42, %v7802_v10  ;;  %6203 = vmatmul.mubr.msk.bf16.gmra.mrb[36].mxu1 %vm483_vm3, %v7916_v5 }
 0x2aa   : > { %vm3379_vm8 = vcmp.gt.f32.partialorder %v3347_v6, 0.0  ;;  %v3418_v20 = vmul.f32 %v7816_v11, %v3347_v6  ;;  %v3348_v48 = vadd.f32 %v7808_v36, %v3309_v44 }
 0x2ab   : > { %vm3377_vm9 = vcmp.gt.f32.partialorder %v3345_v43, 0.0  ;;  %v3416_v12 = vmul.f32 %v7816_v11, %v3345_v43  ;;  %v3346_v59 = vadd.f32 %v7808_v36, %v3307_v7  ;;  %v6186_v39 = vpop.f32.mrb[20].mxu0 }
 0x2ac   : > { %v3450_v27 = vsel %vm3379_vm8, %v3347_v6, %v3418_v20  ;;  %vm3380_vm10 = vcmp.gt.f32.partialorder %v3348_v48, 0.0  ;;  %v3419_v51 = vmul.f32 %v7816_v11, %v3348_v48  ;;  %v6396_v61 = vadd.f32 %v6186_v39, %v7767_v56  ;;  %v3204_v28 = vpop.f32.mrb[21].mxu0  ;;  %v3529_v4 = vld [vmem:[#allocation3 + $0x108] sm:$0xff] }
 0x2ad   : > { %3482 = vst.msk [vmem:[#allocation3 + $0x148] sm:$0xff] %vm483_vm3, %v3450_v27  ;;  %v3448_v1 = vsel %vm3377_vm9, %v3345_v43, %v3416_v12  ;;  %vm3378_vm11 = vcmp.gt.f32.partialorder %v3346_v59, 0.0  ;;  %v3417_v3 = vmul.f32 %v7816_v11, %v3346_v59  ;;  %v6397_v50 = vadd.f32 %v3204_v28, %v7769_v57  ;;  %v6187_v23 = vpop.f32.mrb[22].mxu0 }
 0x2ae   : > { %3480 = vst.msk [vmem:[#allocation3 + $0x128] sm:$0xff] %vm483_vm3, %v3448_v1  ;;  %v3451_v14 = vsel %vm3380_vm10, %v3348_v48, %v3419_v51  ;;  %v3312_v21 = vmul.f32 %v6396_v61, %v7802_v10  ;;  %v6398_v26 = vadd.f32 %v6187_v23, %v7771_v30  ;;  %v3207_v47 = vpop.f32.mrb[23].mxu0  ;;  %v3530_v56 = vld [vmem:[#allocation3 + $0x110] sm:$0xff] }
 0x2af   : > { %3483 = vst.msk [vmem:[#allocation3 + $0x150] sm:$0xff] %vm483_vm3, %v3451_v14  ;;  %v3449_v29 = vsel %vm3378_vm11, %v3346_v59, %v3417_v3  ;;  %v3310_v62 = vmul.f32 %v6397_v50, %v7802_v10  ;;  %v6399_v31 = vadd.f32 %v3207_v47, %v7773_v0  ;;  %v7940_v33 = vpack.c.bf16 %v3530_v56, %v3529_v4 }
 0x2b0   : > { %3481 = vst.msk [vmem:[#allocation3 + $0x130] sm:$0xff] %vm483_vm3, %v3449_v29  ;;  %v3351_v57 = vadd.f32 %v7808_v36, %v3312_v21  ;;  %v3313_v41 = vmul.f32 %v6398_v26, %v7802_v10 }
 0x2b1   : > { %v3349_v30 = vadd.f32 %v7808_v36, %v3310_v62  ;;  %v3311_v45 = vmul.f32 %v6399_v31, %v7802_v10  ;;  %6206 = vmatprep.mubr.msk.bf16.mxu1 %vm483_vm3, %v7940_v33 }
 0x2b2   : > { %vm3383_vm12 = vcmp.gt.f32.partialorder %v3351_v57, 0.0  ;;  %v3422_v53 = vmul.f32 %v7816_v11, %v3351_v57  ;;  %v3352_v0 = vadd.f32 %v7808_v36, %v3313_v41 }
 0x2b3   : > { %vm3381_vm13 = vcmp.gt.f32.partialorder %v3349_v30, 0.0  ;;  %v3420_v63 = vmul.f32 %v7816_v11, %v3349_v30  ;;  %v3350_v40 = vadd.f32 %v7808_v36, %v3311_v45  ;;  %v6190_v55 = vpop.f32.mrb[24].mxu0 }
 0x2b4   : > { %v3454_v19 = vsel %vm3383_vm12, %v3351_v57, %v3422_v53  ;;  %vm3384_vm14 = vcmp.gt.f32.partialorder %v3352_v0, 0.0  ;;  %v3423_v25 = vmul.f32 %v7816_v11, %v3352_v0  ;;  %v6400_v46 = vadd.f32 %v6190_v55, %v7775_v54  ;;  %v3220_v15 = vpop.f32.mrb[25].mxu0  ;;  %v3531_v42 = vld [vmem:[#allocation3 + $0x148] sm:$0xff] }
 0x2b5   : > { %3486 = vst.msk [vmem:[#allocation3 + $0x188] sm:$0xff] %vm483_vm3, %v3454_v19  ;;  %v3452_v58 = vsel %vm3381_vm13, %v3349_v30, %v3420_v63  ;;  %vm3382_vm15 = vcmp.gt.f32.partialorder %v3350_v40, 0.0  ;;  %v3421_v52 = vmul.f32 %v7816_v11, %v3350_v40  ;;  %v6401_v38 = vadd.f32 %v3220_v15, %v7777_v8  ;;  %v6191_v60 = vpop.f32.mrb[26].mxu0  ;;  %v3496_v63 = vld [vmem:[#allocation3 + $0x7] sm:$0xff] }
 0x2b6   : > { %3484 = vst.msk [vmem:[#allocation3 + $0x168] sm:$0xff] %vm483_vm3, %v3452_v58  ;;  %v3455_v2 = vsel %vm3384_vm14, %v3352_v0, %v3423_v25  ;;  %v3316_v37 = vmul.f32 %v6400_v46, %v7802_v10  ;;  %v6402_v49 = vadd.f32 %v6191_v60, %v7779_v9  ;;  %v3223_v35 = vpop.f32.mrb[27].mxu0  ;;  %v3532_v54 = vld [vmem:[#allocation3 + $0x150] sm:$0xff] }
 0x2b7   : > { %3487 = vst.msk [vmem:[#allocation3 + $0x190] sm:$0xff] %vm483_vm3, %v3455_v2  ;;  %v3453_v6 = vsel %vm3382_vm15, %v3350_v40, %v3421_v52  ;;  %v3314_v44 = vmul.f32 %v6401_v38, %v7802_v10  ;;  %v6403_v43 = vadd.f32 %v3223_v35, %v7781_v17  ;;  %v7964_v7 = vpack.c.bf16 %v3532_v54, %v3531_v42  ;;  %v3497_v40 = vld [vmem:[#allocation3 + $0xf] sm:$0xff]  ;;  %v3498_v2 = vld [vmem:[#allocation3 + $0x47] sm:$0xff] }
 0x2b8   : > { %3485 = vst.msk [vmem:[#allocation3 + $0x170] sm:$0xff] %vm483_vm3, %v3453_v6  ;;  %v3355_v8 = vadd.f32 %v7808_v36, %v3316_v37  ;;  %v3317_v20 = vmul.f32 %v6402_v49, %v7802_v10  ;;  %v3512_v52 = vpack.c.bf16 %v3497_v40, %v3496_v63  ;;  %v3499_v60 = vld [vmem:[#allocation3 + $0x4f] sm:$0xff]  ;;  %v3847_v49 = vsel %vm3571_vm2, %v7869_v32, 0  ;;  %v3500_v35 = vld [vmem:[#allocation3 + $0x87] sm:$0xff] }
 0x2b9   : > { %v3353_v9 = vadd.f32 %v7808_v36, %v3314_v44  ;;  %v3315_v48 = vmul.f32 %v6403_v43, %v7802_v10  ;;  %6207 = vmatmul.mubr.msk.bf16.gmra.mrb[40].mxu1 %vm483_vm3, %v7964_v7  ;;  %v8012_v37 = vpack.c.bf16 %v3499_v60, %v3498_v2  ;;  %v5528_v54 = vld [vmem:[%s8342_s2 + $0xc] sm:$0xf]  ;;  %v5546_v2 = vld [vmem:[%s8342_s2 + $0x14] sm:$0xf] }
 0x2ba   : > { %vm3387_vm4 = vcmp.gt.f32.partialorder %v3355_v8, 0.0  ;;  %v3426_v12 = vmul.f32 %v7816_v11, %v3355_v8  ;;  %v3356_v17 = vadd.f32 %v7808_v36, %v3317_v20  ;;  %v3503_v6 = vld [vmem:[#allocation3 + $0xcf] sm:$0xff]  ;;  %v3502_v43 = vld [vmem:[#allocation3 + $0xc7] sm:$0xff] }
 0x2bb   : > { %vm3385_vm5 = vcmp.gt.f32.partialorder %v3353_v9, 0.0  ;;  %v3424_v59 = vmul.f32 %v7816_v11, %v3353_v9  ;;  %v3354_v39 = vadd.f32 %v7808_v36, %v3315_v48  ;;  %v6194_v27 = vpop.f32.mrb[28].mxu0  ;;  %v3505_v44 = vld [vmem:[#allocation3 + $0x10f] sm:$0xff]  ;;  %v8026_v32 = vpack.c.bf16 %v3503_v6, %v3502_v43  ;;  %v3966_v60 = vld [vmem:[#allocation3 + $0xa7] sm:$0xff] }
 0x2bc   : > { %v3458_v51 = vsel %vm3387_vm4, %v3355_v8, %v3426_v12  ;;  %vm3388_vm6 = vcmp.gt.f32.partialorder %v3356_v17, 0.0  ;;  %v3427_v61 = vmul.f32 %v7816_v11, %v3356_v17  ;;  %v6404_v28 = vadd.f32 %v6194_v27, %v7783_v18  ;;  %v3236_v1 = vpop.f32.mrb[29].mxu0  ;;  %v3533_v56 = vld [vmem:[#allocation3 + $0x188] sm:$0xff] }
 0x2bd   : > { %3490 = vst.msk [vmem:[#allocation3 + $0x1c8] sm:$0xff] %vm483_vm3, %v3458_v51  ;;  %v3456_v3 = vsel %vm3385_vm5, %v3353_v9, %v3424_v59  ;;  %vm3386_vm7 = vcmp.gt.f32.partialorder %v3354_v39, 0.0  ;;  %v3425_v50 = vmul.f32 %v7816_v11, %v3354_v39  ;;  %v6405_v23 = vadd.f32 %v3236_v1, %v7785_v24  ;;  %v6195_v14 = vpop.f32.mrb[30].mxu0  ;;  %v3504_v8 = vld [vmem:[#allocation3 + $0x107] sm:$0xff]  ;;  %v3507_v9 = vld [vmem:[#allocation3 + $0x14f] sm:$0xff] }
 0x2be   : > { %3488 = vst.msk [vmem:[#allocation3 + $0x1a8] sm:$0xff] %vm483_vm3, %v3456_v3  ;;  %v3459_v21 = vsel %vm3388_vm6, %v3356_v17, %v3427_v61  ;;  %v3320_v26 = vmul.f32 %v6404_v28, %v7802_v10  ;;  %v6406_v47 = vadd.f32 %v6195_v14, %v7787_v16  ;;  %v3239_v4 = vpop.f32.mrb[31].mxu0  ;;  %v3534_v18 = vld [vmem:[#allocation3 + $0x190] sm:$0xff]  ;;  %v8028_v20 = vpack.c.bf16 %v3505_v44, %v3504_v8  ;;  %v3506_v12 = vld [vmem:[#allocation3 + $0x147] sm:$0xff] }
 0x2bf   : > { %3491 = vst.msk [vmem:[#allocation3 + $0x1d0] sm:$0xff] %vm483_vm3, %v3459_v21  ;;  %v3457_v29 = vsel %vm3386_vm7, %v3354_v39, %v3425_v50  ;;  %v3318_v62 = vmul.f32 %v6405_v23, %v7802_v10  ;;  %v6407_v31 = vadd.f32 %v3239_v4, %v7789_v34  ;;  %v7988_v57 = vpack.c.bf16 %v3534_v18, %v3533_v56  ;;  %v3509_v48 = vld [vmem:[#allocation3 + $0x18f] sm:$0xff]  ;;  %v3508_v59 = vld [vmem:[#allocation3 + $0x187] sm:$0xff] }
 0x2c0   : > { %3489 = vst.msk [vmem:[#allocation3 + $0x1b0] sm:$0xff] %vm483_vm3, %v3457_v29  ;;  %v3359_v24 = vadd.f32 %v7808_v36, %v3320_v26  ;;  %v3321_v41 = vmul.f32 %v6406_v47, %v7802_v10  ;;  %v8034_v17 = vpack.c.bf16 %v3507_v9, %v3506_v12  ;;  %v8036_v39 = vpack.c.bf16 %v3509_v48, %v3508_v59  ;;  %v3796_v27 = vld [vmem:[#allocation3 + $0x9] sm:$0xff]  ;;  %v3797_v51 = vld [vmem:[#allocation3 + $0x11] sm:$0xff] }
 0x2c1   : > { %v3357_v16 = vadd.f32 %v7808_v36, %v3318_v62  ;;  %v3319_v30 = vmul.f32 %v6407_v31, %v7802_v10  ;;  %6210 = vmatprep.mubr.msk.bf16.mxu1 %vm483_vm3, %v7988_v57  ;;  %v3812_v1 = vpack.c.bf16 %v3797_v51, %v3796_v27  ;;  %v3798_v50 = vld [vmem:[#allocation3 + $0x49] sm:$0xff]  ;;  %v3799_v23 = vld [vmem:[#allocation3 + $0x51] sm:$0xff]  ;;  %v4013_v47 = vsel %vm3571_vm2, %v5528_v54, 0 }
 0x2c2   : > { %vm3391_vm8 = vcmp.gt.f32.partialorder %v3359_v24, 0.0  ;;  %v3430_v45 = vmul.f32 %v7816_v11, %v3359_v24  ;;  %v3360_v34 = vadd.f32 %v7808_v36, %v3321_v41  ;;  %v3800_v14 = vld [vmem:[#allocation3 + $0x89] sm:$0xff]  ;;  %v3801_v21 = vld [vmem:[#allocation3 + $0x91] sm:$0xff]  ;;  %v8047_v26 = vpack.c.bf16 %v3799_v23, %v3798_v50 }
 0x2c3   : > { %vm3389_vm9 = vcmp.gt.f32.partialorder %v3357_v16, 0.0  ;;  %v3428_v53 = vmul.f32 %v7816_v11, %v3357_v16  ;;  %v3358_v0 = vadd.f32 %v7808_v36, %v3319_v30  ;;  %v8050_v4 = vpack.c.bf16 %v3801_v21, %v3800_v14  ;;  %v5537_v56 = vld [vmem:[%s8342_s2 + $0x10] sm:$0xf]  ;;  %v3970_v44 = vld [vmem:[#allocation3 + $0x127] sm:$0xff] }
 0x2c4   : > { %v3462_v55 = vsel %vm3391_vm8, %v3359_v24, %v3430_v45  ;;  %vm3392_vm10 = vcmp.gt.f32.partialorder %v3360_v34, 0.0  ;;  %v3431_v19 = vmul.f32 %v7816_v11, %v3360_v34  ;;  %v3535_v15 = vld [vmem:[#allocation3 + $0x1c8] sm:$0xff]  ;;  %v3803_v29 = vld [vmem:[#allocation3 + $0xd1] sm:$0xff] }
 0x2c5   : > { %3494 = vst.msk [vmem:[#allocation3 + $0x208] sm:$0xff] %vm483_vm3, %v3462_v55  ;;  %v3460_v10 = vsel %vm3389_vm9, %v3357_v16, %v3428_v53  ;;  %vm3390_vm11 = vcmp.gt.f32.partialorder %v3358_v0, 0.0  ;;  %v3429_v25 = vmul.f32 %v7816_v11, %v3358_v0  ;;  %v3501_v11 = vld [vmem:[#allocation3 + $0x8f] sm:$0xff]  ;;  %v3510_v28 = vld [vmem:[#allocation3 + $0x1c7] sm:$0xff] }
 0x2c6   : > { %3492 = vst.msk [vmem:[#allocation3 + $0x1e8] sm:$0xff] %vm483_vm3, %v3460_v10  ;;  %v3463_v46 = vsel %vm3392_vm10, %v3360_v34, %v3431_v19  ;;  %v3536_v58 = vld [vmem:[#allocation3 + $0x1d0] sm:$0xff]  ;;  %v8016_v42 = vpack.c.bf16 %v3501_v11, %v3500_v35  ;;  %v3962_v10 = vld [vmem:[#allocation3 + $0x27] sm:$0xff] }
 0x2c7   : > { %3495 = vst.msk [vmem:[#allocation3 + $0x210] sm:$0xff] %vm483_vm3, %v3463_v46  ;;  %v3461_v36 = vsel %vm3390_vm11, %v3358_v0, %v3429_v25  ;;  %v8006_v38 = vpack.c.bf16 %v3536_v58, %v3535_v15  ;;  %v3511_v61 = vld [vmem:[#allocation3 + $0x1cf] sm:$0xff]  ;;  %v3964_v58 = vld [vmem:[#allocation3 + $0x67] sm:$0xff] }
 0x2c8   : > { %3493 = vst.msk [vmem:[#allocation3 + $0x1f0] sm:$0xff] %vm483_vm3, %v3461_v36  ;;  %v8042_v3 = vpack.c.bf16 %v3511_v61, %v3510_v28  ;;  %v3802_v18 = vld [vmem:[#allocation3 + $0xc9] sm:$0xff]  ;;  %v3805_v31 = vld [vmem:[#allocation3 + $0x111] sm:$0xff]  ;;  %v4179_v36 = vsel %vm3571_vm2, %v5537_v56, 0 }
 0x2c9   : > { %6211 = vmatmul.mubr.msk.bf16.gmra.mrb[44].mxu1 %vm483_vm3, %v8006_v38  ;;  %v3804_v62 = vld [vmem:[#allocation3 + $0x109] sm:$0xff]  ;;  %v8060_v24 = vpack.c.bf16 %v3803_v29, %v3802_v18  ;;  %v3807_v30 = vld [vmem:[#allocation3 + $0x151] sm:$0xff]  ;;  %v4345_v18 = vsel %vm3571_vm2, %v5546_v2, 0 }
 0x2ca   : > { %6216 = vmatprep.mubr.msk.bf16.mxu1 %vm483_vm3, %v3512_v52  ;;  %v8062_v41 = vpack.c.bf16 %v3805_v31, %v3804_v62  ;;  %v3806_v16 = vld [vmem:[#allocation3 + $0x149] sm:$0xff]  ;;  %v3809_v34 = vld [vmem:[#allocation3 + $0x191] sm:$0xff] }
 0x2cb   : > { %v3808_v45 = vld [vmem:[#allocation3 + $0x189] sm:$0xff]  ;;  %v8068_v53 = vpack.c.bf16 %v3807_v30, %v3806_v16  ;;  %v3811_v40 = vld [vmem:[#allocation3 + $0x1d1] sm:$0xff] }
 0x2cc   : > { %v8070_v0 = vpack.c.bf16 %v3809_v34, %v3808_v45  ;;  %v3810_v63 = vld [vmem:[#allocation3 + $0x1c9] sm:$0xff]  ;;  %v5555_v31 = vld [vmem:[%s8342_s2 + $0x18] sm:$0xf] }
 0x2cd   : > { %v3963_v55 = vld [vmem:[#allocation3 + $0x2f] sm:$0xff]  ;;  %v8076_v19 = vpack.c.bf16 %v3811_v40, %v3810_v63  ;;  %v3972_v48 = vld [vmem:[#allocation3 + $0x167] sm:$0xff] }
 0x2ce   : > { %v3978_v25 = vpack.c.bf16 %v3963_v55, %v3962_v10  ;;  %v3965_v46 = vld [vmem:[#allocation3 + $0x6f] sm:$0xff]  ;;  %v3974_v59 = vld [vmem:[#allocation3 + $0x1a7] sm:$0xff] }
 0x2cf   : > { %v3967_v15 = vld [vmem:[#allocation3 + $0xaf] sm:$0xff]  ;;  %v3979_v52 = vpack.c.bf16 %v3965_v46, %v3964_v58  ;;  %v3976_v28 = vld [vmem:[#allocation3 + $0x1e7] sm:$0xff] }
 0x2d0   : > { %v3980_v11 = vpack.c.bf16 %v3967_v15, %v3966_v60  ;;  %v3971_v35 = vld [vmem:[#allocation3 + $0x12f] sm:$0xff] }
 0x2d1   : > { %6217 = vmatmul.mubr.msk.bf16.vlgmr.msra.gmra.mrb[32].mxu1 %vm483_vm3, %v8012_v37  ;;  %v3982_v43 = vpack.c.bf16 %v3971_v35, %v3970_v44  ;;  %v3973_v8 = vld [vmem:[#allocation3 + $0x16f] sm:$0xff] }
 0x2d2   : > { %6233 = vmatpush3.bf16.msra.mxu1 %v3847_v49  ;;  %6220 = vmatprep.mubr.msk.bf16.mxu1 %vm483_vm3, %v8016_v42  ;;  %v3969_v49 = vld [vmem:[#allocation3 + $0xef] sm:$0xff]  ;;  %v3983_v12 = vpack.c.bf16 %v3973_v8, %v3972_v48  ;;  %v4512_v8 = vsel %vm3571_vm2, %v5555_v31, 0  ;;  %v5564_v48 = vld [vmem:[%s8342_s2 + $0x1c] sm:$0xf] }
 0x2d3   : > { %6772 = vmatprep.subr.msk.bf16.mxu1 %vm3571_vm2, %v5528_v54  ;;  %v3968_v54 = vld [vmem:[#allocation3 + $0xe7] sm:$0xff]  ;;  %v3975_v9 = vld [vmem:[#allocation3 + $0x1af] sm:$0xff] }
 0x2d4   : > { %v3981_v6 = vpack.c.bf16 %v3969_v49, %v3968_v54  ;;  %v3984_v27 = vpack.c.bf16 %v3975_v9, %v3974_v59  ;;  %v3977_v51 = vld [vmem:[#allocation3 + $0x1ef] sm:$0xff] }
 0x2d5   : > { %v4129_v61 = vld [vmem:[#allocation3 + $0x30] sm:$0xff]  ;;  %v4128_v50 = vld [vmem:[#allocation3 + $0x28] sm:$0xff] }
 0x2d6   : > { %v4144_v23 = vpack.c.bf16 %v4129_v61, %v4128_v50  ;;  %v4131_v14 = vld [vmem:[#allocation3 + $0x70] sm:$0xff]  ;;  %v4132_v29 = vld [vmem:[#allocation3 + $0xa8] sm:$0xff] }
 0x2d7   : > { %v4133_v21 = vld [vmem:[#allocation3 + $0xb0] sm:$0xff]  ;;  %v4134_v45 = vld [vmem:[#allocation3 + $0xe8] sm:$0xff] }
 0x2d8   : > { %v4146_v62 = vpack.c.bf16 %v4133_v21, %v4132_v29  ;;  %v4135_v16 = vld [vmem:[#allocation3 + $0xf0] sm:$0xff]  ;;  %v4136_v63 = vld [vmem:[#allocation3 + $0x128] sm:$0xff] }
 0x2d9   : > { %6221 = vmatmul.mubr.msk.bf16.gmra.mrb[36].mxu1 %vm483_vm3, %v8026_v32  ;;  %v4137_v30 = vld [vmem:[#allocation3 + $0x130] sm:$0xff]  ;;  %v4147_v34 = vpack.c.bf16 %v4135_v16, %v4134_v45  ;;  %v4140_v15 = vld [vmem:[#allocation3 + $0x1a8] sm:$0xff] }
 0x2da   : > { %6224 = vmatprep.mubr.msk.bf16.mxu1 %vm483_vm3, %v8028_v20  ;;  %v4148_v40 = vpack.c.bf16 %v4137_v30, %v4136_v63  ;;  %v4139_v55 = vld [vmem:[#allocation3 + $0x170] sm:$0xff] }
 0x2db   : > { %v4141_v10 = vld [vmem:[#allocation3 + $0x1b0] sm:$0xff] }
 0x2dc   : > { %v4150_v58 = vpack.c.bf16 %v4141_v10, %v4140_v15  ;;  %v4295_v60 = vld [vmem:[#allocation3 + $0x31] sm:$0xff]  ;;  %v4296_v35 = vld [vmem:[#allocation3 + $0x69] sm:$0xff] }
 0x2dd   : > { %v4297_v54 = vld [vmem:[#allocation3 + $0x71] sm:$0xff] }
 0x2de   : > { %v4299_v44 = vld [vmem:[#allocation3 + $0xb1] sm:$0xff] }
 0x2df   : > { %v4301_v59 = vld [vmem:[#allocation3 + $0xf1] sm:$0xff] }
 0x2e0   : > { %v4305_v50 = vld [vmem:[#allocation3 + $0x171] sm:$0xff] }
 0x2e1   : > { %6225 = vmatmul.mubr.msk.bf16.gmra.mrb[40].mxu1 %vm483_vm3, %v8034_v17 }
 0x2e2   : > { %6228 = vmatprep.mubr.msk.bf16.mxu1 %vm483_vm3, %v8036_v39 }
 0x2e9   : > { %6229 = vmatmul.mubr.msk.bf16.gmra.mrb[44].mxu1 %vm483_vm3, %v8042_v3 }
 0x2ea   : > { %6234 = vmatprep.mubr.msk.bf16.mxu1 %vm483_vm3, %v3812_v1  ;;  %v3985_v1 = vpack.c.bf16 %v3977_v51, %v3976_v28  ;;  %v4303_v51 = vld [vmem:[#allocation3 + $0x131] sm:$0xff] }
 0x2f1   : > { %6235 = vmatmul.mubr.msk.bf16.vlgmr.msra.gmra.mrb[32].mxu1 %vm483_vm3, %v8047_v26 }
 0x2f2   : > { %6251 = vmatpush3.bf16.msra.mxu1 %v4013_v47  ;;  %6238 = vmatprep.mubr.msk.bf16.mxu1 %vm483_vm3, %v8050_v4  ;;  %v4130_v47 = vld [vmem:[#allocation3 + $0x68] sm:$0xff] }
 0x2f3   : > { %6773 = vmatprep.subr.msk.bf16.mxu1 %vm3571_vm2, %v5537_v56  ;;  %v4145_v56 = vpack.c.bf16 %v4131_v14, %v4130_v47  ;;  %v4307_v14 = vld [vmem:[#allocation3 + $0x1b1] sm:$0xff] }
 0x2f9   : > { %6239 = vmatmul.mubr.msk.bf16.gmra.mrb[36].mxu1 %vm483_vm3, %v8060_v24 }
 0x2fa   : > { %6242 = vmatprep.mubr.msk.bf16.mxu1 %vm483_vm3, %v8062_v41 }
 0x301   : > { %6243 = vmatmul.mubr.msk.bf16.gmra.mrb[40].mxu1 %vm483_vm3, %v8068_v53 }
 0x302   : > { %6246 = vmatprep.mubr.msk.bf16.mxu1 %vm483_vm3, %v8070_v0 }
 0x309   : > { %6247 = vmatmul.mubr.msk.bf16.gmra.mrb[44].mxu1 %vm483_vm3, %v8076_v19 }
 0x30a   : > { %6252 = vmatprep.mubr.msk.bf16.mxu1 %vm483_vm3, %v3978_v25  ;;  %v4138_v25 = vld [vmem:[#allocation3 + $0x168] sm:$0xff] }
 0x30b   : > { %v4149_v46 = vpack.c.bf16 %v4139_v55, %v4138_v25 }
 0x311   : > { %6253 = vmatmul.mubr.msk.bf16.vlgmr.msra.gmra.mrb[32].mxu1 %vm483_vm3, %v3979_v52  ;;  %v4143_v52 = vld [vmem:[#allocation3 + $0x1f0] sm:$0xff] }
 0x312   : > { %6269 = vmatpush3.bf16.msra.mxu1 %v4179_v36  ;;  %6256 = vmatprep.mubr.msk.bf16.mxu1 %vm483_vm3, %v3980_v11  ;;  %v4294_v36 = vld [vmem:[#allocation3 + $0x29] sm:$0xff] }
 0x313   : > { %6774 = vmatprep.subr.msk.bf16.mxu1 %vm3571_vm2, %v5546_v2  ;;  %v4142_v11 = vld [vmem:[#allocation3 + $0x1e8] sm:$0xff]  ;;  %v4310_v49 = vpack.c.bf16 %v4295_v60, %v4294_v36 }
 0x314   : > { %v4151_v2 = vpack.c.bf16 %v4143_v52, %v4142_v11  ;;  %v8206_v11 = vld [vmem:[%s8348_s8] ss:$0 sm:$0xff] }
 0x319   : > { %6257 = vmatmul.mubr.msk.bf16.gmra.mrb[36].mxu1 %vm483_vm3, %v3981_v6  ;;  %v4298_v6 = vld [vmem:[#allocation3 + $0xa9] sm:$0xff] }
 0x31a   : > { %6260 = vmatprep.mubr.msk.bf16.mxu1 %vm483_vm3, %v3982_v43  ;;  %v4311_v43 = vpack.c.bf16 %v4297_v54, %v4296_v35  ;;  %v4312_v9 = vpack.c.bf16 %v4299_v44, %v4298_v6  ;;  %v8217_v35 = vld [vmem:[%s8349_s9] ss:$0 sm:$0xff] }
 0x31b   : > { %v8223_v44 = vld [vmem:[%s8351_s11] ss:$0 sm:$0xff] }
 0x321   : > { %6261 = vmatmul.mubr.msk.bf16.gmra.mrb[40].mxu1 %vm483_vm3, %v3983_v12  ;;  %v4300_v12 = vld [vmem:[#allocation3 + $0xe9] sm:$0xff] }
 0x322   : > { %6264 = vmatprep.mubr.msk.bf16.mxu1 %vm483_vm3, %v3984_v27  ;;  %v4302_v27 = vld [vmem:[#allocation3 + $0x129] sm:$0xff]  ;;  %v4313_v61 = vpack.c.bf16 %v4301_v59, %v4300_v12 }
 0x323   : > { %v4314_v28 = vpack.c.bf16 %v4303_v51, %v4302_v27 }
 0x329   : > { %6265 = vmatmul.mubr.msk.bf16.gmra.mrb[44].mxu1 %vm483_vm3, %v3985_v1  ;;  %v4304_v1 = vld [vmem:[#allocation3 + $0x169] sm:$0xff] }
 0x32a   : > { %6270 = vmatprep.mubr.msk.bf16.mxu1 %vm483_vm3, %v4144_v23  ;;  %v4306_v23 = vld [vmem:[#allocation3 + $0x1a9] sm:$0xff]  ;;  %v4315_v21 = vpack.c.bf16 %v4305_v50, %v4304_v1 }
 0x32b   : > { %v4316_v47 = vpack.c.bf16 %v4307_v14, %v4306_v23 }
 0x331   : > { %6271 = vmatmul.mubr.msk.bf16.vlgmr.msra.gmra.mrb[32].mxu1 %vm483_vm3, %v4145_v56  ;;  %v4308_v56 = vld [vmem:[#allocation3 + $0x1e9] sm:$0xff] }
 0x332   : > { %6287 = vmatpush3.bf16.msra.mxu1 %v4345_v18  ;;  %6274 = vmatprep.mubr.msk.bf16.mxu1 %vm483_vm3, %v4146_v62  ;;  %v4309_v18 = vld [vmem:[#allocation3 + $0x1f1] sm:$0xff]  ;;  %v4678_v62 = vsel %vm3571_vm2, %v5564_v48, 0 }
 0x333   : > { %6775 = vmatprep.subr.msk.bf16.mxu1 %vm3571_vm2, %v5555_v31  ;;  %v4317_v29 = vpack.c.bf16 %v4309_v18, %v4308_v56  ;;  %v5573_v31 = vld [vmem:[%s8342_s2 + $0x20] sm:$0xf] }
 0x339   : > { %6275 = vmatmul.mubr.msk.bf16.gmra.mrb[36].mxu1 %vm483_vm3, %v4147_v34 }
 0x33a   : > { %6278 = vmatprep.mubr.msk.bf16.mxu1 %vm483_vm3, %v4148_v40 }
 0x341   : > { %6279 = vmatmul.mubr.msk.bf16.gmra.mrb[40].mxu1 %vm483_vm3, %v4149_v46 }
 0x342   : > { %6282 = vmatprep.mubr.msk.bf16.mxu1 %vm483_vm3, %v4150_v58 }
 0x349   : > { %6283 = vmatmul.mubr.msk.bf16.gmra.mrb[44].mxu1 %vm483_vm3, %v4151_v2  ;;  %v8211_v2 = vld [vmem:[%s8350_s10] ss:$0 sm:$0xff] }
 0x34a   : > { %6288 = vmatprep.mubr.msk.bf16.mxu1 %vm483_vm3, %v4310_v49 }
 0x351   : > { %6289 = vmatmul.mubr.msk.bf16.vlgmr.msra.gmra.mrb[32].mxu1 %vm483_vm3, %v4311_v43 }
 0x352   : > { %6305 = vmatpush3.bf16.msra.mxu1 %v4512_v8  ;;  %6292 = vmatprep.mubr.msk.bf16.mxu1 %vm483_vm3, %v4312_v9 }
 0x353   : > { %6776 = vmatprep.subr.msk.bf16.mxu1 %vm3571_vm2, %v5564_v48 }
 0x359   : > { %6293 = vmatmul.mubr.msk.bf16.gmra.mrb[36].mxu1 %vm483_vm3, %v4313_v61 }
 0x35a   : > { %6296 = vmatprep.mubr.msk.bf16.mxu1 %vm483_vm3, %v4314_v28 }
 0x361   : > { %6297 = vmatmul.mubr.msk.bf16.gmra.mrb[40].mxu1 %vm483_vm3, %v4315_v21 }
 0x362   : > { %6300 = vmatprep.mubr.msk.bf16.mxu1 %vm483_vm3, %v4316_v47 }
 0x369   : > { %6301 = vmatmul.mubr.msk.bf16.gmra.mrb[44].mxu1 %vm483_vm3, %v4317_v29 }
 0x36a   : > { %6306 = vmatprep.mubr.msk.bf16.mxu1 %vm483_vm3, %v8012_v37  ;;  %v4476_v37 = vld [vmem:[#allocation3 + $0x20f] sm:$0xff] }
 0x371   : > { %6307 = vmatmul.mubr.msk.bf16.vlgmr.msra.gmra.mrb[32].mxu1 %vm483_vm3, %v8016_v42  ;;  %v4475_v42 = vld [vmem:[#allocation3 + $0x207] sm:$0xff] }
 0x372   : > { %6323 = vmatpush3.bf16.msra.mxu1 %v4678_v62  ;;  %6310 = vmatprep.mubr.msk.bf16.mxu1 %vm483_vm3, %v8026_v32  ;;  %v4484_v16 = vpack.c.bf16 %v4476_v37, %v4475_v42  ;;  %v4844_v32 = vsel %vm3571_vm2, %v5573_v31, 0 }
 0x373   : > { %6777 = vmatprep.subr.msk.bf16.mxu1 %vm3571_vm2, %v5573_v31 }
 0x379   : > { %6311 = vmatmul.mubr.msk.bf16.gmra.mrb[36].mxu1 %vm483_vm3, %v8028_v20  ;;  %v5005_v20 = vld [vmem:[%s8343_s3] sm:$0x3] }
 0x37a   : > { %6314 = vmatprep.mubr.msk.bf16.mxu1 %vm483_vm3, %v8034_v17 }
 0x381   : > { %6315 = vmatmul.mubr.msk.bf16.gmra.mrb[40].mxu1 %vm483_vm3, %v8036_v39  ;;  %v6828_v39 = vld [vmem:[%s7115_s20 + $0x10] sm:$0xff]  }
 0x382   : > { %6318 = vmatprep.mubr.msk.bf16.mxu1 %vm483_vm3, %v8042_v3  ;;  %v6829_v3 = vld [vmem:[%s7115_s20 + $0x20] sm:$0xff]  }
 0x389   : > { %6319 = vmatmul.mubr.msk.bf16.gmra.mrb[44].mxu1 %vm483_vm3, %v4484_v16 }
 0x38a   : > { %6324 = vmatprep.mubr.msk.bf16.mxu1 %vm483_vm3, %v7861_v13  ;;  %v4642_v13 = vld [vmem:[#allocation3 + $0x210] sm:$0xff] }
 0x391   : > { %6325 = vmatmul.mubr.msk.bf16.vlgmr.msra.gmra.mrb[32].mxu1 %vm483_vm3, %v7892_v22  ;;  %v4641_v22 = vld [vmem:[#allocation3 + $0x208] sm:$0xff] }
 0x392   : > { %6341 = vmatpush3.bf16.msra.mxu1 %v4844_v32  ;;  %6328 = vmatprep.mubr.msk.bf16.mxu1 %vm483_vm3, %v7916_v5  ;;  %v4650_v17 = vpack.c.bf16 %v4642_v13, %v4641_v22  ;;  %v5071_v5 = vsel %vm847_vm0, %v5005_v20, 0 }
 0x393   : > { %6778 = vmatprep.subr.msk.bf16.mxu1 %vm847_vm0, %v5005_v20 }
 0x399   : > { %6329 = vmatmul.mubr.msk.bf16.gmra.mrb[36].mxu1 %vm483_vm3, %v7940_v33  ;;  %v4807_v33 = vld [vmem:[#allocation3 + $0x209] sm:$0xff] }
 0x39a   : > { %6332 = vmatprep.mubr.msk.bf16.mxu1 %vm483_vm3, %v7964_v7  ;;  %v4808_v7 = vld [vmem:[#allocation3 + $0x211] sm:$0xff] }
 0x3a1   : > { %6333 = vmatmul.mubr.msk.bf16.gmra.mrb[40].mxu1 %vm483_vm3, %v7988_v57  ;;  %v6827_v57 = vld [vmem:[%s7115_s20] sm:$0xff]  }
 0x3a2   : > { %6336 = vmatprep.mubr.msk.bf16.mxu1 %vm483_vm3, %v8006_v38  ;;  %v4816_v38 = vpack.c.bf16 %v4808_v7, %v4807_v33 }
 0x3a9   : > { %6337 = vmatmul.mubr.msk.bf16.gmra.mrb[44].mxu1 %vm483_vm3, %v4650_v17 }
 0x3aa   : > { %6342 = vmatprep.mubr.msk.bf16.mxu1 %vm483_vm3, %v8047_v26  ;;  %v6830_v26 = vld [vmem:[%s7115_s20 + $0x30] sm:$0xff]  }
 0x3b1   : > { %6343 = vmatmul.mubr.msk.bf16.vlgmr.msra.gmra.mrb[32].mxu1 %vm483_vm3, %v8050_v4  ;;  %v6831_v4 = vld [vmem:[%s7115_s20 + $0x40] sm:$0xff]  }
 0x3b2   : > { %6359 = vmatpush3.bf16.msra.mxu1 %v5071_v5  ;;  %6346 = vmatprep.mubr.msk.bf16.mxu1 %vm483_vm3, %v8060_v24  ;;  %v6832_v24 = vld [vmem:[%s7115_s20 + $0x50] sm:$0xff]  }
 0x3b9   : > { %6347 = vmatmul.mubr.msk.bf16.gmra.mrb[36].mxu1 %vm483_vm3, %v8062_v41  ;;  %v6833_v41 = vld [vmem:[%s7115_s20 + $0x60] sm:$0xff]  }
 0x3ba   : > { %6350 = vmatprep.mubr.msk.bf16.mxu1 %vm483_vm3, %v8068_v53  ;;  %v6834_v53 = vld [vmem:[%s7115_s20 + $0x70] sm:$0xff]   ;;  %s5342_s20 = sshll.u32 %s431_s22, 3 }
 0x3bb   : > { %s433_s23 = scalar_lea.vmem [#allocation4], %s5342_s20  ;;  %s6900_s20 = smov [#allocation4]  }
 0x3bc   : > { %s5279_s24 = sshll.u32 %s433_s23, 4  ;;  %s6839_s29 = sshll.u32 %s6900_s20, 4  ;;  %s8295_s24 = int_to_ptr.vmem [resolvable:$true] %s5279_s24  ;;  %s6840_s29 = int_to_ptr.vmem [resolvable:$false] %s6839_s29 }
 0x3bd   : > { %s6835_s0 = scalar_lea.vmem %s8295_s24, 128  ;;  %s6841_s1 = scalar_lea.vmem %s6840_s29, 256 }
 0x3be   : > { %p6836_p11 = scmp.ne.s32.totalorder %s8295_s24, %s6835_s0  ;;  %p6842_p0 = scmp.lt.s32.totalorder %s8295_s24, %s6840_s29 }
 0x3bf   : > { %p6843_p1 = scmp.lt.s32.totalorder %s6841_s1, %s6835_s0 }
 0x3c0   : > { %p6837_p12 = pnand %p6836_p11, %p7009_p5 }
 0x3c1   : > { %6351 = vmatmul.mubr.msk.bf16.gmra.mrb[40].mxu1 %vm483_vm3, %v8070_v0  ;;  %p6844_p2 = por %p6843_p1, %p6842_p0 }
 0x3c2   : > { %6354 = vmatprep.mubr.msk.bf16.mxu1 %vm483_vm3, %v8076_v19  ;;  %p6838_p13 = pneg %p6837_p12 }
 0x3c4   : > { %p6845_p3 = pnand %p6844_p2, %p6838_p13 }
 0x3c9   : > { %6355 = vmatmul.mubr.msk.bf16.gmra.mrb[44].mxu1 %vm483_vm3, %v4816_v38 }
 0x3ca   : > { %6360 = vmatprep.mubr.msk.bf16.mxu1 %vm440_vm1, %v6827_v57 }
 0x3d1   : > { %6361 = vmatmul.mubr.msk.bf16.vlgmr.msra.gmra.mrb[48].mxu1 %vm440_vm1, %v6828_v39 }
 0x3d2   : > { %6364 = vmatprep.mubr.msk.bf16.mxu1 %vm440_vm1, %v6829_v3 }
 0x3d9   : > { %6365 = vmatmul.mubr.msk.bf16.gmra.mrb[52].mxu1 %vm440_vm1, %v6830_v26 }
 0x3da   : > { %6368 = vmatprep.mubr.msk.bf16.mxu1 %vm440_vm1, %v6831_v4 }
 0x3e1   : > { %6369 = vmatmul.mubr.msk.bf16.gmra.mrb[56].mxu1 %vm440_vm1, %v6832_v24 }
 0x3e2   : > { %6372 = vmatprep.mubr.msk.bf16.mxu1 %vm440_vm1, %v6833_v41 }
 0x3e9   : > { %6373 = vmatmul.mubr.msk.bf16.gmra.mrb[60].mxu1 %vm440_vm1, %v6834_v53 }
 0x484   : > { %v6344_v0 = vpop.f32.mrb[32].mxu1 }
 0x485   : > { %v4880_v19 = vpop.f32.mrb[33].mxu1  ;;  %v4968_v49 = vmul.f32 %v6344_v0, %v8206_v11 }
 0x486   : > { %v6345_v30 = vpop.f32.mrb[34].mxu1  ;;  %v4966_v54 = vmul.f32 %v8206_v11, %v4880_v19 }
 0x487   : > { %v4883_v45 = vpop.f32.mrb[35].mxu1  ;;  %v4969_v43 = vmul.f32 %v6345_v30, %v8206_v11  ;;  %v4991_v27 = vadd.f32 %v8217_v35, %v4968_v49 }
 0x488   : > { %v4967_v48 = vmul.f32 %v8206_v11, %v4883_v45  ;;  %v4989_v50 = vadd.f32 %v8217_v35, %v4966_v54 }
 0x489   : > { %v4992_v14 = vadd.f32 %v8217_v35, %v4969_v43 }
 0x48a   : > { %v4990_v56 = vadd.f32 %v8217_v35, %v4967_v48 }
 0x48c   : > { %v6348_v34 = vpop.f32.mrb[36].mxu1 }
 0x48d   : > { %v4896_v63 = vpop.f32.mrb[37].mxu1  ;;  %v4972_v62 = vmul.f32 %v6348_v34, %v8206_v11 }
 0x48e   : > { %v6349_v40 = vpop.f32.mrb[38].mxu1  ;;  %v4970_v37 = vmul.f32 %v8206_v11, %v4896_v63 }
 0x48f   : > { %v4899_v55 = vpop.f32.mrb[39].mxu1  ;;  %v4973_v32 = vmul.f32 %v6349_v40, %v8206_v11  ;;  %v4995_v33 = vadd.f32 %v8217_v35, %v4972_v62 }
 0x490   : > { %v4971_v22 = vmul.f32 %v8206_v11, %v4899_v55  ;;  %v4993_v39 = vadd.f32 %v8217_v35, %v4970_v37 }
 0x491   : > { %v4996_v4 = vadd.f32 %v8217_v35, %v4973_v32 }
 0x492   : > { %v4994_v53 = vadd.f32 %v8217_v35, %v4971_v22 }
 0x494   : > { %v6352_v10 = vpop.f32.mrb[40].mxu1 }
 0x495   : > { %v4912_v25 = vpop.f32.mrb[41].mxu1  ;;  %v4976_v30 = vmul.f32 %v6352_v10, %v8206_v11 }
 0x496   : > { %v8191_v46 = vpop.f32.mrb[42].mxu1  ;;  %v4974_v34 = vmul.f32 %v8206_v11, %v4912_v25 }
 0x497   : > { %v8193_v15 = vpop.f32.mrb[43].mxu1  ;;  %v4977_v55 = vmul.f32 %v8191_v46, %v8206_v11  ;;  %v4999_v10 = vadd.f32 %v8217_v35, %v4976_v30 }
 0x49c   : > { %v8195_v58 = vpop.f32.mrb[44].mxu1 }
 0x49d   : > { %v8197_v52 = vpop.f32.mrb[45].mxu1 }
 0x49e   : > { %v8199_v36 = vpop.f32.mrb[46].mxu1 }
 0x49f   : > { %v8201_v60 = vpop.f32.mrb[47].mxu1 }
 0x4a0   : > { %v4979_v62 = vmul.f32 %v8206_v11, %v8201_v60 }
 0x4a2   : > { %v5002_v22 = vadd.f32 %v8217_v35, %v4979_v62 }
 0x4a4   : > { %v6362_v6 = vpop.f32.mrb[48].mxu1 }
 0x4a5   : > { %v5179_v8 = vmul.f32 %v6362_v6, %v8211_v2  ;;  %v5107_v9 = vpop.f32.mrb[49].mxu1  ;;  %v4975_v6 = vmul.f32 %v8206_v11, %v8193_v15 }
 0x4a6   : > { %v5177_v12 = vmul.f32 %v8211_v2, %v5107_v9  ;;  %v6363_v59 = vpop.f32.mrb[50].mxu1 }
 0x4a7   : > { %v5202_v51 = vadd.f32 %v8223_v44, %v5179_v8  ;;  %v5180_v61 = vmul.f32 %v6363_v59, %v8211_v2  ;;  %v5110_v28 = vpop.f32.mrb[51].mxu1 }
 0x4a8   : > { %v5178_v1 = vmul.f32 %v8211_v2, %v5110_v28  ;;  %v5200_v23 = vadd.f32 %v8223_v44, %v5177_v12  ;;  %v4997_v12 = vadd.f32 %v8217_v35, %v4974_v34 }
 0x4a9   : > { %v5203_v21 = vadd.f32 %v8223_v44, %v5180_v61  ;;  %v5218_v47 = vadd.f32 %v5202_v51, %v4991_v27  ;;  %v5000_v27 = vadd.f32 %v8217_v35, %v4977_v55  ;;  %v4998_v61 = vadd.f32 %v8217_v35, %v4975_v6 }
 0x4aa   : > { %v5201_v18 = vadd.f32 %v8223_v44, %v5178_v1  ;;  %v5216_v29 = vadd.f32 %v5200_v23, %v4989_v50  ;;  %v4980_v50 = vmul.f32 %v8195_v58, %v8206_v11 }
 0x4ab   : > { %v5219_v31 = vadd.f32 %v5203_v21, %v4992_v14  ;;  %v4978_v14 = vmul.f32 %v8206_v11, %v8197_v52 }
 0x4ac   : > { %v6366_v42 = vpop.f32.mrb[52].mxu1  ;;  %5232 = vxpose.xlu0.b32.start [1/16] (narrow) %v5216_v29, 8  ;;  %v5217_v16 = vadd.f32 %v5201_v18, %v4990_v56  ;;  %v4981_v56 = vmul.f32 %v8199_v36, %v8206_v11  ;;  %v5003_v58 = vadd.f32 %v8217_v35, %v4980_v50 }
 0x4ad   : > { %v5183_v20 = vmul.f32 %v6366_v42, %v8211_v2  ;;  %v5123_v13 = vpop.f32.mrb[53].mxu1  ;;  %v5001_v32 = vadd.f32 %v8217_v35, %v4978_v14 }
 0x4ae   : > { %v5181_v17 = vmul.f32 %v8211_v2, %v5123_v13  ;;  %v6367_v5 = vpop.f32.mrb[54].mxu1  ;;  %v5004_v13 = vadd.f32 %v8217_v35, %v4981_v56 }
 0x4af   : > { %v5206_v7 = vadd.f32 %v8223_v44, %v5183_v20  ;;  %v5184_v57 = vmul.f32 %v6367_v5, %v8211_v2  ;;  %v5126_v38 = vpop.f32.mrb[55].mxu1 }
 0x4b0   : > { %v5204_v3 = vadd.f32 %v8223_v44, %v5181_v17  ;;  %v5182_v26 = vmul.f32 %v8211_v2, %v5126_v38  ;;  %5233 = vxpose.xlu0.b32.cont [2/16] (narrow) %v5217_v16, 8 }
 0x4b1   : > { %v5207_v24 = vadd.f32 %v8223_v44, %v5184_v57  ;;  %v5222_v41 = vadd.f32 %v5206_v7, %v4995_v33 }
 0x4b2   : > { %v5205_v0 = vadd.f32 %v8223_v44, %v5182_v26  ;;  %v5220_v19 = vadd.f32 %v5204_v3, %v4993_v39 }
 0x4b3   : > { %v5223_v45 = vadd.f32 %v5207_v24, %v4996_v4 }
 0x4b4   : > { %v6370_v63 = vpop.f32.mrb[56].mxu1  ;;  %5234 = vxpose.xlu0.b32.cont [3/16] (narrow) %v5218_v47, 8  ;;  %v5221_v40 = vadd.f32 %v5205_v0, %v4994_v53 }
 0x4b5   : > { %v5187_v49 = vmul.f32 %v6370_v63, %v8211_v2  ;;  %v5139_v54 = vpop.f32.mrb[57].mxu1 }
 0x4b6   : > { %v5185_v43 = vmul.f32 %v8211_v2, %v5139_v54  ;;  %v6371_v8 = vpop.f32.mrb[58].mxu1 }
 0x4b7   : > { %v5210_v9 = vadd.f32 %v8223_v44, %v5187_v49  ;;  %v5188_v25 = vmul.f32 %v6371_v8, %v8211_v2  ;;  %v5142_v48 = vpop.f32.mrb[59].mxu1 }
 0x4b8   : > { %v5208_v46 = vadd.f32 %v8223_v44, %v5185_v43  ;;  %v5186_v59 = vmul.f32 %v8211_v2, %v5142_v48  ;;  %5235 = vxpose.xlu0.b32.cont [4/16] (narrow) %v5219_v31, 8 }
 0x4b9   : > { %v5211_v15 = vadd.f32 %v8223_v44, %v5188_v25  ;;  %v5226_v51 = vadd.f32 %v5210_v9, %v4999_v10 }
 0x4ba   : > { %v5209_v28 = vadd.f32 %v8223_v44, %v5186_v59  ;;  %v5224_v1 = vadd.f32 %v5208_v46, %v4997_v12 }
 0x4bb   : > { %v5227_v23 = vadd.f32 %v5211_v15, %v5000_v27 }
 0x4bc   : > { %v6374_v21 = vpop.f32.mrb[60].mxu1  ;;  %5236 = vxpose.xlu0.b32.cont [5/16] (narrow) %v5220_v19, 8  ;;  %v5225_v47 = vadd.f32 %v5209_v28, %v4998_v61 }
 0x4bd   : > { %v5191_v18 = vmul.f32 %v6374_v21, %v8211_v2  ;;  %v5155_v29 = vpop.f32.mrb[61].mxu1 }
 0x4be   : > { %v5189_v31 = vmul.f32 %v8211_v2, %v5155_v29  ;;  %v6375_v37 = vpop.f32.mrb[62].mxu1 }
 0x4bf   : > { %v5214_v42 = vadd.f32 %v8223_v44, %v5191_v18  ;;  %v5192_v52 = vmul.f32 %v6375_v37, %v8211_v2  ;;  %v5158_v16 = vpop.f32.mrb[63].mxu1 }
 0x4c0   : > { %v5212_v36 = vadd.f32 %v8223_v44, %v5189_v31  ;;  %v5190_v20 = vmul.f32 %v8211_v2, %v5158_v16  ;;  %5237 = vxpose.xlu0.b32.cont [6/16] (narrow) %v5221_v40, 8 }
 0x4c1   : > { %v5215_v60 = vadd.f32 %v8223_v44, %v5192_v52  ;;  %v5230_v11 = vadd.f32 %v5214_v42, %v5003_v58 }
 0x4c2   : > { %v5213_v17 = vadd.f32 %v8223_v44, %v5190_v20  ;;  %v5228_v5 = vadd.f32 %v5212_v36, %v5001_v32 }
 0x4c3   : > { %v5231_v33 = vadd.f32 %v5215_v60, %v5004_v13 }
 0x4c4   : > { %5238 = vxpose.xlu0.b32.cont [7/16] (narrow) %v5222_v41, 8  ;;  %v5229_v7 = vadd.f32 %v5213_v17, %v5002_v22 }
 0x4c8   : > { %5239 = vxpose.xlu0.b32.cont [8/16] (narrow) %v5223_v45, 8 }
 0x4cc   : > { %5240 = vxpose.xlu0.b32.cont [9/16] (narrow) %v5224_v1, 8 }
 0x4d0   : > { %5241 = vxpose.xlu0.b32.cont [10/16] (narrow) %v5225_v47, 8 }
 0x4d4   : > { %5242 = vxpose.xlu0.b32.cont [11/16] (narrow) %v5226_v51, 8 }
 0x4d8   : > { %5243 = vxpose.xlu0.b32.cont [12/16] (narrow) %v5227_v23, 8 }
 0x4dc   : > { %5244 = vxpose.xlu0.b32.cont [13/16] (narrow) %v5228_v5, 8 }
 0x4e0   : > { %5245 = vxpose.xlu0.b32.cont [14/16] (narrow) %v5229_v7, 8 }
 0x4e4   : > { %5246 = vxpose.xlu0.b32.cont [15/16] (narrow) %v5230_v11, 8 }
 0x4e8   : > { %5247 = vxpose.xlu0.b32.end [16/16] (narrow) %v5231_v33, 8 }
 0x52c   : > { %v5248_v2 = vpop.trf.xlu0 }
 0x52d   : > { %5264 = vst [vmem:[%s433_s23] sm:$0xff] %v5248_v2 }
 0x52e   : > { %6848 = shalt.err (!%p6845_p3)
}
 0x52f   : > { %s6849_s22 = scalar_lea.hbm %s8300_s21, 128  ;;  %s6853_s15 = scalar_lea.hbm %s8353_s13, 256 }
 0x530   : > { %p6850_p4 = scmp.ne.s32.totalorder %s8300_s21, %s6849_s22  ;;  %p6854_p9 = scmp.lt.u32.totalorder %s8300_s21, %s8353_s13 }
 0x531   : > { %p6855_p10 = scmp.lt.u32.totalorder %s6853_s15, %s6849_s22  ;;  %p6857_p12 = scmp.lt.u32.totalorder %s6849_s22, %s8300_s21 }
 0x532   : > { %p6851_p7 = pnand %p6850_p4, %p7009_p5 }
 0x533   : > { %p6856_p11 = por %p6855_p10, %p6854_p9 }
 0x534   : > { %p6852_p8 = pneg %p6851_p7 }
 0x535   : > { %p6858_p13 = por %p6857_p12, %p6856_p11 }
 0x537   : > { %p6859_p0 = pnand %p6858_p13, %p6852_p8 }
 0x539   : > { %6862 = shalt.err (!%p6859_p0)
}
 0x53a   : > { %6779 = dma.vmem_to_hbm [thread:$0]  (%p7009_p5), %s8295_s24, 128, %s8300_s21, %s5266_s17  }
 0x53b PF: > { %p6785_p1 = scmp.ge.s32.totalorder %s6897_s28, 2  ;;  %s5291_s0 = sand.u32 1, %s6885_s25  }
 0x53c   : > { %s5292_s1 = scalar_lea.sflag [#allocation5], %s5291_s0 }
 0x53d   : > { %p6782_p2 = pnand %p6785_p1, %p7013_p6 }
 0x53f   : > { %6880 = dma.done.wait (!%p6782_p2), %s5292_s1, 128  }
 0x540   : > { %6882 = vsyncadd (!%p6782_p2), %s5292_s1, 4294967168  ;;  %s8361_s29 = sld [smem:[#allocation7_spill]]  ;;  %p23_p3 = scmp.ge.s32.totalorder %s6996_s14, 4  }
 0x541   : > { %s8362_s25 = smov %s6889_s26  ;;  %s8363_s26 = smov %s6893_s27 }
 0x542   : > { %s8365_s28 = smov %s6996_s14  ;;  %25 = sbr.rel (!%p23_p3) target bundleno = 6 (0x6), region = 129 }
 0x546   : > { %s8364_s27 = smov %s8361_s29 }
 0x549   :  { %5297 = vsyncpa [#allocation5], 1 }
 0x54a   :  { %5299 = vsyncpa [#allocation5 + $0x1], 1 }

</bundles_post_ra>
